<compile_context>
chip_gen: v6e
topology: v6e:2x2x1
jax: 0.10.0
libtpu: 0.0.40
codegen_flags: <defaults>
</compile_context>

<pallas_src>
import functools

import jax
import jax.numpy as jnp
from jax.experimental import pallas as pl
from jax.experimental.pallas import tpu as pltpu


_H_IN = 10     # fc1 expects 128*2*2 = 512 features -> 10x10 input is required
_W1 = 12       # conv1/conv2 padded spatial grid (10x10 + 1-ring)
_W3 = 6        # conv3 padded spatial grid (4x4 pool1 output + 1-ring)
_HALO1 = 16    # row halo around each tile's 12x12 grid (needs >= 13)
_HALO3 = 8     # row halo around each tile's 6x6 grid  (needs >= 7)


# ---------------------------------------------------------------------------
# The single fused kernel (one grid step = TB images)
# ---------------------------------------------------------------------------
def _fused_cnn_kernel(x_ref, w1_ref, b1_ref, w2_ref, b2_ref, w3_ref, b3_ref,
                      fw1_ref, fb1_ref, fw2_ref, fb2_ref, sm_ref,
                      out_ref,
                      a1_ref, xc2_ref, a2_ref, pm1_ref, p3_ref,
                      xc3_ref, a3_ref, pm3_ref, p2_ref,
                      *, tb, restrict):
    f32 = jnp.float32
    cdt = a1_ref.dtype                       # compute dtype (bf16 or f32)
    M1 = tb * _W1 * _W1                      # rows on the padded 12x12 grid
    M3 = tb * _W3 * _W3                      # rows on the padded 6x6 grid
    C1 = w1_ref.shape[-1]                    # 64
    C2 = w2_ref.shape[-1]                    # 64
    C3 = w3_ref.shape[-1]                    # 128

    def mm_bias_relu(a, w_ref, b_ref):       # MXU matmul, f32 acc + epilogue
        acc = jnp.dot(a, w_ref[...], preferred_element_type=f32)
        return jnp.maximum(acc + b_ref[...], 0.0)

    # conv1 + relu: ONE wide-K matmul (K = 9*Cin) over the wrapper-built
    # im2col of the 12x12 padded grid.  a1's halo rows stay uninitialized:
    # they only feed conv2 outputs at border positions that are never read
    # downstream, so no full-buffer zero fill is needed.
    a1_ref[pl.ds(_HALO1, M1), :] = mm_bias_relu(
        x_ref[...], w1_ref, b1_ref).astype(cdt)

    # conv2 + relu: lane-axis im2col in VMEM (9 shifted full slabs -> K=576),
    # then ONE matmul against the [576, 64] repacked weight.
    t = 0
    for kh in range(3):
        for kw in range(3):
            shift = (kh - 1) * _W1 + (kw - 1)
            xc2_ref[:, t * C1:(t + 1) * C1] = a1_ref[pl.ds(_HALO1 + shift, M1), :]
            t += 1
    a2_ref[0:M1, :] = mm_bias_relu(xc2_ref[...], w2_ref, b2_ref).astype(cdt)

    # maxpool 2x2/2 #1, vectorized: full-slab max over the 4 row-shifted views
    # (0, +1, +W, +W+1), then one stride-2 compaction per pooled output row
    # into the interior of the zero-padded 6x6 grid feeding conv3.
    pm1_ref[...] = jnp.maximum(
        jnp.maximum(a2_ref[pl.ds(0, M1), :], a2_ref[pl.ds(1, M1), :]),
        jnp.maximum(a2_ref[pl.ds(_W1, M1), :], a2_ref[pl.ds(_W1 + 1, M1), :]))
    p3_ref[...] = jnp.zeros(p3_ref.shape, cdt)   # ring gives conv3's pad=1
    for b in range(tb):
        for i in range(4):
            src = b * 144 + 24 * i + 26          # window anchored at (2i+2, 2)
            dst = _HALO3 + b * 36 + 6 * (i + 1) + 1
            p3_ref[pl.ds(dst, 4), :] = pm1_ref[pl.ds(src, 4, stride=2), :]

    # conv3 + relu: same lane-axis im2col trick (K = 576 again).
    t = 0
    for kh in range(3):
        for kw in range(3):
            shift = (kh - 1) * _W3 + (kw - 1)
            xc3_ref[:, t * C2:(t + 1) * C2] = p3_ref[pl.ds(_HALO3 + shift, M3), :]
            t += 1
    a3_ref[0:M3, :] = mm_bias_relu(xc3_ref[...], w3_ref, b3_ref).astype(cdt)

    # maxpool 2x2/2 #2 (vectorized shifted max) + NCHW flatten: the four 2x2
    # spatial positions are concatenated along 128-aligned lane offsets, so
    # p2 is [tb, 512] and fc1 becomes a single K=512 matmul.
    pm3_ref[...] = jnp.maximum(
        jnp.maximum(a3_ref[pl.ds(0, M3), :], a3_ref[pl.ds(1, M3), :]),
        jnp.maximum(a3_ref[pl.ds(_W3, M3), :], a3_ref[pl.ds(_W3 + 1, M3), :]))
    for b in range(tb):
        for i in range(2):
            for j in range(2):
                p = 2 * i + j
                src = b * 36 + 12 * i + 2 * j + 7   # anchored at (2i+1, 2j+1)
                p2_ref[b:b + 1, p * C3:(p + 1) * C3] = pm3_ref[pl.ds(src, 1), :]

    # fc1 + relu (one K=512 matmul), fc2, optional tanh*scale + mean
    # (scale/mean are runtime SMEM scalars -> no recompile when they change).
    y = jnp.dot(p2_ref[...], fw1_ref[...], preferred_element_type=f32)
    y = jnp.maximum(y + fb1_ref[...], 0.0)
    y = jnp.dot(y.astype(cdt), fw2_ref[...], preferred_element_type=f32)
    y = y + fb2_ref[...]
    if restrict:
        y = jnp.tanh(y) * sm_ref[0] + sm_ref[1]
    out_ref[...] = y.astype(out_ref.dtype)


# ---------------------------------------------------------------------------
# One-time weight repacking (tap-major wide-K conv weights, flatten-permuted
# fc1).  dtype=bf16 is the production default (f32 accumulation in-kernel).
# ---------------------------------------------------------------------------
def prepare_params(params, dtype=jnp.bfloat16):
    f32 = jnp.float32

    def conv_w(w):       # torch OIHW [Cout, Cin, 3, 3] -> [9*Cin, Cout]
        co, ci, kh, kw = w.shape
        return jnp.transpose(w, (2, 3, 1, 0)).reshape(kh * kw * ci, co).astype(dtype)

    # fc1: torch flatten index = c*4 + (h*2 + w); repack to [(p*128 + c), out]
    # so fc1 is one K=512 matmul against the lane-concatenated pooled features.
    fc1_w = params["fc1_w"].astype(f32)                        # [128, 512]
    fw1 = jnp.transpose(fc1_w.reshape(fc1_w.shape[0], -1, 4), (2, 1, 0))
    fw1 = fw1.reshape(-1, fc1_w.shape[0])                      # [512, 128]

    return {
        "w1": conv_w(params["w1"]), "b1": params["b1"].reshape(1, -1).astype(f32),
        "w2": conv_w(params["w2"]), "b2": params["b2"].reshape(1, -1).astype(f32),
        "w3": conv_w(params["w3"]), "b3": params["b3"].reshape(1, -1).astype(f32),
        "fw1": fw1.astype(dtype),
        "fb1": params["fc1_b"].reshape(1, -1).astype(f32),
        "fw2": jnp.transpose(params["fc2_w"]).astype(dtype),   # [128, out_dim]
        "fb2": params["fc2_b"].reshape(1, -1).astype(f32),
    }


# ---------------------------------------------------------------------------
# Forward wrapper: boundary layout work (conv1 im2col) + one pallas_call
# over a batch-tiled "parallel" grid.
# ---------------------------------------------------------------------------
def simple_cnn_small3_forward(prep, x, min_output=None, max_output=None,
                              block_batch=None):
    B, cin, H, W = x.shape
    assert H == _H_IN and W == _H_IN, "fc1(512) requires a 10x10 input"
    cdt = prep["w1"].dtype                    # compute dtype comes from prep
    n_out = prep["fw2"].shape[-1]
    C1 = prep["w1"].shape[-1]
    C2 = prep["w2"].shape[-1]
    C3 = prep["w3"].shape[-1]

    # conv1 im2col at the model boundary: NCHW -> NHWC, zero-pad to 14x14,
    # gather the 9 shifted 12x12 windows along channels -> [B*144, 9*Cin].
    xt = jnp.transpose(x, (0, 2, 3, 1)).astype(cdt)
    xp = jnp.pad(xt, ((0, 0), (2, 2), (2, 2), (0, 0)))
    cols = [xp[:, kh:kh + _W1, kw:kw + _W1, :]
            for kh in range(3) for kw in range(3)]
    xcol = jnp.concatenate(cols, axis=-1).reshape(B * _W1 * _W1, 9 * cin)

    # Batch tile: bounds per-step VMEM (~0.3 MiB / image in bf16, well inside
    # v7x's 64 MiB) and, with a "parallel" grid axis, lets the two v7x
    # TensorCores split the batch while Pallas double-buffers the input tiles.
    if block_batch is not None:
        tb = block_batch
    elif B <= 8:
        tb = B
    else:
        tb = next(d for d in (8, 4, 2, 1) if B % d == 0)
    assert B % tb == 0
    grid = (B // tb,)

    restrict = (min_output is not None) and (max_output is not None)
    scale = (max_output - min_output) / 2.0 if restrict else 1.0
    mean = (min_output + max_output) / 2.0 if restrict else 0.0
    sm = jnp.asarray([scale, mean], jnp.float32)   # runtime SMEM scalars

    def resident(a):   # weights: constant block index -> stay VMEM-resident
        nd = a.ndim
        return pl.BlockSpec(a.shape, lambda i, _nd=nd: (0,) * _nd)

    M1 = tb * _W1 * _W1
    M3 = tb * _W3 * _W3
    in_specs = [
        pl.BlockSpec((M1, 9 * cin), lambda i: (i, 0)),       # conv1 im2col tile
        resident(prep["w1"]), resident(prep["b1"]),
        resident(prep["w2"]), resident(prep["b2"]),
        resident(prep["w3"]), resident(prep["b3"]),
        resident(prep["fw1"]), resident(prep["fb1"]),
        resident(prep["fw2"]), resident(prep["fb2"]),
        pl.BlockSpec(memory_space=pltpu.MemorySpace.SMEM),   # [scale, mean]
    ]

    kernel = functools.partial(_fused_cnn_kernel, tb=tb, restrict=restrict)
    return pl.pallas_call(
        kernel,
        out_shape=jax.ShapeDtypeStruct((B, n_out), jnp.float32),
        grid=grid,
        in_specs=in_specs,
        out_specs=pl.BlockSpec((tb, n_out), lambda i: (i, 0)),
        scratch_shapes=[
            pltpu.VMEM((M1 + 2 * _HALO1, C1), cdt),   # a1  conv1 out (haloed)
            pltpu.VMEM((M1, 9 * C1), cdt),            # xc2 conv2 im2col (K=576)
            pltpu.VMEM((M1 + 16, C2), cdt),           # a2  conv2 out (+pool tail)
            pltpu.VMEM((M1, C2), cdt),                # pm1 pool1 window max
            pltpu.VMEM((M3 + 2 * _HALO3, C2), cdt),   # p3  padded conv3 input
            pltpu.VMEM((M3, 9 * C2), cdt),            # xc3 conv3 im2col (K=576)
            pltpu.VMEM((M3 + 8, C3), cdt),            # a3  conv3 out (+pool tail)
            pltpu.VMEM((M3, C3), cdt),                # pm3 pool2 window max
            pltpu.VMEM((tb, 4 * C3), cdt),            # p2  flattened [tb, 512]
        ],
        compiler_params=pltpu.CompilerParams(
            dimension_semantics=("parallel",)),
    )(xcol, prep["w1"], prep["b1"], prep["w2"], prep["b2"],
      prep["w3"], prep["b3"], prep["fw1"], prep["fb1"],
      prep["fw2"], prep["fb2"], sm)


# ---------------------------------------------------------------------------
# Parameters (PyTorch-style init) and a pure-JAX reference for checking
# ---------------------------------------------------------------------------
def init_params(key, input_channels, output_dim):
    keys = jax.random.split(key, 10)

    def unif(k, shape, fan_in):
        bound = 1.0 / jnp.sqrt(jnp.float32(fan_in))
        return jax.random.uniform(k, shape, jnp.float32, -bound, bound)

    return {
        "w1": unif(keys[0], (64, input_channels, 3, 3), input_channels * 9),
        "b1": unif(keys[1], (64,), input_channels * 9),
        "w2": unif(keys[2], (64, 64, 3, 3), 64 * 9),
        "b2": unif(keys[3], (64,), 64 * 9),
        "w3": unif(keys[4], (128, 64, 3, 3), 64 * 9),
        "b3": unif(keys[5], (128,), 64 * 9),
        "fc1_w": unif(keys[6], (128, 512), 512),   # PyTorch Linear: [out, in]
        "fc1_b": unif(keys[7], (128,), 512),
        "fc2_w": unif(keys[8], (output_dim, 128), 128),
        "fc2_b": unif(keys[9], (output_dim,), 128),
    }


def reference_forward(params, x, min_output=None, max_output=None):
    def conv(x, w, b, pad):
        y = jax.lax.conv_general_dilated(
            x, w, window_strides=(1, 1), padding=[(pad, pad), (pad, pad)],
            dimension_numbers=("NCHW", "OIHW", "NCHW"))
        return jax.nn.relu(y + b[None, :, None, None])

    def pool(x):
        return jax.lax.reduce_window(x, -jnp.inf, jax.lax.max,
                                     (1, 1, 2, 2), (1, 1, 2, 2), "VALID")

    x = conv(x, params["w1"], params["b1"], 1)
    x = conv(x, params["w2"], params["b2"], 0)
    x = pool(x)
    x = conv(x, params["w3"], params["b3"], 1)
    x = pool(x)
    x = x.reshape(x.shape[0], -1)
    x = jax.nn.relu(x @ params["fc1_w"].T + params["fc1_b"])
    x = x @ params["fc2_w"].T + params["fc2_b"]
    if min_output is not None and max_output is not None:
        mean = (min_output + max_output) / 2.0
        scale = (max_output - min_output) / 2.0
        x = jnp.tanh(x) * scale + mean
    return x


if __name__ == "__main__":
    key = jax.random.PRNGKey(0)
    k_params, k_x = jax.random.split(key)

    input_channels, output_dim = 4, 8
    batch, spatial = 2, 10            # spatial=10 is forced by the 512-wide flatten
    min_out, max_out = -2.0, 2.0      # exercise the restrict_output (tanh) path

    params = init_params(k_params, input_channels, output_dim)
    x = jax.random.normal(k_x, (batch, input_channels, spatial, spatial),
                          jnp.float32)

    ref_r = reference_forward(params, x, min_out, max_out)
    ref_u = reference_forward(params, x)

    # f32 operand path: tight numerical check against the pure-JAX reference.
    prep32 = prepare_params(params, dtype=jnp.float32)
    out = jax.block_until_ready(
        simple_cnn_small3_forward(prep32, x, min_out, max_out))
    assert out.shape == (batch, output_dim), out.shape
    assert jnp.allclose(out, ref_r, rtol=1e-4, atol=1e-4), (out, ref_r)
    out2 = jax.block_until_ready(simple_cnn_small3_forward(prep32, x))
    assert jnp.allclose(out2, ref_u, rtol=1e-4, atol=1e-4), (out2, ref_u)

    # bf16 production default (bf16 MXU operands, f32 accumulation): relaxed.
    prep16 = prepare_params(params)   # bf16
    out3 = jax.block_until_ready(
        simple_cnn_small3_forward(prep16, x, min_out, max_out))
    assert jnp.allclose(out3, ref_r, rtol=5e-2, atol=5e-2), (out3, ref_r)

    print("KERNEL_OK")
</pallas_src>

<mosaic_0001>
module attributes {stable_mosaic.version = 11 : i64} {
  func.func @_fused_cnn_kernel(%arg0: i32, %arg1: memref<288x36xf32, #tpu.memory_space<vmem>>, %arg2: memref<36x64xf32, #tpu.memory_space<vmem>>, %arg3: memref<1x64xf32, #tpu.memory_space<vmem>>, %arg4: memref<576x64xf32, #tpu.memory_space<vmem>>, %arg5: memref<1x64xf32, #tpu.memory_space<vmem>>, %arg6: memref<576x128xf32, #tpu.memory_space<vmem>>, %arg7: memref<1x128xf32, #tpu.memory_space<vmem>>, %arg8: memref<512x128xf32, #tpu.memory_space<vmem>>, %arg9: memref<1x128xf32, #tpu.memory_space<vmem>>, %arg10: memref<128x8xf32, #tpu.memory_space<vmem>>, %arg11: memref<1x8xf32, #tpu.memory_space<vmem>>, %arg12: memref<2xf32, #tpu.memory_space<smem>>, %arg13: memref<2x8xf32, #tpu.memory_space<vmem>>, %arg14: memref<320x64xf32, #tpu.memory_space<vmem>>, %arg15: memref<288x576xf32, #tpu.memory_space<vmem>>, %arg16: memref<304x64xf32, #tpu.memory_space<vmem>>, %arg17: memref<288x64xf32, #tpu.memory_space<vmem>>, %arg18: memref<88x64xf32, #tpu.memory_space<vmem>>, %arg19: memref<72x576xf32, #tpu.memory_space<vmem>>, %arg20: memref<80x128xf32, #tpu.memory_space<vmem>>, %arg21: memref<72x128xf32, #tpu.memory_space<vmem>>, %arg22: memref<2x512xf32, #tpu.memory_space<vmem>>) attributes {dimension_semantics = [#tpu.dimension_semantics<parallel>], iteration_bounds = array<i64: 1>, scalar_prefetch = 0 : i64, scratch_operands = 9 : i64, tpu.core_type = #tpu.core_type<tc>, window_params = [{transform_indices = @transform_0, window_bounds = array<i64: 288, 36>}, {pipeline_mode = #tpu.pipeline_mode<synchronous>, transform_indices = @transform_1, window_bounds = array<i64: 36, 64>}, {pipeline_mode = #tpu.pipeline_mode<synchronous>, transform_indices = @transform_2, window_bounds = array<i64: 1, 64>}, {pipeline_mode = #tpu.pipeline_mode<synchronous>, transform_indices = @transform_3, window_bounds = array<i64: 576, 64>}, {pipeline_mode = #tpu.pipeline_mode<synchronous>, transform_indices = @transform_4, window_bounds = array<i64: 1, 64>}, {pipeline_mode = #tpu.pipeline_mode<synchronous>, transform_indices = @transform_5, window_bounds = array<i64: 576, 128>}, {pipeline_mode = #tpu.pipeline_mode<synchronous>, transform_indices = @transform_6, window_bounds = array<i64: 1, 128>}, {pipeline_mode = #tpu.pipeline_mode<synchronous>, transform_indices = @transform_7, window_bounds = array<i64: 512, 128>}, {pipeline_mode = #tpu.pipeline_mode<synchronous>, transform_indices = @transform_8, window_bounds = array<i64: 1, 128>}, {pipeline_mode = #tpu.pipeline_mode<synchronous>, transform_indices = @transform_9, window_bounds = array<i64: 128, 8>}, {pipeline_mode = #tpu.pipeline_mode<synchronous>, transform_indices = @transform_10, window_bounds = array<i64: 1, 8>}, {transform_indices = @transform_11, window_bounds = array<i64: 2>}, {transform_indices = @transform_12, window_bounds = array<i64: 2, 8>}]} {
    %c0 = arith.constant 0 : index
    %c0_0 = arith.constant 0 : index
    %0 = vector.load %arg1[%c0, %c0_0] : memref<288x36xf32, #tpu.memory_space<vmem>>, vector<288x36xf32>
    %c0_1 = arith.constant 0 : index
    %c0_2 = arith.constant 0 : index
    %1 = vector.load %arg2[%c0_1, %c0_2] : memref<36x64xf32, #tpu.memory_space<vmem>>, vector<36x64xf32>
    %cst = arith.constant dense<0.000000e+00> : vector<288x64xf32>
    %2 = tpu.matmul %0, %1, %cst {dimension_numbers = #tpu.dot_dimension_numbers<[1], [0], [0], [1], [0, 0, 1, 1], [], []>} : vector<288x36xf32>, vector<36x64xf32>, vector<288x64xf32> -> vector<288x64xf32>
    %c0_3 = arith.constant 0 : index
    %c0_4 = arith.constant 0 : index
    %3 = vector.load %arg3[%c0_3, %c0_4] : memref<1x64xf32, #tpu.memory_space<vmem>>, vector<1x64xf32>
    %4 = vector.broadcast %3 : vector<1x64xf32> to vector<288x64xf32>
    %5 = arith.addf %2, %4 : vector<288x64xf32>
    %cst_5 = arith.constant 0.000000e+00 : f32
    %6 = vector.broadcast %cst_5 : f32 to vector<288x64xf32>
    %7 = arith.maximumf %5, %6 : vector<288x64xf32>
    %c16 = arith.constant 16 : index
    %c0_6 = arith.constant 0 : index
    %8 = vector.load %arg14[%c16, %c0_6] : memref<320x64xf32, #tpu.memory_space<vmem>>, vector<288x64xf32>
    tpu.vector_store %arg14[%c16, %c0_6], %7 {strides = array<i32>} : memref<320x64xf32, #tpu.memory_space<vmem>>, vector<288x64xf32>,
    %c3 = arith.constant 3 : index
    %c0_7 = arith.constant 0 : index
    %9 = vector.load %arg14[%c3, %c0_7] : memref<320x64xf32, #tpu.memory_space<vmem>>, vector<288x64xf32>
    %c0_8 = arith.constant 0 : index
    %c0_9 = arith.constant 0 : index
    %10 = vector.load %arg15[%c0_8, %c0_9] : memref<288x576xf32, #tpu.memory_space<vmem>>, vector<288x64xf32>
    tpu.vector_store %arg15[%c0_8, %c0_9], %9 {strides = array<i32>} : memref<288x576xf32, #tpu.memory_space<vmem>>, vector<288x64xf32>,
    %c4 = arith.constant 4 : index
    %c0_10 = arith.constant 0 : index
    %11 = vector.load %arg14[%c4, %c0_10] : memref<320x64xf32, #tpu.memory_space<vmem>>, vector<288x64xf32>
    %c0_11 = arith.constant 0 : index
    %c64 = arith.constant 64 : index
    %12 = vector.load %arg15[%c0_11, %c64] : memref<288x576xf32, #tpu.memory_space<vmem>>, vector<288x64xf32>
    tpu.vector_store %arg15[%c0_11, %c64], %11 {strides = array<i32>} : memref<288x576xf32, #tpu.memory_space<vmem>>, vector<288x64xf32>,
    %c5 = arith.constant 5 : index
    %c0_12 = arith.constant 0 : index
    %13 = vector.load %arg14[%c5, %c0_12] : memref<320x64xf32, #tpu.memory_space<vmem>>, vector<288x64xf32>
    %c0_13 = arith.constant 0 : index
    %c128 = arith.constant 128 : index
    %14 = vector.load %arg15[%c0_13, %c128] : memref<288x576xf32, #tpu.memory_space<vmem>>, vector<288x64xf32>
    tpu.vector_store %arg15[%c0_13, %c128], %13 {strides = array<i32>} : memref<288x576xf32, #tpu.memory_space<vmem>>, vector<288x64xf32>,
    %c15 = arith.constant 15 : index
    %c0_14 = arith.constant 0 : index
    %15 = vector.load %arg14[%c15, %c0_14] : memref<320x64xf32, #tpu.memory_space<vmem>>, vector<288x64xf32>
    %c0_15 = arith.constant 0 : index
    %c192 = arith.constant 192 : index
    %16 = vector.load %arg15[%c0_15, %c192] : memref<288x576xf32, #tpu.memory_space<vmem>>, vector<288x64xf32>
    tpu.vector_store %arg15[%c0_15, %c192], %15 {strides = array<i32>} : memref<288x576xf32, #tpu.memory_space<vmem>>, vector<288x64xf32>,
    %c16_16 = arith.constant 16 : index
    %c0_17 = arith.constant 0 : index
    %17 = vector.load %arg14[%c16_16, %c0_17] : memref<320x64xf32, #tpu.memory_space<vmem>>, vector<288x64xf32>
    %c0_18 = arith.constant 0 : index
    %c256 = arith.constant 256 : index
    %18 = vector.load %arg15[%c0_18, %c256] : memref<288x576xf32, #tpu.memory_space<vmem>>, vector<288x64xf32>
    tpu.vector_store %arg15[%c0_18, %c256], %17 {strides = array<i32>} : memref<288x576xf32, #tpu.memory_space<vmem>>, vector<288x64xf32>,
    %c17 = arith.constant 17 : index
    %c0_19 = arith.constant 0 : index
    %19 = vector.load %arg14[%c17, %c0_19] : memref<320x64xf32, #tpu.memory_space<vmem>>, vector<288x64xf32>
    %c0_20 = arith.constant 0 : index
    %c320 = arith.constant 320 : index
    %20 = vector.load %arg15[%c0_20, %c320] : memref<288x576xf32, #tpu.memory_space<vmem>>, vector<288x64xf32>
    tpu.vector_store %arg15[%c0_20, %c320], %19 {strides = array<i32>} : memref<288x576xf32, #tpu.memory_space<vmem>>, vector<288x64xf32>,
    %c27 = arith.constant 27 : index
    %c0_21 = arith.constant 0 : index
    %21 = vector.load %arg14[%c27, %c0_21] : memref<320x64xf32, #tpu.memory_space<vmem>>, vector<288x64xf32>
    %c0_22 = arith.constant 0 : index
    %c384 = arith.constant 384 : index
    %22 = vector.load %arg15[%c0_22, %c384] : memref<288x576xf32, #tpu.memory_space<vmem>>, vector<288x64xf32>
    tpu.vector_store %arg15[%c0_22, %c384], %21 {strides = array<i32>} : memref<288x576xf32, #tpu.memory_space<vmem>>, vector<288x64xf32>,
    %c28 = arith.constant 28 : index
    %c0_23 = arith.constant 0 : index
    %23 = vector.load %arg14[%c28, %c0_23] : memref<320x64xf32, #tpu.memory_space<vmem>>, vector<288x64xf32>
    %c0_24 = arith.constant 0 : index
    %c448 = arith.constant 448 : index
    %24 = vector.load %arg15[%c0_24, %c448] : memref<288x576xf32, #tpu.memory_space<vmem>>, vector<288x64xf32>
    tpu.vector_store %arg15[%c0_24, %c448], %23 {strides = array<i32>} : memref<288x576xf32, #tpu.memory_space<vmem>>, vector<288x64xf32>,
    %c29 = arith.constant 29 : index
    %c0_25 = arith.constant 0 : index
    %25 = vector.load %arg14[%c29, %c0_25] : memref<320x64xf32, #tpu.memory_space<vmem>>, vector<288x64xf32>
    %c0_26 = arith.constant 0 : index
    %c512 = arith.constant 512 : index
    %26 = vector.load %arg15[%c0_26, %c512] : memref<288x576xf32, #tpu.memory_space<vmem>>, vector<288x64xf32>
    tpu.vector_store %arg15[%c0_26, %c512], %25 {strides = array<i32>} : memref<288x576xf32, #tpu.memory_space<vmem>>, vector<288x64xf32>,
    %c0_27 = arith.constant 0 : index
    %c0_28 = arith.constant 0 : index
    %27 = vector.load %arg15[%c0_27, %c0_28] : memref<288x576xf32, #tpu.memory_space<vmem>>, vector<288x576xf32>
    %c0_29 = arith.constant 0 : index
    %c0_30 = arith.constant 0 : index
    %28 = vector.load %arg4[%c0_29, %c0_30] : memref<576x64xf32, #tpu.memory_space<vmem>>, vector<576x64xf32>
    %cst_31 = arith.constant dense<0.000000e+00> : vector<288x64xf32>
    %29 = tpu.matmul %27, %28, %cst_31 {dimension_numbers = #tpu.dot_dimension_numbers<[1], [0], [0], [1], [0, 0, 1, 1], [], []>} : vector<288x576xf32>, vector<576x64xf32>, vector<288x64xf32> -> vector<288x64xf32>
    %c0_32 = arith.constant 0 : index
    %c0_33 = arith.constant 0 : index
    %30 = vector.load %arg5[%c0_32, %c0_33] : memref<1x64xf32, #tpu.memory_space<vmem>>, vector<1x64xf32>
    %31 = vector.broadcast %30 : vector<1x64xf32> to vector<288x64xf32>
    %32 = arith.addf %29, %31 : vector<288x64xf32>
    %cst_34 = arith.constant 0.000000e+00 : f32
    %33 = vector.broadcast %cst_34 : f32 to vector<288x64xf32>
    %34 = arith.maximumf %32, %33 : vector<288x64xf32>
    %c0_35 = arith.constant 0 : index
    %c0_36 = arith.constant 0 : index
    %35 = vector.load %arg16[%c0_35, %c0_36] : memref<304x64xf32, #tpu.memory_space<vmem>>, vector<288x64xf32>
    tpu.vector_store %arg16[%c0_35, %c0_36], %34 {strides = array<i32>} : memref<304x64xf32, #tpu.memory_space<vmem>>, vector<288x64xf32>,
    %c0_37 = arith.constant 0 : index
    %c0_38 = arith.constant 0 : index
    %36 = vector.load %arg16[%c0_37, %c0_38] : memref<304x64xf32, #tpu.memory_space<vmem>>, vector<288x64xf32>
    %c1 = arith.constant 1 : index
    %c0_39 = arith.constant 0 : index
    %37 = vector.load %arg16[%c1, %c0_39] : memref<304x64xf32, #tpu.memory_space<vmem>>, vector<288x64xf32>
    %38 = arith.maximumf %36, %37 : vector<288x64xf32>
    %c12 = arith.constant 12 : index
    %c0_40 = arith.constant 0 : index
    %39 = vector.load %arg16[%c12, %c0_40] : memref<304x64xf32, #tpu.memory_space<vmem>>, vector<288x64xf32>
    %c13 = arith.constant 13 : index
    %c0_41 = arith.constant 0 : index
    %40 = vector.load %arg16[%c13, %c0_41] : memref<304x64xf32, #tpu.memory_space<vmem>>, vector<288x64xf32>
    %41 = arith.maximumf %39, %40 : vector<288x64xf32>
    %42 = arith.maximumf %38, %41 : vector<288x64xf32>
    %c0_42 = arith.constant 0 : index
    %c0_43 = arith.constant 0 : index
    %43 = vector.load %arg17[%c0_42, %c0_43] : memref<288x64xf32, #tpu.memory_space<vmem>>, vector<288x64xf32>
    tpu.vector_store %arg17[%c0_42, %c0_43], %42 {strides = array<i32>} : memref<288x64xf32, #tpu.memory_space<vmem>>, vector<288x64xf32>,
    %cst_44 = arith.constant 0.000000e+00 : f32
    %44 = vector.broadcast %cst_44 : f32 to vector<88x64xf32>
    %c0_45 = arith.constant 0 : index
    %c0_46 = arith.constant 0 : index
    %45 = vector.load %arg18[%c0_45, %c0_46] : memref<88x64xf32, #tpu.memory_space<vmem>>, vector<88x64xf32>
    tpu.vector_store %arg18[%c0_45, %c0_46], %44 {strides = array<i32>} : memref<88x64xf32, #tpu.memory_space<vmem>>, vector<88x64xf32>,
    %c26 = arith.constant 26 : index
    %c0_47 = arith.constant 0 : index
    %46 = tpu.strided_load %arg17[%c26, %c0_47] {strides = array<i32: 2, 1>} : memref<288x64xf32, #tpu.memory_space<vmem>>, vector<4x64xf32>
    %c15_48 = arith.constant 15 : index
    %c0_49 = arith.constant 0 : index
    %47 = vector.load %arg18[%c15_48, %c0_49] : memref<88x64xf32, #tpu.memory_space<vmem>>, vector<4x64xf32>
    tpu.vector_store %arg18[%c15_48, %c0_49], %46 {strides = array<i32>} : memref<88x64xf32, #tpu.memory_space<vmem>>, vector<4x64xf32>,
    %c50 = arith.constant 50 : index
    %c0_50 = arith.constant 0 : index
    %48 = tpu.strided_load %arg17[%c50, %c0_50] {strides = array<i32: 2, 1>} : memref<288x64xf32, #tpu.memory_space<vmem>>, vector<4x64xf32>
    %c21 = arith.constant 21 : index
    %c0_51 = arith.constant 0 : index
    %49 = vector.load %arg18[%c21, %c0_51] : memref<88x64xf32, #tpu.memory_space<vmem>>, vector<4x64xf32>
    tpu.vector_store %arg18[%c21, %c0_51], %48 {strides = array<i32>} : memref<88x64xf32, #tpu.memory_space<vmem>>, vector<4x64xf32>,
    %c74 = arith.constant 74 : index
    %c0_52 = arith.constant 0 : index
    %50 = tpu.strided_load %arg17[%c74, %c0_52] {strides = array<i32: 2, 1>} : memref<288x64xf32, #tpu.memory_space<vmem>>, vector<4x64xf32>
    %c27_53 = arith.constant 27 : index
    %c0_54 = arith.constant 0 : index
    %51 = vector.load %arg18[%c27_53, %c0_54] : memref<88x64xf32, #tpu.memory_space<vmem>>, vector<4x64xf32>
    tpu.vector_store %arg18[%c27_53, %c0_54], %50 {strides = array<i32>} : memref<88x64xf32, #tpu.memory_space<vmem>>, vector<4x64xf32>,
    %c98 = arith.constant 98 : index
    %c0_55 = arith.constant 0 : index
    %52 = tpu.strided_load %arg17[%c98, %c0_55] {strides = array<i32: 2, 1>} : memref<288x64xf32, #tpu.memory_space<vmem>>, vector<4x64xf32>
    %c33 = arith.constant 33 : index
    %c0_56 = arith.constant 0 : index
    %53 = vector.load %arg18[%c33, %c0_56] : memref<88x64xf32, #tpu.memory_space<vmem>>, vector<4x64xf32>
    tpu.vector_store %arg18[%c33, %c0_56], %52 {strides = array<i32>} : memref<88x64xf32, #tpu.memory_space<vmem>>, vector<4x64xf32>,
    %c170 = arith.constant 170 : index
    %c0_57 = arith.constant 0 : index
    %54 = tpu.strided_load %arg17[%c170, %c0_57] {strides = array<i32: 2, 1>} : memref<288x64xf32, #tpu.memory_space<vmem>>, vector<4x64xf32>
    %c51 = arith.constant 51 : index
    %c0_58 = arith.constant 0 : index
    %55 = vector.load %arg18[%c51, %c0_58] : memref<88x64xf32, #tpu.memory_space<vmem>>, vector<4x64xf32>
    tpu.vector_store %arg18[%c51, %c0_58], %54 {strides = array<i32>} : memref<88x64xf32, #tpu.memory_space<vmem>>, vector<4x64xf32>,
    %c194 = arith.constant 194 : index
    %c0_59 = arith.constant 0 : index
    %56 = tpu.strided_load %arg17[%c194, %c0_59] {strides = array<i32: 2, 1>} : memref<288x64xf32, #tpu.memory_space<vmem>>, vector<4x64xf32>
    %c57 = arith.constant 57 : index
    %c0_60 = arith.constant 0 : index
    %57 = vector.load %arg18[%c57, %c0_60] : memref<88x64xf32, #tpu.memory_space<vmem>>, vector<4x64xf32>
    tpu.vector_store %arg18[%c57, %c0_60], %56 {strides = array<i32>} : memref<88x64xf32, #tpu.memory_space<vmem>>, vector<4x64xf32>,
    %c218 = arith.constant 218 : index
    %c0_61 = arith.constant 0 : index
    %58 = tpu.strided_load %arg17[%c218, %c0_61] {strides = array<i32: 2, 1>} : memref<288x64xf32, #tpu.memory_space<vmem>>, vector<4x64xf32>
    %c63 = arith.constant 63 : index
    %c0_62 = arith.constant 0 : index
    %59 = vector.load %arg18[%c63, %c0_62] : memref<88x64xf32, #tpu.memory_space<vmem>>, vector<4x64xf32>
    tpu.vector_store %arg18[%c63, %c0_62], %58 {strides = array<i32>} : memref<88x64xf32, #tpu.memory_space<vmem>>, vector<4x64xf32>,
    %c242 = arith.constant 242 : index
    %c0_63 = arith.constant 0 : index
    %60 = tpu.strided_load %arg17[%c242, %c0_63] {strides = array<i32: 2, 1>} : memref<288x64xf32, #tpu.memory_space<vmem>>, vector<4x64xf32>
    %c69 = arith.constant 69 : index
    %c0_64 = arith.constant 0 : index
    %61 = vector.load %arg18[%c69, %c0_64] : memref<88x64xf32, #tpu.memory_space<vmem>>, vector<4x64xf32>
    tpu.vector_store %arg18[%c69, %c0_64], %60 {strides = array<i32>} : memref<88x64xf32, #tpu.memory_space<vmem>>, vector<4x64xf32>,
    %c1_65 = arith.constant 1 : index
    %c0_66 = arith.constant 0 : index
    %62 = vector.load %arg18[%c1_65, %c0_66] : memref<88x64xf32, #tpu.memory_space<vmem>>, vector<72x64xf32>
    %c0_67 = arith.constant 0 : index
    %c0_68 = arith.constant 0 : index
    %63 = vector.load %arg19[%c0_67, %c0_68] : memref<72x576xf32, #tpu.memory_space<vmem>>, vector<72x64xf32>
    tpu.vector_store %arg19[%c0_67, %c0_68], %62 {strides = array<i32>} : memref<72x576xf32, #tpu.memory_space<vmem>>, vector<72x64xf32>,
    %c2 = arith.constant 2 : index
    %c0_69 = arith.constant 0 : index
    %64 = vector.load %arg18[%c2, %c0_69] : memref<88x64xf32, #tpu.memory_space<vmem>>, vector<72x64xf32>
    %c0_70 = arith.constant 0 : index
    %c64_71 = arith.constant 64 : index
    %65 = vector.load %arg19[%c0_70, %c64_71] : memref<72x576xf32, #tpu.memory_space<vmem>>, vector<72x64xf32>
    tpu.vector_store %arg19[%c0_70, %c64_71], %64 {strides = array<i32>} : memref<72x576xf32, #tpu.memory_space<vmem>>, vector<72x64xf32>,
    %c3_72 = arith.constant 3 : index
    %c0_73 = arith.constant 0 : index
    %66 = vector.load %arg18[%c3_72, %c0_73] : memref<88x64xf32, #tpu.memory_space<vmem>>, vector<72x64xf32>
    %c0_74 = arith.constant 0 : index
    %c128_75 = arith.constant 128 : index
    %67 = vector.load %arg19[%c0_74, %c128_75] : memref<72x576xf32, #tpu.memory_space<vmem>>, vector<72x64xf32>
    tpu.vector_store %arg19[%c0_74, %c128_75], %66 {strides = array<i32>} : memref<72x576xf32, #tpu.memory_space<vmem>>, vector<72x64xf32>,
    %c7 = arith.constant 7 : index
    %c0_76 = arith.constant 0 : index
    %68 = vector.load %arg18[%c7, %c0_76] : memref<88x64xf32, #tpu.memory_space<vmem>>, vector<72x64xf32>
    %c0_77 = arith.constant 0 : index
    %c192_78 = arith.constant 192 : index
    %69 = vector.load %arg19[%c0_77, %c192_78] : memref<72x576xf32, #tpu.memory_space<vmem>>, vector<72x64xf32>
    tpu.vector_store %arg19[%c0_77, %c192_78], %68 {strides = array<i32>} : memref<72x576xf32, #tpu.memory_space<vmem>>, vector<72x64xf32>,
    %c8 = arith.constant 8 : index
    %c0_79 = arith.constant 0 : index
    %70 = vector.load %arg18[%c8, %c0_79] : memref<88x64xf32, #tpu.memory_space<vmem>>, vector<72x64xf32>
    %c0_80 = arith.constant 0 : index
    %c256_81 = arith.constant 256 : index
    %71 = vector.load %arg19[%c0_80, %c256_81] : memref<72x576xf32, #tpu.memory_space<vmem>>, vector<72x64xf32>
    tpu.vector_store %arg19[%c0_80, %c256_81], %70 {strides = array<i32>} : memref<72x576xf32, #tpu.memory_space<vmem>>, vector<72x64xf32>,
    %c9 = arith.constant 9 : index
    %c0_82 = arith.constant 0 : index
    %72 = vector.load %arg18[%c9, %c0_82] : memref<88x64xf32, #tpu.memory_space<vmem>>, vector<72x64xf32>
    %c0_83 = arith.constant 0 : index
    %c320_84 = arith.constant 320 : index
    %73 = vector.load %arg19[%c0_83, %c320_84] : memref<72x576xf32, #tpu.memory_space<vmem>>, vector<72x64xf32>
    tpu.vector_store %arg19[%c0_83, %c320_84], %72 {strides = array<i32>} : memref<72x576xf32, #tpu.memory_space<vmem>>, vector<72x64xf32>,
    %c13_85 = arith.constant 13 : index
    %c0_86 = arith.constant 0 : index
    %74 = vector.load %arg18[%c13_85, %c0_86] : memref<88x64xf32, #tpu.memory_space<vmem>>, vector<72x64xf32>
    %c0_87 = arith.constant 0 : index
    %c384_88 = arith.constant 384 : index
    %75 = vector.load %arg19[%c0_87, %c384_88] : memref<72x576xf32, #tpu.memory_space<vmem>>, vector<72x64xf32>
    tpu.vector_store %arg19[%c0_87, %c384_88], %74 {strides = array<i32>} : memref<72x576xf32, #tpu.memory_space<vmem>>, vector<72x64xf32>,
    %c14 = arith.constant 14 : index
    %c0_89 = arith.constant 0 : index
    %76 = vector.load %arg18[%c14, %c0_89] : memref<88x64xf32, #tpu.memory_space<vmem>>, vector<72x64xf32>
    %c0_90 = arith.constant 0 : index
    %c448_91 = arith.constant 448 : index
    %77 = vector.load %arg19[%c0_90, %c448_91] : memref<72x576xf32, #tpu.memory_space<vmem>>, vector<72x64xf32>
    tpu.vector_store %arg19[%c0_90, %c448_91], %76 {strides = array<i32>} : memref<72x576xf32, #tpu.memory_space<vmem>>, vector<72x64xf32>,
    %c15_92 = arith.constant 15 : index
    %c0_93 = arith.constant 0 : index
    %78 = vector.load %arg18[%c15_92, %c0_93] : memref<88x64xf32, #tpu.memory_space<vmem>>, vector<72x64xf32>
    %c0_94 = arith.constant 0 : index
    %c512_95 = arith.constant 512 : index
    %79 = vector.load %arg19[%c0_94, %c512_95] : memref<72x576xf32, #tpu.memory_space<vmem>>, vector<72x64xf32>
    tpu.vector_store %arg19[%c0_94, %c512_95], %78 {strides = array<i32>} : memref<72x576xf32, #tpu.memory_space<vmem>>, vector<72x64xf32>,
    %c0_96 = arith.constant 0 : index
    %c0_97 = arith.constant 0 : index
    %80 = vector.load %arg19[%c0_96, %c0_97] : memref<72x576xf32, #tpu.memory_space<vmem>>, vector<72x576xf32>
    %c0_98 = arith.constant 0 : index
    %c0_99 = arith.constant 0 : index
    %81 = vector.load %arg6[%c0_98, %c0_99] : memref<576x128xf32, #tpu.memory_space<vmem>>, vector<576x128xf32>
    %cst_100 = arith.constant dense<0.000000e+00> : vector<72x128xf32>
    %82 = tpu.matmul %80, %81, %cst_100 {dimension_numbers = #tpu.dot_dimension_numbers<[1], [0], [0], [1], [0, 0, 1, 1], [], []>} : vector<72x576xf32>, vector<576x128xf32>, vector<72x128xf32> -> vector<72x128xf32>
    %c0_101 = arith.constant 0 : index
    %c0_102 = arith.constant 0 : index
    %83 = vector.load %arg7[%c0_101, %c0_102] : memref<1x128xf32, #tpu.memory_space<vmem>>, vector<1x128xf32>
    %84 = vector.broadcast %83 : vector<1x128xf32> to vector<72x128xf32>
    %85 = arith.addf %82, %84 : vector<72x128xf32>
    %cst_103 = arith.constant 0.000000e+00 : f32
    %86 = vector.broadcast %cst_103 : f32 to vector<72x128xf32>
    %87 = arith.maximumf %85, %86 : vector<72x128xf32>
    %c0_104 = arith.constant 0 : index
    %c0_105 = arith.constant 0 : index
    %88 = vector.load %arg20[%c0_104, %c0_105] : memref<80x128xf32, #tpu.memory_space<vmem>>, vector<72x128xf32>
    tpu.vector_store %arg20[%c0_104, %c0_105], %87 {strides = array<i32>} : memref<80x128xf32, #tpu.memory_space<vmem>>, vector<72x128xf32>,
    %c0_106 = arith.constant 0 : index
    %c0_107 = arith.constant 0 : index
    %89 = vector.load %arg20[%c0_106, %c0_107] : memref<80x128xf32, #tpu.memory_space<vmem>>, vector<72x128xf32>
    %c1_108 = arith.constant 1 : index
    %c0_109 = arith.constant 0 : index
    %90 = vector.load %arg20[%c1_108, %c0_109] : memref<80x128xf32, #tpu.memory_space<vmem>>, vector<72x128xf32>
    %91 = arith.maximumf %89, %90 : vector<72x128xf32>
    %c6 = arith.constant 6 : index
    %c0_110 = arith.constant 0 : index
    %92 = vector.load %arg20[%c6, %c0_110] : memref<80x128xf32, #tpu.memory_space<vmem>>, vector<72x128xf32>
    %c7_111 = arith.constant 7 : index
    %c0_112 = arith.constant 0 : index
    %93 = vector.load %arg20[%c7_111, %c0_112] : memref<80x128xf32, #tpu.memory_space<vmem>>, vector<72x128xf32>
    %94 = arith.maximumf %92, %93 : vector<72x128xf32>
    %95 = arith.maximumf %91, %94 : vector<72x128xf32>
    %c0_113 = arith.constant 0 : index
    %c0_114 = arith.constant 0 : index
    %96 = vector.load %arg21[%c0_113, %c0_114] : memref<72x128xf32, #tpu.memory_space<vmem>>, vector<72x128xf32>
    tpu.vector_store %arg21[%c0_113, %c0_114], %95 {strides = array<i32>} : memref<72x128xf32, #tpu.memory_space<vmem>>, vector<72x128xf32>,
    %c7_115 = arith.constant 7 : index
    %c0_116 = arith.constant 0 : index
    %97 = vector.load %arg21[%c7_115, %c0_116] : memref<72x128xf32, #tpu.memory_space<vmem>>, vector<1x128xf32>
    %c0_117 = arith.constant 0 : index
    %c0_118 = arith.constant 0 : index
    %98 = vector.load %arg22[%c0_117, %c0_118] : memref<2x512xf32, #tpu.memory_space<vmem>>, vector<1x128xf32>
    tpu.vector_store %arg22[%c0_117, %c0_118], %97 {strides = array<i32>} : memref<2x512xf32, #tpu.memory_space<vmem>>, vector<1x128xf32>,
    %c9_119 = arith.constant 9 : index
    %c0_120 = arith.constant 0 : index
    %99 = vector.load %arg21[%c9_119, %c0_120] : memref<72x128xf32, #tpu.memory_space<vmem>>, vector<1x128xf32>
    %c0_121 = arith.constant 0 : index
    %c128_122 = arith.constant 128 : index
    %100 = vector.load %arg22[%c0_121, %c128_122] : memref<2x512xf32, #tpu.memory_space<vmem>>, vector<1x128xf32>
    tpu.vector_store %arg22[%c0_121, %c128_122], %99 {strides = array<i32>} : memref<2x512xf32, #tpu.memory_space<vmem>>, vector<1x128xf32>,
    %c19 = arith.constant 19 : index
    %c0_123 = arith.constant 0 : index
    %101 = vector.load %arg21[%c19, %c0_123] : memref<72x128xf32, #tpu.memory_space<vmem>>, vector<1x128xf32>
    %c0_124 = arith.constant 0 : index
    %c256_125 = arith.constant 256 : index
    %102 = vector.load %arg22[%c0_124, %c256_125] : memref<2x512xf32, #tpu.memory_space<vmem>>, vector<1x128xf32>
    tpu.vector_store %arg22[%c0_124, %c256_125], %101 {strides = array<i32>} : memref<2x512xf32, #tpu.memory_space<vmem>>, vector<1x128xf32>,
    %c21_126 = arith.constant 21 : index
    %c0_127 = arith.constant 0 : index
    %103 = vector.load %arg21[%c21_126, %c0_127] : memref<72x128xf32, #tpu.memory_space<vmem>>, vector<1x128xf32>
    %c0_128 = arith.constant 0 : index
    %c384_129 = arith.constant 384 : index
    %104 = vector.load %arg22[%c0_128, %c384_129] : memref<2x512xf32, #tpu.memory_space<vmem>>, vector<1x128xf32>
    tpu.vector_store %arg22[%c0_128, %c384_129], %103 {strides = array<i32>} : memref<2x512xf32, #tpu.memory_space<vmem>>, vector<1x128xf32>,
    %c43 = arith.constant 43 : index
    %c0_130 = arith.constant 0 : index
    %105 = vector.load %arg21[%c43, %c0_130] : memref<72x128xf32, #tpu.memory_space<vmem>>, vector<1x128xf32>
    %c1_131 = arith.constant 1 : index
    %c0_132 = arith.constant 0 : index
    %106 = vector.load %arg22[%c1_131, %c0_132] : memref<2x512xf32, #tpu.memory_space<vmem>>, vector<1x128xf32>
    tpu.vector_store %arg22[%c1_131, %c0_132], %105 {strides = array<i32>} : memref<2x512xf32, #tpu.memory_space<vmem>>, vector<1x128xf32>,
    %c45 = arith.constant 45 : index
    %c0_133 = arith.constant 0 : index
    %107 = vector.load %arg21[%c45, %c0_133] : memref<72x128xf32, #tpu.memory_space<vmem>>, vector<1x128xf32>
    %c1_134 = arith.constant 1 : index
    %c128_135 = arith.constant 128 : index
    %108 = vector.load %arg22[%c1_134, %c128_135] : memref<2x512xf32, #tpu.memory_space<vmem>>, vector<1x128xf32>
    tpu.vector_store %arg22[%c1_134, %c128_135], %107 {strides = array<i32>} : memref<2x512xf32, #tpu.memory_space<vmem>>, vector<1x128xf32>,
    %c55 = arith.constant 55 : index
    %c0_136 = arith.constant 0 : index
    %109 = vector.load %arg21[%c55, %c0_136] : memref<72x128xf32, #tpu.memory_space<vmem>>, vector<1x128xf32>
    %c1_137 = arith.constant 1 : index
    %c256_138 = arith.constant 256 : index
    %110 = vector.load %arg22[%c1_137, %c256_138] : memref<2x512xf32, #tpu.memory_space<vmem>>, vector<1x128xf32>
    tpu.vector_store %arg22[%c1_137, %c256_138], %109 {strides = array<i32>} : memref<2x512xf32, #tpu.memory_space<vmem>>, vector<1x128xf32>,
    %c57_139 = arith.constant 57 : index
    %c0_140 = arith.constant 0 : index
    %111 = vector.load %arg21[%c57_139, %c0_140] : memref<72x128xf32, #tpu.memory_space<vmem>>, vector<1x128xf32>
    %c1_141 = arith.constant 1 : index
    %c384_142 = arith.constant 384 : index
    %112 = vector.load %arg22[%c1_141, %c384_142] : memref<2x512xf32, #tpu.memory_space<vmem>>, vector<1x128xf32>
    tpu.vector_store %arg22[%c1_141, %c384_142], %111 {strides = array<i32>} : memref<2x512xf32, #tpu.memory_space<vmem>>, vector<1x128xf32>,
    %c0_143 = arith.constant 0 : index
    %c0_144 = arith.constant 0 : index
    %113 = vector.load %arg22[%c0_143, %c0_144] : memref<2x512xf32, #tpu.memory_space<vmem>>, vector<2x512xf32>
    %c0_145 = arith.constant 0 : index
    %c0_146 = arith.constant 0 : index
    %114 = vector.load %arg8[%c0_145, %c0_146] : memref<512x128xf32, #tpu.memory_space<vmem>>, vector<512x128xf32>
    %cst_147 = arith.constant dense<0.000000e+00> : vector<2x128xf32>
    %115 = tpu.matmul %113, %114, %cst_147 {dimension_numbers = #tpu.dot_dimension_numbers<[1], [0], [0], [1], [0, 0, 1, 1], [], []>} : vector<2x512xf32>, vector<512x128xf32>, vector<2x128xf32> -> vector<2x128xf32>
    %c0_148 = arith.constant 0 : index
    %c0_149 = arith.constant 0 : index
    %116 = vector.load %arg9[%c0_148, %c0_149] : memref<1x128xf32, #tpu.memory_space<vmem>>, vector<1x128xf32>
    %117 = vector.broadcast %116 : vector<1x128xf32> to vector<2x128xf32>
    %118 = arith.addf %115, %117 : vector<2x128xf32>
    %cst_150 = arith.constant 0.000000e+00 : f32
    %119 = vector.broadcast %cst_150 : f32 to vector<2x128xf32>
    %120 = arith.maximumf %118, %119 : vector<2x128xf32>
    %c0_151 = arith.constant 0 : index
    %c0_152 = arith.constant 0 : index
    %121 = vector.load %arg10[%c0_151, %c0_152] : memref<128x8xf32, #tpu.memory_space<vmem>>, vector<128x8xf32>
    %cst_153 = arith.constant dense<0.000000e+00> : vector<2x8xf32>
    %122 = tpu.matmul %120, %121, %cst_153 {dimension_numbers = #tpu.dot_dimension_numbers<[1], [0], [0], [1], [0, 0, 1, 1], [], []>} : vector<2x128xf32>, vector<128x8xf32>, vector<2x8xf32> -> vector<2x8xf32>
    %c0_154 = arith.constant 0 : index
    %c0_155 = arith.constant 0 : index
    %123 = vector.load %arg11[%c0_154, %c0_155] : memref<1x8xf32, #tpu.memory_space<vmem>>, vector<1x8xf32>
    %124 = vector.broadcast %123 : vector<1x8xf32> to vector<2x8xf32>
    %125 = arith.addf %122, %124 : vector<2x8xf32>
    %126 = math.tanh %125 : vector<2x8xf32>
    %c0_156 = arith.constant 0 : index
    %127 = memref.load %arg12[%c0_156] : memref<2xf32, #tpu.memory_space<smem>>
    %128 = vector.broadcast %127 : f32 to vector<2x8xf32>
    %129 = arith.mulf %126, %128 : vector<2x8xf32>
    %c1_157 = arith.constant 1 : index
    %130 = memref.load %arg12[%c1_157] : memref<2xf32, #tpu.memory_space<smem>>
    %131 = vector.broadcast %130 : f32 to vector<2x8xf32>
    %132 = arith.addf %129, %131 : vector<2x8xf32>
    %c0_158 = arith.constant 0 : index
    %c0_159 = arith.constant 0 : index
    %133 = vector.load %arg13[%c0_158, %c0_159] : memref<2x8xf32, #tpu.memory_space<vmem>>, vector<2x8xf32>
    tpu.vector_store %arg13[%c0_158, %c0_159], %132 {strides = array<i32>} : memref<2x8xf32, #tpu.memory_space<vmem>>, vector<2x8xf32>,
    return
  }
  func.func @transform_0(%arg0: i32) -> (i32, i32) {
    %c0_i32 = arith.constant 0 : i32
    %c0_i32_0 = arith.constant 0 : i32
    return %arg0, %c0_i32 : i32, i32
  }
  func.func @transform_1(%arg0: i32) -> (i32, i32) {
    %c0_i32 = arith.constant 0 : i32
    %c0_i32_0 = arith.constant 0 : i32
    %c0_i32_1 = arith.constant 0 : i32
    return %c0_i32, %c0_i32_0 : i32, i32
  }
  func.func @transform_2(%arg0: i32) -> (i32, i32) {
    %c0_i32 = arith.constant 0 : i32
    %c0_i32_0 = arith.constant 0 : i32
    %c0_i32_1 = arith.constant 0 : i32
    return %c0_i32, %c0_i32_0 : i32, i32
  }
  func.func @transform_3(%arg0: i32) -> (i32, i32) {
    %c0_i32 = arith.constant 0 : i32
    %c0_i32_0 = arith.constant 0 : i32
    %c0_i32_1 = arith.constant 0 : i32
    return %c0_i32, %c0_i32_0 : i32, i32
  }
  func.func @transform_4(%arg0: i32) -> (i32, i32) {
    %c0_i32 = arith.constant 0 : i32
    %c0_i32_0 = arith.constant 0 : i32
    %c0_i32_1 = arith.constant 0 : i32
    return %c0_i32, %c0_i32_0 : i32, i32
  }
  func.func @transform_5(%arg0: i32) -> (i32, i32) {
    %c0_i32 = arith.constant 0 : i32
    %c0_i32_0 = arith.constant 0 : i32
    %c0_i32_1 = arith.constant 0 : i32
    return %c0_i32, %c0_i32_0 : i32, i32
  }
  func.func @transform_6(%arg0: i32) -> (i32, i32) {
    %c0_i32 = arith.constant 0 : i32
    %c0_i32_0 = arith.constant 0 : i32
    %c0_i32_1 = arith.constant 0 : i32
    return %c0_i32, %c0_i32_0 : i32, i32
  }
  func.func @transform_7(%arg0: i32) -> (i32, i32) {
    %c0_i32 = arith.constant 0 : i32
    %c0_i32_0 = arith.constant 0 : i32
    %c0_i32_1 = arith.constant 0 : i32
    return %c0_i32, %c0_i32_0 : i32, i32
  }
  func.func @transform_8(%arg0: i32) -> (i32, i32) {
    %c0_i32 = arith.constant 0 : i32
    %c0_i32_0 = arith.constant 0 : i32
    %c0_i32_1 = arith.constant 0 : i32
    return %c0_i32, %c0_i32_0 : i32, i32
  }
  func.func @transform_9(%arg0: i32) -> (i32, i32) {
    %c0_i32 = arith.constant 0 : i32
    %c0_i32_0 = arith.constant 0 : i32
    %c0_i32_1 = arith.constant 0 : i32
    return %c0_i32, %c0_i32_0 : i32, i32
  }
  func.func @transform_10(%arg0: i32) -> (i32, i32) {
    %c0_i32 = arith.constant 0 : i32
    %c0_i32_0 = arith.constant 0 : i32
    %c0_i32_1 = arith.constant 0 : i32
    return %c0_i32, %c0_i32_0 : i32, i32
  }
  func.func @transform_11(%arg0: i32) -> i32 {
    %c0_i32 = arith.constant 0 : i32
    %c0_i32_0 = arith.constant 0 : i32
    return %c0_i32 : i32
  }
  func.func @transform_12(%arg0: i32) -> (i32, i32) {
    %c0_i32 = arith.constant 0 : i32
    %c0_i32_0 = arith.constant 0 : i32
    return %arg0, %c0_i32 : i32, i32
  }
}

</mosaic_0001>

<bundles_post_ra>
// kernel: tpu_custom_call.1
= control target key start
LH: loop header
LB: loop body
LE: loop exit
PB: predicated region body
PF: predicated region fallthrough
CT: control target
= control target key end

     0   :  { %17 = vsyncpa [#allocation12], 0  ;;  %s7444_s0 = inlined_call_operand.vmem [shape: f32[288,36], index: 0, kind: input, shape index: {}]   ;;  %s7445_s1 = inlined_call_operand.hbm [shape: f32[36,64], index: 1, kind: input, shape index: {}]   ;;  %s7446_s2 = inlined_call_operand.vmem [shape: f32[1,64], index: 2, kind: input, shape index: {}]   ;;  %s7447_s3 = inlined_call_operand.vmem [shape: f32[576,64], index: 3, kind: input, shape index: {}]   ;;  %s7448_s4 = inlined_call_operand.vmem [shape: f32[1,64], index: 4, kind: input, shape index: {}]   ;;  %s7449_s5 = inlined_call_operand.vmem [shape: f32[576,128], index: 5, kind: input, shape index: {}]   ;;  %s7450_s6 = inlined_call_operand.vmem [shape: f32[1,128], index: 6, kind: input, shape index: {}]   ;;  %s7451_s7 = inlined_call_operand.vmem [shape: f32[512,128], index: 7, kind: input, shape index: {}]   ;;  %s7452_s8 = inlined_call_operand.vmem [shape: f32[1,128], index: 8, kind: input, shape index: {}]   ;;  %s7453_s9 = inlined_call_operand.vmem [shape: f32[128,8], index: 9, kind: input, shape index: {}]   ;;  %s7454_s10 = inlined_call_operand.vmem [shape: f32[1,8], index: 10, kind: input, shape index: {}]   ;;  %s7455_s11 = inlined_call_operand.vmem [shape: f32[2], index: 11, kind: input, shape index: {}]   ;;  %s7456_s12 = inlined_call_operand.hbm [shape: f32[2,8], index: 12, kind: output, shape index: {}]  }
   0x1   :  { %18 = vsyncpa [#allocation14], 0 }
   0x2   :  { %19 = vsyncpa [#allocation13], 0  ;;  %s5205_s21 = smov [#allocation11]   ;;  %s58_s25 = sshll.u32 %s7455_s11, 4  ;;  %s59_s25 = int_to_ptr.vmem [resolvable:$true] %s58_s25 }
   0x3   :  { %s27_s22 = sshll.u32 %s5205_s21, 4  ;;  %s28_s22 = int_to_ptr.vmem [resolvable:$true] %s27_s22 }
   0x4   :  { %s5155_s26 = scalar_lea.vmem %s28_s22, 640  ;;  %p5160_p1 = scmp.lt.s32.totalorder %s28_s22, %s28_s22 }
   0x5   :  { %p5156_p0 = scmp.ne.s32.totalorder %s28_s22, %s5155_s26  ;;  %p5161_p2 = scmp.lt.s32.totalorder %s5155_s26, %s5155_s26 }
   0x7   :  { %p5162_p3 = por %p5161_p2, %p5160_p1 }
   0x9   :  { %p5163_p4 = pnand %p5162_p3, %p5156_p0 }
   0xb   :  { %5166 = shalt.err (!%p5163_p4)
}
   0xc   :  { %s5206_s27 = smov 128   ;;  %s5207_s28 = smov 8  }
   0xd   :  { %33 = dma.hbm_to_vmem [thread:$0]  %s7445_s1, 640, %s28_s22, [#allocation12], %s5206_s27, %s5206_s27, %s5207_s28  }
   0xe   :  { %s5167_s13 = scalar_lea.vmem %s59_s25, 16  ;;  %p5172_p6 = scmp.lt.s32.totalorder %s59_s25, %s59_s25 }
   0xf   :  { %p5168_p5 = scmp.ne.s32.totalorder %s59_s25, %s5167_s13  ;;  %p5173_p7 = scmp.lt.s32.totalorder %s5167_s13, %s5167_s13 }
  0x11   :  { %p5174_p8 = por %p5173_p7, %p5172_p6 }
  0x13   :  { %p5175_p9 = pnand %p5174_p8, %p5168_p5 }
  0x15   :  { %5178 = shalt.err (!%p5175_p9)
}
  0x16   :  { %s5208_s11 = smov [#allocation15]  }
  0x17   :  { %61 = dma.vmem_to_smem %s59_s25, 16, %s5208_s11, [#allocation14]  }
  0x18   :  { %5199 = dma.done.wait [#allocation12], 640  }
  0x19   :  { %5200 = vsyncadd [#allocation12], 4294966656 }
  0x1a   :  { %5201 = dma.done.wait [#allocation14], 16  }
  0x1b   :  { %5202 = vsyncadd [#allocation14], 4294967280 }
  0x1c   :  { %68 = sfence }
  0x1d   :  { %v109_v0 = vld [vmem:[#allocation11 + $0x20] sm:$0xf]  ;;  %vm226_vm0 = vcmask 1043456   ;;  %v108_v1 = vld [vmem:[#allocation11 + $0x18] sm:$0xff]  ;;  %vm117_vm1 = vcmask 293888   ;;  %v69_v2 = vld [vmem:[%s7444_s0] sm:$0xff] }
  0x1e   :  { %4912 = vmatprep.subr.msk.mxu0 %vm226_vm0, %v109_v0  ;;  %5124 = vmatprep.subr.msk.mxu1 %vm226_vm0, %v109_v0  ;;  %v107_v3 = vld [vmem:[#allocation11 + $0x10] sm:$0xff]  ;;  %v106_v4 = vld [vmem:[#allocation11 + $0x8] sm:$0xff]  ;;  %v105_v5 = vld [vmem:[#allocation11] sm:$0xff]  ;;  %s5209_s25 = smov 64   ;;  %vm511_vm2 = vcmask 523264   ;;  %v5210_v42 = vmov 0.0  }
  0x1f   :  { %4913 = vmatpush3.msk.msra.mxu0 %vm226_vm0, %v109_v0  ;;  %4922 = vmatprep.mubr.msk.f32.mxu0 %vm117_vm1, %v69_v2  ;;  %v70_v6 = vld [vmem:[%s7444_s0 + $0x8] sm:$0xff]  ;;  %v71_v7 = vld [vmem:[%s7444_s0 + $0x10] sm:$0xff]  ;;  %v101_v8 = vld [vmem:[%s7444_s0 + $0x100] sm:$0xff]  ;;  %3235 = vst.msk [vmem:[#allocation6] sm:$0xff] %vm511_vm2, %v5210_v42  ;;  %vm800_vm3 = vcmask 1048064   ;;  %vm5211_vm4 = vmmov 0  }
  0x20   :  { %4914 = vmatprep.subr.mxu0 %v108_v1  ;;  %5129 = vmatpush3.msk.msra.mxu1 %vm226_vm0, %v109_v0  ;;  %v102_v9 = vld [vmem:[%s7444_s0 + $0x108] sm:$0xff]  ;;  %v72_v10 = vld [vmem:[%s7444_s0 + $0x18] sm:$0xff]  ;;  %v103_v11 = vld [vmem:[%s7444_s0 + $0x110] sm:$0xff]  ;;  %3236 = vst.msk [vmem:[#allocation6 + $0x8] sm:$0xff] %vm511_vm2, %v5210_v42  ;;  %vm3248_vm5 = vcmask 519168   ;;  %s4493_s27 = sld [smem:[#allocation15]] }
  0x21   :  { %4915 = vmatpush3.msra.mxu0 %v108_v1  ;;  %5125 = vmatprep.subr.mxu1 %v108_v1  ;;  %v73_v12 = vld [vmem:[%s7444_s0 + $0x20] sm:$0xff]  ;;  %v104_v13 = vld [vmem:[%s7444_s0 + $0x118] sm:$0xff]  ;;  %v74_v14 = vld [vmem:[%s7444_s0 + $0x28] sm:$0xff]  ;;  %3237 = vst.msk [vmem:[#allocation6 + $0x10] sm:$0xff] %vm511_vm2, %v5210_v42  ;;  %vm4499_vm6 = vcmask 58368  }
  0x22   :  { %4916 = vmatprep.subr.mxu0 %v107_v3  ;;  %5130 = vmatpush3.msra.mxu1 %v108_v1  ;;  %v75_v15 = vld [vmem:[%s7444_s0 + $0x30] sm:$0xff]  ;;  %v76_v16 = vld [vmem:[%s7444_s0 + $0x38] sm:$0xff]  ;;  %v77_v17 = vld [vmem:[%s7444_s0 + $0x40] sm:$0xff]  ;;  %3238 = vst.msk [vmem:[#allocation6 + $0x18] sm:$0xff] %vm511_vm2, %v5210_v42 }
  0x23   :  { %4917 = vmatpush3.msra.mxu0 %v107_v3  ;;  %5126 = vmatprep.subr.mxu1 %v107_v3  ;;  %v78_v18 = vld [vmem:[%s7444_s0 + $0x48] sm:$0xff]  ;;  %v79_v19 = vld [vmem:[%s7444_s0 + $0x50] sm:$0xff]  ;;  %v80_v20 = vld [vmem:[%s7444_s0 + $0x58] sm:$0xff]  ;;  %3239 = vst.msk [vmem:[#allocation6 + $0x20] sm:$0xff] %vm511_vm2, %v5210_v42 }
  0x24   :  { %4918 = vmatprep.subr.mxu0 %v106_v4  ;;  %5131 = vmatpush3.msra.mxu1 %v107_v3  ;;  %v81_v21 = vld [vmem:[%s7444_s0 + $0x60] sm:$0xff]  ;;  %v82_v22 = vld [vmem:[%s7444_s0 + $0x68] sm:$0xff]  ;;  %v83_v23 = vld [vmem:[%s7444_s0 + $0x70] sm:$0xff]  ;;  %3240 = vst.msk [vmem:[#allocation6 + $0x28] sm:$0xff] %vm511_vm2, %v5210_v42 }
  0x25   :  { %4919 = vmatpush3.msra.mxu0 %v106_v4  ;;  %5127 = vmatprep.subr.mxu1 %v106_v4  ;;  %v84_v24 = vld [vmem:[%s7444_s0 + $0x78] sm:$0xff]  ;;  %v85_v25 = vld [vmem:[%s7444_s0 + $0x80] sm:$0xff]  ;;  %v86_v26 = vld [vmem:[%s7444_s0 + $0x88] sm:$0xff]  ;;  %3241 = vst.msk [vmem:[#allocation6 + $0x30] sm:$0xff] %vm511_vm2, %v5210_v42 }
  0x26   :  { %4920 = vmatprep.subr.mxu0 %v105_v5  ;;  %5132 = vmatpush3.msra.mxu1 %v106_v4  ;;  %v87_v27 = vld [vmem:[%s7444_s0 + $0x90] sm:$0xff]  ;;  %v88_v28 = vld [vmem:[%s7444_s0 + $0x98] sm:$0xff]  ;;  %v89_v29 = vld [vmem:[%s7444_s0 + $0xa0] sm:$0xff]  ;;  %3242 = vst.msk [vmem:[#allocation6 + $0x38] sm:$0xff] %vm511_vm2, %v5210_v42 }
  0x27   :  { %4921 = vmatpush3.msra.mxu0 %v105_v5  ;;  %5128 = vmatprep.subr.mxu1 %v105_v5  ;;  %v90_v30 = vld [vmem:[%s7444_s0 + $0xa8] sm:$0xff]  ;;  %v91_v31 = vld [vmem:[%s7444_s0 + $0xb0] sm:$0xff]  ;;  %v92_v32 = vld [vmem:[%s7444_s0 + $0xb8] sm:$0xff]  ;;  %3243 = vst.msk [vmem:[#allocation6 + $0x40] sm:$0xff] %vm511_vm2, %v5210_v42 }
  0x28   :  { %4923 = vmatmul.mubr.msk.f32.vlgmr.msra.gmra.mxu0 %vm117_vm1, %v70_v6  ;;  %5133 = vmatpush3.msra.mxu1 %v105_v5  ;;  %v93_v33 = vld [vmem:[%s7444_s0 + $0xc0] sm:$0xff]  ;;  %v94_v34 = vld [vmem:[%s7444_s0 + $0xc8] sm:$0xff]  ;;  %v95_v35 = vld [vmem:[%s7444_s0 + $0xd0] sm:$0xff]  ;;  %3244 = vst.msk [vmem:[#allocation6 + $0x48] sm:$0xff] %vm511_vm2, %v5210_v42 }
  0x29   :  { %4925 = vmatprep.mubr.msk.f32.mxu0 %vm117_vm1, %v71_v7  ;;  %4970 = vmatprep.mubr.msk.f32.mxu1 %vm117_vm1, %v101_v8  ;;  %v96_v36 = vld [vmem:[%s7444_s0 + $0xd8] sm:$0xff]  ;;  %v97_v37 = vld [vmem:[%s7444_s0 + $0xe0] sm:$0xff]  ;;  %v98_v38 = vld [vmem:[%s7444_s0 + $0xe8] sm:$0xff]  ;;  %3245 = vst.msk [vmem:[#allocation6 + $0x50] sm:$0xff] %vm511_vm2, %v5210_v42 }
  0x2a   :  { %4971 = vmatmul.mubr.msk.f32.vlgmr.msra.gmra.mxu1 %vm117_vm1, %v102_v9  ;;  %v99_v39 = vld [vmem:[%s7444_s0 + $0xf0] sm:$0xff]  ;;  %v100_v40 = vld [vmem:[%s7444_s0 + $0xf8] sm:$0xff]  ;;  %v620_v41 = vld [vmem:[#allocation2 + $0x4] sm:$0xff]  ;;  %2140 = vmatprep.subr.mxu1 %v5210_v42 }
  0x2b   :  { %4973 = vmatprep.mubr.msk.f32.mxu1 %vm117_vm1, %v103_v11  ;;  %692 = vrot.lane.b32.xlu0 %v620_v41, %s5209_s25  ;;  %v1968_v43 = vld [vmem:[%s7447_s3 + $0x78] sm:$0xff]  ;;  %v1967_v44 = vld [vmem:[%s7447_s3 + $0x70] sm:$0xff]  ;;  %v1966_v45 = vld [vmem:[%s7447_s3 + $0x68] sm:$0xff] }
  0x2c   :  { %4926 = vmatmul.mubr.msk.f32.gmra.mxu0 %vm117_vm1, %v72_v10  ;;  %2385 = vmatprep.subr.mxu0 %v5210_v42  ;;  %v1965_v46 = vld [vmem:[%s7447_s3 + $0x60] sm:$0xff]  ;;  %v1964_v47 = vld [vmem:[%s7447_s3 + $0x58] sm:$0xff]  ;;  %v1963_v48 = vld [vmem:[%s7447_s3 + $0x50] sm:$0xff] }
  0x2d   :  { %4928 = vmatprep.mubr.msk.f32.mxu0 %vm117_vm1, %v73_v12  ;;  %2141 = vmatpush1.msra.mxu1 %v1968_v43  ;;  %v1962_v49 = vld [vmem:[%s7447_s3 + $0x48] sm:$0xff]  ;;  %v1961_v50 = vld [vmem:[%s7447_s3 + $0x40] sm:$0xff]  ;;  %v1960_v51 = vld [vmem:[%s7447_s3 + $0x38] sm:$0xff] }
  0x2e   :  { %4974 = vmatmul.mubr.msk.f32.gmra.mxu1 %vm117_vm1, %v104_v13  ;;  %2142 = vmatprep.subr.mxu1 %v5210_v42  ;;  %v1959_v52 = vld [vmem:[%s7447_s3 + $0x30] sm:$0xff]  ;;  %v1958_v53 = vld [vmem:[%s7447_s3 + $0x28] sm:$0xff]  ;;  %v1957_v54 = vld [vmem:[%s7447_s3 + $0x20] sm:$0xff] }
  0x2f   :  { %2143 = vmatpush1.msra.mxu1 %v1967_v44  ;;  %v1956_v55 = vld [vmem:[%s7447_s3 + $0x18] sm:$0xff]  ;;  %v1955_v57 = vld [vmem:[%s7447_s3 + $0x10] sm:$0xff]  ;;  %v1954_v59 = vld [vmem:[%s7447_s3 + $0x8] sm:$0xff] }
  0x30   :  { %4929 = vmatmul.mubr.msk.f32.gmra.mxu0 %vm117_vm1, %v74_v14  ;;  %2144 = vmatprep.subr.mxu1 %v5210_v42  ;;  %v2000_v56 = vld [vmem:[%s7447_s3 + $0x178] sm:$0xff]  ;;  %v1999_v58 = vld [vmem:[%s7447_s3 + $0x170] sm:$0xff]  ;;  %v1998_v60 = vld [vmem:[%s7447_s3 + $0x168] sm:$0xff] }
  0x31   :  { %4931 = vmatprep.mubr.msk.f32.mxu0 %vm117_vm1, %v75_v15  ;;  %2145 = vmatpush1.msra.mxu1 %v1966_v45  ;;  %v1953_v61 = vld [vmem:[%s7447_s3] sm:$0xff]  ;;  %v1984_v63 = vld [vmem:[%s7447_s3 + $0xf8] sm:$0xff]  ;;  %v1983_v1 = vld [vmem:[%s7447_s3 + $0xf0] sm:$0xff] }
  0x32   :  { %2146 = vmatprep.subr.mxu1 %v5210_v42  ;;  %2386 = vmatpush1.msra.mxu0 %v2000_v56  ;;  %v1997_v62 = vld [vmem:[%s7447_s3 + $0x160] sm:$0xff]  ;;  %v1996_v0 = vld [vmem:[%s7447_s3 + $0x158] sm:$0xff]  ;;  %v1995_v2 = vld [vmem:[%s7447_s3 + $0x150] sm:$0xff] }
  0x33   :  { %2147 = vmatpush1.msra.mxu1 %v1965_v46  ;;  %2387 = vmatprep.subr.mxu0 %v5210_v42  ;;  %v1982_v3 = vld [vmem:[%s7447_s3 + $0xe8] sm:$0xff]  ;;  %v1981_v5 = vld [vmem:[%s7447_s3 + $0xe0] sm:$0xff]  ;;  %v1980_v7 = vld [vmem:[%s7447_s3 + $0xd8] sm:$0xff] }
  0x34   :  { %4932 = vmatmul.mubr.msk.f32.gmra.mxu0 %vm117_vm1, %v76_v16  ;;  %2148 = vmatprep.subr.mxu1 %v5210_v42  ;;  %v1994_v4 = vld [vmem:[%s7447_s3 + $0x148] sm:$0xff]  ;;  %v1993_v6 = vld [vmem:[%s7447_s3 + $0x140] sm:$0xff]  ;;  %v1992_v8 = vld [vmem:[%s7447_s3 + $0x138] sm:$0xff] }
  0x35   :  { %4934 = vmatprep.mubr.msk.f32.mxu0 %vm117_vm1, %v77_v17  ;;  %2149 = vmatpush1.msra.mxu1 %v1964_v47  ;;  %v1979_v9 = vld [vmem:[%s7447_s3 + $0xd0] sm:$0xff]  ;;  %v1978_v11 = vld [vmem:[%s7447_s3 + $0xc8] sm:$0xff]  ;;  %v1977_v13 = vld [vmem:[%s7447_s3 + $0xc0] sm:$0xff] }
  0x36   :  { %2150 = vmatprep.subr.mxu1 %v5210_v42  ;;  %2388 = vmatpush1.msra.mxu0 %v1999_v58  ;;  %v1991_v10 = vld [vmem:[%s7447_s3 + $0x130] sm:$0xff]  ;;  %v1990_v12 = vld [vmem:[%s7447_s3 + $0x128] sm:$0xff]  ;;  %v1989_v14 = vld [vmem:[%s7447_s3 + $0x120] sm:$0xff] }
  0x37   :  { %2151 = vmatpush1.msra.mxu1 %v1963_v48  ;;  %2389 = vmatprep.subr.mxu0 %v5210_v42  ;;  %v1976_v15 = vld [vmem:[%s7447_s3 + $0xb8] sm:$0xff]  ;;  %v548_v17 = vld [vmem:[#allocation2 + $0x3] sm:$0xff]  ;;  %v1971_v45 = vld [vmem:[%s7447_s3 + $0x90] sm:$0xff] }
  0x38   :  { %4935 = vmatmul.mubr.msk.f32.gmra.mxu0 %vm117_vm1, %v78_v18  ;;  %2152 = vmatprep.subr.mxu1 %v5210_v42  ;;  %v1988_v16 = vld [vmem:[%s7447_s3 + $0x118] sm:$0xff]  ;;  %584 = vst.msk [vmem:[#allocation3] sm:$0xff] %vm511_vm2, %v548_v17  ;;  %v1975_v18 = vld [vmem:[%s7447_s3 + $0xb0] sm:$0xff] }
  0x39   :  { %4937 = vmatprep.mubr.msk.f32.mxu0 %vm117_vm1, %v79_v19  ;;  %2153 = vmatpush1.msra.mxu1 %v1962_v49  ;;  %v1987_v19 = vld [vmem:[%s7447_s3 + $0x110] sm:$0xff] }
  0x3a   :  { %2154 = vmatprep.subr.mxu1 %v5210_v42  ;;  %2390 = vmatpush1.msra.mxu0 %v1998_v60  ;;  %v2015_v46 = vld [vmem:[%s7447_s3 + $0x1f0] sm:$0xff]  ;;  %v1969_v60 = vld [vmem:[%s7447_s3 + $0x80] sm:$0xff] }
  0x3b   :  { %2155 = vmatpush1.msra.mxu1 %v1961_v50  ;;  %2391 = vmatprep.subr.mxu0 %v5210_v42 }
  0x3c   :  { %4938 = vmatmul.mubr.msk.f32.gmra.mxu0 %vm117_vm1, %v80_v20  ;;  %2156 = vmatprep.subr.mxu1 %v5210_v42 }
  0x3d   :  { %4940 = vmatprep.mubr.msk.f32.mxu0 %vm117_vm1, %v81_v21  ;;  %2157 = vmatpush1.msra.mxu1 %v1960_v51  ;;  %v5616_v21 = vld [vmem:[%s7446_s2] ss:$0 sm:$0xff]  ;;  %v1970_v51 = vld [vmem:[%s7447_s3 + $0x88] sm:$0xff] }
  0x3e   :  { %2158 = vmatprep.subr.mxu1 %v5210_v42  ;;  %2392 = vmatpush1.msra.mxu0 %v1997_v62 }
  0x3f   :  { %2159 = vmatpush1.msra.mxu1 %v1959_v52  ;;  %2393 = vmatprep.subr.mxu0 %v5210_v42  ;;  %v2014_v52 = vld [vmem:[%s7447_s3 + $0x1e8] sm:$0xff] }
  0x40   :  { %4941 = vmatmul.mubr.msk.f32.gmra.mxu0 %vm117_vm1, %v82_v22  ;;  %2160 = vmatprep.subr.mxu1 %v5210_v42  ;;  %v1974_v22 = vld [vmem:[%s7447_s3 + $0xa8] sm:$0xff] }
  0x41   :  { %4943 = vmatprep.mubr.msk.f32.mxu0 %vm117_vm1, %v83_v23  ;;  %2161 = vmatpush1.msra.mxu1 %v1958_v53  ;;  %v1986_v23 = vld [vmem:[%s7447_s3 + $0x108] sm:$0xff] }
  0x42   :  { %2162 = vmatprep.subr.mxu1 %v5210_v42  ;;  %2394 = vmatpush1.msra.mxu0 %v1996_v0 }
  0x43   :  { %2163 = vmatpush1.msra.mxu1 %v1957_v54  ;;  %2395 = vmatprep.subr.mxu0 %v5210_v42 }
  0x44   :  { %4944 = vmatmul.mubr.msk.f32.gmra.mxu0 %vm117_vm1, %v84_v24  ;;  %2164 = vmatprep.subr.mxu1 %v5210_v42 }
  0x45   :  { %4946 = vmatprep.mubr.msk.f32.mxu0 %vm117_vm1, %v85_v25  ;;  %2165 = vmatpush1.msra.mxu1 %v1956_v55 }
  0x46   :  { %2166 = vmatprep.subr.mxu1 %v5210_v42  ;;  %2396 = vmatpush1.msra.mxu0 %v1995_v2  ;;  %v2012_v2 = vld [vmem:[%s7447_s3 + $0x1d8] sm:$0xff] }
  0x47   :  { %2167 = vmatpush1.msra.mxu1 %v1955_v57  ;;  %2397 = vmatprep.subr.mxu0 %v5210_v42 }
  0x48   :  { %4947 = vmatmul.mubr.msk.f32.gmra.mxu0 %vm117_vm1, %v86_v26  ;;  %2168 = vmatprep.subr.mxu1 %v5210_v42 }
  0x49   :  { %4949 = vmatprep.mubr.msk.f32.mxu0 %vm117_vm1, %v87_v27  ;;  %2169 = vmatpush1.msra.mxu1 %v1954_v59 }
  0x4a   :  { %2170 = vmatprep.subr.mxu1 %v5210_v42  ;;  %2398 = vmatpush1.msra.mxu0 %v1994_v4 }
  0x4b   :  { %2171 = vmatpush1.msra.mxu1 %v1953_v61  ;;  %2399 = vmatprep.subr.mxu0 %v5210_v42  ;;  %v2013_v61 = vld [vmem:[%s7447_s3 + $0x1e0] sm:$0xff] }
  0x4c   :  { %4950 = vmatmul.mubr.msk.f32.gmra.mxu0 %vm117_vm1, %v88_v28  ;;  %2172 = vmatprep.subr.mxu1 %v5210_v42  ;;  %v837_v28 = vld [vmem:[#allocation2 + $0x5] sm:$0xff] }
  0x4d   :  { %4952 = vmatprep.mubr.msk.f32.mxu0 %vm117_vm1, %v89_v29  ;;  %2173 = vmatpush2.msra.mxu1 %v1984_v63  ;;  %v1973_v29 = vld [vmem:[%s7447_s3 + $0xa0] sm:$0xff]  ;;  %873 = vst.msk [vmem:[#allocation3 + $0x8] sm:$0xff] %vm511_vm2, %v837_v28 }
  0x4e   :  { %2174 = vmatprep.subr.mxu1 %v5210_v42  ;;  %2400 = vmatpush1.msra.mxu0 %v1993_v6 }
  0x4f   :  { %2175 = vmatpush2.msra.mxu1 %v1983_v1  ;;  %2401 = vmatprep.subr.mxu0 %v5210_v42 }
  0x50   :  { %4953 = vmatmul.mubr.msk.f32.gmra.mxu0 %vm117_vm1, %v90_v30  ;;  %2176 = vmatprep.subr.mxu1 %v5210_v42  ;;  %v1985_v30 = vld [vmem:[%s7447_s3 + $0x100] sm:$0xff] }
  0x51   :  { %4955 = vmatprep.mubr.msk.f32.mxu0 %vm117_vm1, %v91_v31  ;;  %2177 = vmatpush2.msra.mxu1 %v1982_v3 }
  0x52   :  { %2178 = vmatprep.subr.mxu1 %v5210_v42  ;;  %2402 = vmatpush1.msra.mxu0 %v1992_v8 }
  0x53   :  { %2179 = vmatpush2.msra.mxu1 %v1981_v5  ;;  %2403 = vmatprep.subr.mxu0 %v5210_v42 }
  0x54   :  { %4956 = vmatmul.mubr.msk.f32.gmra.mxu0 %vm117_vm1, %v92_v32  ;;  %2180 = vmatprep.subr.mxu1 %v5210_v42 }
  0x55   :  { %4958 = vmatprep.mubr.msk.f32.mxu0 %vm117_vm1, %v93_v33  ;;  %2181 = vmatpush2.msra.mxu1 %v1980_v7 }
  0x56   :  { %2182 = vmatprep.subr.mxu1 %v5210_v42  ;;  %2404 = vmatpush1.msra.mxu0 %v1991_v10 }
  0x57   :  { %2183 = vmatpush2.msra.mxu1 %v1979_v9  ;;  %2405 = vmatprep.subr.mxu0 %v5210_v42 }
  0x58   :  { %4959 = vmatmul.mubr.msk.f32.gmra.mxu0 %vm117_vm1, %v94_v34  ;;  %2184 = vmatprep.subr.mxu1 %v5210_v42  ;;  %v1972_v34 = vld [vmem:[%s7447_s3 + $0x98] sm:$0xff] }
  0x59   :  { %4961 = vmatprep.mubr.msk.f32.mxu0 %vm117_vm1, %v95_v35  ;;  %2185 = vmatpush2.msra.mxu1 %v1978_v11  ;;  %v2016_v35 = vld [vmem:[%s7447_s3 + $0x1f8] sm:$0xff] }
  0x5a   :  { %2406 = vmatpush1.msra.mxu0 %v1990_v12  ;;  %2186 = vmatprep.subr.mxu1 %v5210_v42 }
  0x5b   :  { %2407 = vmatprep.subr.mxu0 %v5210_v42  ;;  %2187 = vmatpush2.msra.mxu1 %v1977_v13 }
  0x5c   :  { %4962 = vmatmul.mubr.msk.f32.gmra.mxu0 %vm117_vm1, %v96_v36  ;;  %2188 = vmatprep.subr.mxu1 %v5210_v42 }
  0x5d   :  { %4964 = vmatprep.mubr.msk.f32.mxu0 %vm117_vm1, %v97_v37  ;;  %2408 = vmatpush1.msra.mxu0 %v1989_v14 }
  0x5e   :  { %2409 = vmatprep.subr.mxu0 %v5210_v42  ;;  %2189 = vmatpush2.msra.mxu1 %v1976_v15 }
  0x5f   :  { %2410 = vmatpush1.msra.mxu0 %v1988_v16  ;;  %2190 = vmatprep.subr.mxu1 %v5210_v42 }
  0x60   :  { %4965 = vmatmul.mubr.msk.f32.gmra.mxu0 %vm117_vm1, %v98_v38  ;;  %2411 = vmatprep.subr.mxu0 %v5210_v42 }
  0x61   :  { %4967 = vmatprep.mubr.msk.f32.mxu0 %vm117_vm1, %v99_v39  ;;  %2191 = vmatpush2.msra.mxu1 %v1975_v18 }
  0x62   :  { %2412 = vmatpush1.msra.mxu0 %v1987_v19  ;;  %2192 = vmatprep.subr.mxu1 %v5210_v42 }
  0x63   :  { %2413 = vmatprep.subr.mxu0 %v5210_v42  ;;  %2193 = vmatpush2.msra.mxu1 %v1974_v22 }
  0x64   :  { %4968 = vmatmul.mubr.msk.f32.gmra.mxu0 %vm117_vm1, %v100_v40  ;;  %2194 = vmatprep.subr.mxu1 %v5210_v42 }
  0x65   :  { %2414 = vmatpush1.msra.mxu0 %v1986_v23  ;;  %2195 = vmatpush2.msra.mxu1 %v1973_v29 }
  0x66   :  { %2415 = vmatprep.subr.mxu0 %v5210_v42  ;;  %2196 = vmatprep.subr.mxu1 %v5210_v42 }
  0x67   :  { %2416 = vmatpush1.msra.mxu0 %v1985_v30  ;;  %2197 = vmatpush2.msra.mxu1 %v1972_v34 }
  0x68   :  { %2417 = vmatprep.subr.mxu0 %v5210_v42  ;;  %2198 = vmatprep.subr.mxu1 %v5210_v42 }
  0x69   :  { %2418 = vmatpush2.msra.mxu0 %v2016_v35  ;;  %2199 = vmatpush2.msra.mxu1 %v1971_v45 }
  0x6a   :  { %2419 = vmatprep.subr.mxu0 %v5210_v42  ;;  %2200 = vmatprep.subr.mxu1 %v5210_v42 }
  0x6b   :  { %2420 = vmatpush2.msra.mxu0 %v2015_v46  ;;  %2201 = vmatpush2.msra.mxu1 %v1970_v51 }
  0x6c   :  { %2421 = vmatprep.subr.mxu0 %v5210_v42  ;;  %2202 = vmatprep.subr.mxu1 %v5210_v42 }
  0x6d   :  { %2422 = vmatpush2.msra.mxu0 %v2014_v52  ;;  %2203 = vmatpush2.msra.mxu1 %v1969_v60 }
  0x6e   :  { %2423 = vmatprep.subr.mxu0 %v5210_v42 }
  0x6f   :  { %2424 = vmatpush2.msra.mxu0 %v2013_v61  ;;  %v2009_v61 = vld [vmem:[%s7447_s3 + $0x1c0] sm:$0xff] }
  0x70   :  { %2425 = vmatprep.subr.mxu0 %v5210_v42 }
  0x71   :  { %2426 = vmatpush2.msra.mxu0 %v2012_v2 }
  0x72   :  { %2427 = vmatprep.subr.mxu0 %v5210_v42 }
  0x9d   :  { %v693_v20 = vpop.permute.xlu0 %692 }
  0x9e   :  { %801 = vst.msk [vmem:[#allocation3] sm:$0xff] %vm800_vm3, %v693_v20 }
  0xe8   :  { %v4924_v24 = vpop.f32.mrf.mxu0 }
  0xe9   :  { %v302_v25 = vadd.f32 %v4924_v24, %v5616_v21 }
  0xea   :  { %v296_v26 = vpop.f32.mrf.mxu0  ;;  %v4972_v27 = vpop.f32.mrf.mxu1 }
  0xeb   :  { %v476_v31 = vmax.f32 %v302_v25, 0.0  ;;  %v297_v32 = vadd.f32 %v5616_v21, %v296_v26  ;;  %v462_v33 = vadd.f32 %v4972_v27, %v5616_v21 }
  0xec   :  { %v4927_v36 = vpop.f32.mrf.mxu0  ;;  %v456_v37 = vpop.f32.mrf.mxu1 }
  0xed   :  { %513 = vst.msk [vmem:[#allocation2 + $0x18] sm:$0xff] %vm511_vm2, %v476_v31  ;;  %v475_v38 = vmax.f32 %v297_v32, 0.0  ;;  %v312_v39 = vadd.f32 %v4927_v36, %v5616_v21  ;;  %v508_v40 = vmax.f32 %v462_v33, 0.0  ;;  %v457_v41 = vadd.f32 %v5616_v21, %v456_v37 }
  0xee   :  { %v306_v43 = vpop.f32.mrf.mxu0  ;;  %v4975_v44 = vpop.f32.mrf.mxu1 }
  0xef   :  { %512 = vst.msk [vmem:[#allocation2 + $0x10] sm:$0xff] %vm511_vm2, %v475_v38  ;;  %v478_v47 = vmax.f32 %v312_v39, 0.0  ;;  %v307_v48 = vadd.f32 %v5616_v21, %v306_v43  ;;  %545 = vst.msk [vmem:[#allocation2 + $0x118] sm:$0xff] %vm511_vm2, %v508_v40  ;;  %v507_v49 = vmax.f32 %v457_v41, 0.0  ;;  %v472_v50 = vadd.f32 %v4975_v44, %v5616_v21 }
  0xf0   :  { %v4930_v53 = vpop.f32.mrf.mxu0  ;;  %v466_v54 = vpop.f32.mrf.mxu1 }
  0xf1   :  { %515 = vst.msk [vmem:[#allocation2 + $0x28] sm:$0xff] %vm511_vm2, %v478_v47  ;;  %v477_v55 = vmax.f32 %v307_v48, 0.0  ;;  %v322_v56 = vadd.f32 %v4930_v53, %v5616_v21  ;;  %544 = vst.msk [vmem:[#allocation2 + $0x110] sm:$0xff] %vm511_vm2, %v507_v49  ;;  %v510_v57 = vmax.f32 %v472_v50, 0.0  ;;  %v467_v58 = vadd.f32 %v5616_v21, %v466_v54  ;;  %v2011_v48 = vld [vmem:[%s7447_s3 + $0x1d0] sm:$0xff]  ;;  %v2010_v53 = vld [vmem:[%s7447_s3 + $0x1c8] sm:$0xff] }
  0xf2   :  { %v316_v59 = vpop.f32.mrf.mxu0  ;;  %2428 = vmatpush2.msra.mxu0 %v2011_v48 }
  0xf3   :  { %514 = vst.msk [vmem:[#allocation2 + $0x20] sm:$0xff] %vm511_vm2, %v477_v55  ;;  %v480_v62 = vmax.f32 %v322_v56, 0.0  ;;  %v317_v63 = vadd.f32 %v5616_v21, %v316_v59  ;;  %547 = vst.msk [vmem:[#allocation2 + $0x128] sm:$0xff] %vm511_vm2, %v510_v57  ;;  %v509_v0 = vmax.f32 %v467_v58, 0.0  ;;  %2429 = vmatprep.subr.mxu0 %v5210_v42 }
  0xf4   :  { %v4933_v1 = vpop.f32.mrf.mxu0  ;;  %v1126_v3 = vld [vmem:[#allocation2 + $0x18] sm:$0xff]  ;;  %2430 = vmatpush2.msra.mxu0 %v2010_v53 }
  0xf5   :  { %517 = vst.msk [vmem:[#allocation2 + $0x38] sm:$0xff] %vm511_vm2, %v480_v62  ;;  %v479_v4 = vmax.f32 %v317_v63, 0.0  ;;  %v332_v5 = vadd.f32 %v4933_v1, %v5616_v21  ;;  %546 = vst.msk [vmem:[#allocation2 + $0x120] sm:$0xff] %vm511_vm2, %v509_v0  ;;  %2431 = vmatprep.subr.mxu0 %v5210_v42 }
  0xf6   :  { %1162 = vst.msk [vmem:[#allocation3 + $0x38] sm:$0xff] %vm511_vm2, %v1126_v3  ;;  %v326_v6 = vpop.f32.mrf.mxu0  ;;  %v910_v7 = vld [vmem:[#allocation2 + $0x17] sm:$0xff]  ;;  %v909_v8 = vld [vmem:[#allocation2 + $0xf] sm:$0xff]  ;;  %2432 = vmatpush2.msra.mxu0 %v2009_v61 }
  0xf7   :  { %516 = vst.msk [vmem:[#allocation2 + $0x30] sm:$0xff] %vm511_vm2, %v479_v4  ;;  %v482_v9 = vmax.f32 %v332_v5, 0.0  ;;  %v327_v10 = vadd.f32 %v5616_v21, %v326_v6  ;;  %983 = vrot.lane.b32.xlu1 %v910_v7, %s5209_s25  ;;  %981 = vrot.lane.b32.xlu0 %v909_v8, %s5209_s25  ;;  %v838_v11 = vld [vmem:[#allocation2 + $0xd] sm:$0xff]  ;;  %v839_v15 = vld [vmem:[#allocation2 + $0x15] sm:$0xff] }
  0xf8   :  { %v621_v12 = vld [vmem:[#allocation2 + $0xc] sm:$0xff]  ;;  %v4936_v13 = vpop.f32.mrf.mxu0  ;;  %v1732_v14 = vld [vmem:[#allocation2 + $0x115] sm:$0xff]  ;;  %874 = vst.msk [vmem:[#allocation3 + $0x30] sm:$0xff] %vm511_vm2, %v838_v11  ;;  %875 = vst.msk [vmem:[#allocation3 + $0x58] sm:$0xff] %vm511_vm2, %v839_v15  ;;  %2433 = vmatprep.subr.mxu0 %v5210_v42 }
  0xf9   :  { %519 = vst.msk [vmem:[#allocation2 + $0x48] sm:$0xff] %vm511_vm2, %v482_v9  ;;  %v481_v16 = vmax.f32 %v327_v10, 0.0  ;;  %v342_v17 = vadd.f32 %v4936_v13, %v5616_v21  ;;  %1768 = vst.msk [vmem:[#allocation3 + $0x4f8] sm:$0xff] %vm511_vm2, %v1732_v14  ;;  %v549_v18 = vld [vmem:[#allocation2 + $0xb] sm:$0xff]  ;;  %v550_v19 = vld [vmem:[#allocation2 + $0x13] sm:$0xff] }
  0xfa   :  { %v1125_v20 = vld [vmem:[#allocation2 + $0x10] sm:$0xff]  ;;  %v1701_v22 = vld [vmem:[#allocation2 + $0x1d] sm:$0xff]  ;;  %v1702_v23 = vld [vmem:[#allocation2 + $0x25] sm:$0xff]  ;;  %v336_v25 = vpop.f32.mrf.mxu0  ;;  %585 = vst.msk [vmem:[#allocation3 + $0x28] sm:$0xff] %vm511_vm2, %v549_v18 }
  0xfb   :  { %v911_v24 = vld [vmem:[#allocation2 + $0x1f] sm:$0xff]  ;;  %586 = vst.msk [vmem:[#allocation3 + $0x50] sm:$0xff] %vm511_vm2, %v550_v19  ;;  %1161 = vst.msk [vmem:[#allocation3 + $0x10] sm:$0xff] %vm511_vm2, %v1125_v20  ;;  %694 = vrot.lane.b32.xlu1 %v621_v12, %s5209_s25  ;;  %v484_v26 = vmax.f32 %v342_v17, 0.0  ;;  %v337_v27 = vadd.f32 %v5616_v21, %v336_v25  ;;  %v1735_v29 = vld [vmem:[#allocation2 + $0x12d] sm:$0xff] }
  0xfc   :  { %1738 = vst.msk [vmem:[#allocation3 + $0x48] sm:$0xff] %vm511_vm2, %v1702_v23  ;;  %1737 = vst.msk [vmem:[#allocation3 + $0x20] sm:$0xff] %vm511_vm2, %v1701_v22  ;;  %985 = vrot.lane.b32.xlu0 %v911_v24, %s5209_s25  ;;  %v4939_v28 = vpop.f32.mrf.mxu0  ;;  %v622_v31 = vld [vmem:[#allocation2 + $0x14] sm:$0xff]  ;;  %v1733_v33 = vld [vmem:[#allocation2 + $0x11d] sm:$0xff] }
  0xfd   :  { %518 = vst.msk [vmem:[#allocation2 + $0x40] sm:$0xff] %vm511_vm2, %v481_v16  ;;  %876 = vst.msk [vmem:[#allocation3 + $0x80] sm:$0xff] %vm511_vm2, %v1701_v22  ;;  %v483_v30 = vmax.f32 %v337_v27, 0.0  ;;  %v352_v32 = vadd.f32 %v4939_v28, %v5616_v21  ;;  %v1734_v34 = vld [vmem:[#allocation2 + $0x125] sm:$0xff]  ;;  %v1197_v41 = vld [vmem:[#allocation2 + $0x11] sm:$0xff] }
  0xfe   :  { %521 = vst.msk [vmem:[#allocation2 + $0x58] sm:$0xff] %vm511_vm2, %v484_v26  ;;  %1771 = vst.msk [vmem:[#allocation3 + $0x570] sm:$0xff] %vm511_vm2, %v1735_v29  ;;  %v1703_v35 = vld [vmem:[#allocation2 + $0x2d] sm:$0xff]  ;;  %v1704_v36 = vld [vmem:[#allocation2 + $0x35] sm:$0xff]  ;;  %v346_v38 = vpop.f32.mrf.mxu0 }
  0xff   :  { %v912_v37 = vld [vmem:[#allocation2 + $0x27] sm:$0xff]  ;;  %1769 = vst.msk [vmem:[#allocation3 + $0x520] sm:$0xff] %vm511_vm2, %v1733_v33  ;;  %1770 = vst.msk [vmem:[#allocation3 + $0x548] sm:$0xff] %vm511_vm2, %v1734_v34  ;;  %696 = vrot.lane.b32.xlu1 %v622_v31, %s5209_s25  ;;  %v486_v39 = vmax.f32 %v352_v32, 0.0  ;;  %v347_v40 = vadd.f32 %v5616_v21, %v346_v38  ;;  %v913_v45 = vld [vmem:[#allocation2 + $0x2f] sm:$0xff] }
 0x100   :  { %1739 = vst.msk [vmem:[#allocation3 + $0x70] sm:$0xff] %vm511_vm2, %v1703_v35  ;;  %1740 = vst.msk [vmem:[#allocation3 + $0x98] sm:$0xff] %vm511_vm2, %v1704_v36  ;;  %987 = vrot.lane.b32.xlu0 %v912_v37, %s5209_s25  ;;  %v4942_v43 = vpop.f32.mrf.mxu0  ;;  %v841_v44 = vld [vmem:[#allocation2 + $0x25] sm:$0xff]  ;;  %v842_v49 = vld [vmem:[#allocation2 + $0x2d] sm:$0xff] }
 0x101   :  { %520 = vst.msk [vmem:[#allocation2 + $0x50] sm:$0xff] %vm511_vm2, %v483_v30  ;;  %523 = vst.msk [vmem:[#allocation2 + $0x68] sm:$0xff] %vm511_vm2, %v486_v39  ;;  %v485_v46 = vmax.f32 %v347_v40, 0.0  ;;  %v362_v47 = vadd.f32 %v4942_v43, %v5616_v21  ;;  %v551_v57 = vld [vmem:[#allocation2 + $0x1b] sm:$0xff]  ;;  %v552_v7 = vld [vmem:[#allocation2 + $0x23] sm:$0xff] }
 0x102   :  { %877 = vst.msk [vmem:[#allocation3 + $0xa8] sm:$0xff] %vm511_vm2, %v841_v44  ;;  %v356_v52 = vpop.f32.mrf.mxu0  ;;  %878 = vst.msk [vmem:[#allocation3 + $0xd0] sm:$0xff] %vm511_vm2, %v842_v49  ;;  %v5741_v58 = vld [vmem:[#allocation2 + $0x1c] sm:$0xff]  ;;  %v5762_v9 = vld [vmem:[#allocation2 + $0x24] sm:$0xff] }
 0x103   :  { %1269 = vrot.lane.b32.xlu1 %v1197_v41, %s5209_s25  ;;  %522 = vst.msk [vmem:[#allocation2 + $0x60] sm:$0xff] %vm511_vm2, %v485_v46  ;;  %v488_v54 = vmax.f32 %v362_v47, 0.0  ;;  %v357_v55 = vadd.f32 %v5616_v21, %v356_v52  ;;  %587 = vst.msk [vmem:[#allocation3 + $0x78] sm:$0xff] %vm511_vm2, %v551_v57  ;;  %v843_v62 = vld [vmem:[#allocation2 + $0x35] sm:$0xff]  ;;  %v2006_v24 = vld [vmem:[%s7447_s3 + $0x1a8] sm:$0xff] }
 0x104   :  { %v1705_v50 = vld [vmem:[#allocation2 + $0x3d] sm:$0xff]  ;;  %v1706_v51 = vld [vmem:[#allocation2 + $0x45] sm:$0xff]  ;;  %989 = vrot.lane.b32.xlu0 %v913_v45, %s5209_s25  ;;  %v4945_v56 = vpop.f32.mrf.mxu0  ;;  %1449 = vst.msk [vmem:[#allocation3 + $0x18] sm:$0xff] %vm511_vm2, %v551_v57  ;;  %879 = vst.msk [vmem:[#allocation3 + $0xf8] sm:$0xff] %vm511_vm2, %v843_v62 }
 0x105   :  { %1741 = vst.msk [vmem:[#allocation3 + $0xc0] sm:$0xff] %vm511_vm2, %v1705_v50  ;;  %1742 = vst.msk [vmem:[#allocation3 + $0xe8] sm:$0xff] %vm511_vm2, %v1706_v51  ;;  %v487_v59 = vmax.f32 %v357_v55, 0.0  ;;  %v372_v60 = vadd.f32 %v4945_v56, %v5616_v21  ;;  %v914_v1 = vld [vmem:[#allocation2 + $0x37] sm:$0xff]  ;;  %v915_v8 = vld [vmem:[#allocation2 + $0x3f] sm:$0xff] }
 0x106   :  { %525 = vst.msk [vmem:[#allocation2 + $0x78] sm:$0xff] %vm511_vm2, %v488_v54  ;;  %v366_v2 = vpop.f32.mrf.mxu0  ;;  %v2008_v5 = vld [vmem:[%s7447_s3 + $0x1b8] sm:$0xff]  ;;  %588 = vst.msk [vmem:[#allocation3 + $0xa0] sm:$0xff] %vm511_vm2, %v552_v7  ;;  %v2007_v16 = vld [vmem:[%s7447_s3 + $0x1b0] sm:$0xff] }
 0x107   :  { %698 = vrot.lane.b32.xlu1 %v5741_v58, %s5209_s25  ;;  %524 = vst.msk [vmem:[#allocation2 + $0x70] sm:$0xff] %vm511_vm2, %v487_v59  ;;  %v490_v3 = vmax.f32 %v372_v60, 0.0  ;;  %v367_v4 = vadd.f32 %v5616_v21, %v366_v2  ;;  %v844_v12 = vld [vmem:[#allocation2 + $0x3d] sm:$0xff]  ;;  %1450 = vst.msk [vmem:[#allocation3 + $0x40] sm:$0xff] %vm511_vm2, %v552_v7  ;;  %2434 = vmatpush2.msra.mxu0 %v2008_v5  ;;  %v845_v20 = vld [vmem:[#allocation2 + $0x45] sm:$0xff] }
 0x108   :  { %v1707_v63 = vld [vmem:[#allocation2 + $0x4d] sm:$0xff]  ;;  %v1708_v0 = vld [vmem:[#allocation2 + $0x55] sm:$0xff]  ;;  %991 = vrot.lane.b32.xlu0 %v914_v1, %s5209_s25  ;;  %v4948_v6 = vpop.f32.mrf.mxu0  ;;  %880 = vst.msk [vmem:[#allocation3 + $0x120] sm:$0xff] %vm511_vm2, %v844_v12  ;;  %2435 = vmatprep.subr.mxu0 %v5210_v42  ;;  %881 = vst.msk [vmem:[#allocation3 + $0x148] sm:$0xff] %vm511_vm2, %v845_v20 }
 0x109   :  { %1743 = vst.msk [vmem:[#allocation3 + $0x110] sm:$0xff] %vm511_vm2, %v1707_v63  ;;  %1744 = vst.msk [vmem:[#allocation3 + $0x138] sm:$0xff] %vm511_vm2, %v1708_v0  ;;  %v489_v10 = vmax.f32 %v367_v4, 0.0  ;;  %v382_v11 = vadd.f32 %v4948_v6, %v5616_v21  ;;  %2436 = vmatpush2.msra.mxu0 %v2007_v16  ;;  %v846_v25 = vld [vmem:[#allocation2 + $0x4d] sm:$0xff]  ;;  %v2005_v32 = vld [vmem:[%s7447_s3 + $0x1a0] sm:$0xff] }
 0x10a   :  { %527 = vst.msk [vmem:[#allocation2 + $0x88] sm:$0xff] %vm511_vm2, %v490_v3  ;;  %v1709_v13 = vld [vmem:[#allocation2 + $0x5d] sm:$0xff]  ;;  %v1710_v14 = vld [vmem:[#allocation2 + $0x65] sm:$0xff]  ;;  %v376_v15 = vpop.f32.mrf.mxu0  ;;  %2437 = vmatprep.subr.mxu0 %v5210_v42  ;;  %882 = vst.msk [vmem:[#allocation3 + $0x170] sm:$0xff] %vm511_vm2, %v846_v25 }
 0x10b   :  { %1745 = vst.msk [vmem:[#allocation3 + $0x160] sm:$0xff] %vm511_vm2, %v1709_v13  ;;  %1746 = vst.msk [vmem:[#allocation3 + $0x188] sm:$0xff] %vm511_vm2, %v1710_v14  ;;  %700 = vrot.lane.b32.xlu1 %v5762_v9, %s5209_s25  ;;  %v492_v17 = vmax.f32 %v382_v11, 0.0  ;;  %v377_v18 = vadd.f32 %v5616_v21, %v376_v15  ;;  %v916_v28 = vld [vmem:[#allocation2 + $0x47] sm:$0xff]  ;;  %2438 = vmatpush2.msra.mxu0 %v2006_v24  ;;  %v847_v34 = vld [vmem:[#allocation2 + $0x55] sm:$0xff] }
 0x10c   :  { %993 = vrot.lane.b32.xlu0 %v915_v8, %s5209_s25  ;;  %526 = vst.msk [vmem:[#allocation2 + $0x80] sm:$0xff] %vm511_vm2, %v489_v10  ;;  %v4951_v19 = vpop.f32.mrf.mxu0  ;;  %v1127_v35 = vld [vmem:[#allocation2 + $0x20] sm:$0xff]  ;;  %v917_v36 = vld [vmem:[#allocation2 + $0x4f] sm:$0xff]  ;;  %2439 = vmatprep.subr.mxu0 %v5210_v42  ;;  %883 = vst.msk [vmem:[#allocation3 + $0x198] sm:$0xff] %vm511_vm2, %v847_v34 }
 0x10d   :  { %529 = vst.msk [vmem:[#allocation2 + $0x98] sm:$0xff] %vm511_vm2, %v492_v17  ;;  %v491_v22 = vmax.f32 %v377_v18, 0.0  ;;  %v392_v23 = vadd.f32 %v4951_v19, %v5616_v21  ;;  %1163 = vst.msk [vmem:[#allocation3 + $0x60] sm:$0xff] %vm511_vm2, %v1127_v35  ;;  %v848_v39 = vld [vmem:[#allocation2 + $0x5d] sm:$0xff]  ;;  %v553_v40 = vld [vmem:[#allocation2 + $0x2b] sm:$0xff]  ;;  %2440 = vmatpush2.msra.mxu0 %v2005_v32 }
 0x10e   :  { %v1711_v26 = vld [vmem:[#allocation2 + $0x6d] sm:$0xff]  ;;  %v1712_v27 = vld [vmem:[#allocation2 + $0x75] sm:$0xff]  ;;  %v386_v29 = vpop.f32.mrf.mxu0  ;;  %884 = vst.msk [vmem:[#allocation3 + $0x1c0] sm:$0xff] %vm511_vm2, %v848_v39  ;;  %589 = vst.msk [vmem:[#allocation3 + $0xc8] sm:$0xff] %vm511_vm2, %v553_v40  ;;  %2441 = vmatprep.subr.mxu0 %v5210_v42 }
 0x10f   :  { %1747 = vst.msk [vmem:[#allocation3 + $0x1b0] sm:$0xff] %vm511_vm2, %v1711_v26  ;;  %1748 = vst.msk [vmem:[#allocation3 + $0x1d8] sm:$0xff] %vm511_vm2, %v1712_v27  ;;  %1557 = vrot.lane.b32.xlu1 %v5741_v58, %s5209_s25  ;;  %v494_v30 = vmax.f32 %v392_v23, 0.0  ;;  %v387_v31 = vadd.f32 %v5616_v21, %v386_v29  ;;  %v2004_v45 = vld [vmem:[%s7447_s3 + $0x198] sm:$0xff]  ;;  %v849_v50 = vld [vmem:[#allocation2 + $0x65] sm:$0xff] }
 0x110   :  { %995 = vrot.lane.b32.xlu0 %v916_v28, %s5209_s25  ;;  %528 = vst.msk [vmem:[#allocation2 + $0x90] sm:$0xff] %vm511_vm2, %v491_v22  ;;  %v4954_v33 = vpop.f32.mrf.mxu0  ;;  %1451 = vst.msk [vmem:[#allocation3 + $0x68] sm:$0xff] %vm511_vm2, %v553_v40  ;;  %v1198_v48 = vld [vmem:[#allocation2 + $0x19] sm:$0xff]  ;;  %2442 = vmatpush2.msra.mxu0 %v2004_v45  ;;  %v2003_v54 = vld [vmem:[%s7447_s3 + $0x190] sm:$0xff] }
 0x111   :  { %531 = vst.msk [vmem:[#allocation2 + $0xa8] sm:$0xff] %vm511_vm2, %v494_v30  ;;  %v493_v37 = vmax.f32 %v387_v31, 0.0  ;;  %v402_v38 = vadd.f32 %v4954_v33, %v5616_v21  ;;  %v554_v51 = vld [vmem:[#allocation2 + $0x33] sm:$0xff]  ;;  %885 = vst.msk [vmem:[#allocation3 + $0x1e8] sm:$0xff] %vm511_vm2, %v849_v50  ;;  %2443 = vmatprep.subr.mxu0 %v5210_v42  ;;  %v2002_v63 = vld [vmem:[%s7447_s3 + $0x188] sm:$0xff] }
 0x112   :  { %v396_v44 = vpop.f32.mrf.mxu0  ;;  %590 = vst.msk [vmem:[#allocation3 + $0xf0] sm:$0xff] %vm511_vm2, %v554_v51  ;;  %v850_v55 = vld [vmem:[#allocation2 + $0x6d] sm:$0xff]  ;;  %v851_v56 = vld [vmem:[#allocation2 + $0x75] sm:$0xff]  ;;  %1452 = vst.msk [vmem:[#allocation3 + $0x90] sm:$0xff] %vm511_vm2, %v554_v51  ;;  %2444 = vmatpush2.msra.mxu0 %v2003_v54 }
 0x113   :  { %v1713_v41 = vld [vmem:[#allocation2 + $0x7d] sm:$0xff]  ;;  %v1714_v43 = vld [vmem:[#allocation2 + $0x85] sm:$0xff]  ;;  %1559 = vrot.lane.b32.xlu1 %v5762_v9, %s5209_s25  ;;  %530 = vst.msk [vmem:[#allocation2 + $0xa0] sm:$0xff] %vm511_vm2, %v493_v37  ;;  %v496_v46 = vmax.f32 %v402_v38, 0.0  ;;  %v397_v47 = vadd.f32 %v5616_v21, %v396_v44  ;;  %886 = vst.msk [vmem:[#allocation3 + $0x210] sm:$0xff] %vm511_vm2, %v850_v55  ;;  %2445 = vmatprep.subr.mxu0 %v5210_v42 }
 0x114   :  { %1749 = vst.msk [vmem:[#allocation3 + $0x200] sm:$0xff] %vm511_vm2, %v1713_v41  ;;  %1750 = vst.msk [vmem:[#allocation3 + $0x228] sm:$0xff] %vm511_vm2, %v1714_v43  ;;  %997 = vrot.lane.b32.xlu0 %v917_v36, %s5209_s25  ;;  %v4957_v49 = vpop.f32.mrf.mxu0  ;;  %v918_v59 = vld [vmem:[#allocation2 + $0x57] sm:$0xff]  ;;  %v1199_v0 = vld [vmem:[#allocation2 + $0x21] sm:$0xff]  ;;  %2446 = vmatpush2.msra.mxu0 %v2002_v63 }
 0x115   :  { %533 = vst.msk [vmem:[#allocation2 + $0xb8] sm:$0xff] %vm511_vm2, %v496_v46  ;;  %v495_v52 = vmax.f32 %v397_v47, 0.0  ;;  %v412_v53 = vadd.f32 %v4957_v49, %v5616_v21  ;;  %887 = vst.msk [vmem:[#allocation3 + $0x238] sm:$0xff] %vm511_vm2, %v851_v56  ;;  %v852_v2 = vld [vmem:[#allocation2 + $0x7d] sm:$0xff]  ;;  %v1128_v3 = vld [vmem:[#allocation2 + $0x28] sm:$0xff]  ;;  %2447 = vmatprep.subr.mxu0 %v5210_v42 }
 0x116   :  { %v406_v60 = vpop.f32.mrf.mxu0  ;;  %v853_v4 = vld [vmem:[#allocation2 + $0x85] sm:$0xff]  ;;  %888 = vst.msk [vmem:[#allocation3 + $0x260] sm:$0xff] %vm511_vm2, %v852_v2  ;;  %1164 = vst.msk [vmem:[#allocation3 + $0x88] sm:$0xff] %vm511_vm2, %v1128_v3  ;;  %v1129_v8 = vld [vmem:[#allocation2 + $0x30] sm:$0xff] }
 0x117   :  { %v1715_v57 = vld [vmem:[#allocation2 + $0x8d] sm:$0xff]  ;;  %v1716_v58 = vld [vmem:[#allocation2 + $0x95] sm:$0xff]  ;;  %1271 = vrot.lane.b32.xlu1 %v1198_v48, %s5209_s25  ;;  %532 = vst.msk [vmem:[#allocation2 + $0xb0] sm:$0xff] %vm511_vm2, %v495_v52  ;;  %v498_v61 = vmax.f32 %v412_v53, 0.0  ;;  %v407_v62 = vadd.f32 %v5616_v21, %v406_v60  ;;  %v919_v5 = vld [vmem:[#allocation2 + $0x5f] sm:$0xff] }
 0x118   :  { %1751 = vst.msk [vmem:[#allocation3 + $0x250] sm:$0xff] %vm511_vm2, %v1715_v57  ;;  %1752 = vst.msk [vmem:[#allocation3 + $0x278] sm:$0xff] %vm511_vm2, %v1716_v58  ;;  %999 = vrot.lane.b32.xlu0 %v918_v59, %s5209_s25  ;;  %v4960_v1 = vpop.f32.mrf.mxu0  ;;  %v854_v9 = vld [vmem:[#allocation2 + $0x8d] sm:$0xff]  ;;  %v2001_v13 = vld [vmem:[%s7447_s3 + $0x180] sm:$0xff] }
 0x119   :  { %535 = vst.msk [vmem:[#allocation2 + $0xc8] sm:$0xff] %vm511_vm2, %v498_v61  ;;  %v497_v6 = vmax.f32 %v407_v62, 0.0  ;;  %v422_v7 = vadd.f32 %v4960_v1, %v5616_v21  ;;  %889 = vst.msk [vmem:[#allocation3 + $0x288] sm:$0xff] %vm511_vm2, %v853_v4  ;;  %v555_v17 = vld [vmem:[#allocation2 + $0x3b] sm:$0xff]  ;;  %v556_v18 = vld [vmem:[#allocation2 + $0x43] sm:$0xff]  ;;  %2448 = vmatpush2.msra.mxu0 %v2001_v13 }
 0x11a   :  { %v1717_v10 = vld [vmem:[#allocation2 + $0x9d] sm:$0xff]  ;;  %v1718_v11 = vld [vmem:[#allocation2 + $0xa5] sm:$0xff]  ;;  %v416_v12 = vpop.f32.mrf.mxu0  ;;  %1165 = vst.msk [vmem:[#allocation3 + $0xb0] sm:$0xff] %vm511_vm2, %v1129_v8  ;;  %890 = vst.msk [vmem:[#allocation3 + $0x2b0] sm:$0xff] %vm511_vm2, %v854_v9 }
 0x11b   :  { %1753 = vst.msk [vmem:[#allocation3 + $0x2a0] sm:$0xff] %vm511_vm2, %v1717_v10  ;;  %1754 = vst.msk [vmem:[#allocation3 + $0x2c8] sm:$0xff] %vm511_vm2, %v1718_v11  ;;  %1273 = vrot.lane.b32.xlu1 %v1199_v0, %s5209_s25  ;;  %v500_v14 = vmax.f32 %v422_v7, 0.0  ;;  %v417_v15 = vadd.f32 %v5616_v21, %v416_v12  ;;  %v5856_v19 = vld [vmem:[#allocation2 + $0x2c] sm:$0xff]  ;;  %v871_v23 = vld [vmem:[#allocation2 + $0x115] sm:$0xff] }
 0x11c   :  { %1001 = vrot.lane.b32.xlu0 %v919_v5, %s5209_s25  ;;  %534 = vst.msk [vmem:[#allocation2 + $0xc0] sm:$0xff] %vm511_vm2, %v497_v6  ;;  %v4963_v16 = vpop.f32.mrf.mxu0  ;;  %591 = vst.msk [vmem:[#allocation3 + $0x118] sm:$0xff] %vm511_vm2, %v555_v17  ;;  %v855_v24 = vld [vmem:[#allocation2 + $0x95] sm:$0xff]  ;;  %v920_v27 = vld [vmem:[#allocation2 + $0x67] sm:$0xff] }
 0x11d   :  { %537 = vst.msk [vmem:[#allocation2 + $0xd8] sm:$0xff] %vm511_vm2, %v500_v14  ;;  %v499_v20 = vmax.f32 %v417_v15, 0.0  ;;  %v432_v22 = vadd.f32 %v4963_v16, %v5616_v21  ;;  %592 = vst.msk [vmem:[#allocation3 + $0x140] sm:$0xff] %vm511_vm2, %v556_v18  ;;  %v856_v32 = vld [vmem:[#allocation2 + $0x9d] sm:$0xff]  ;;  %v626_v34 = vld [vmem:[#allocation2 + $0x34] sm:$0xff] }
 0x11e   :  { %1453 = vst.msk [vmem:[#allocation3 + $0xb8] sm:$0xff] %vm511_vm2, %v555_v17  ;;  %1454 = vst.msk [vmem:[#allocation3 + $0xe0] sm:$0xff] %vm511_vm2, %v556_v18  ;;  %v1719_v25 = vld [vmem:[#allocation2 + $0xad] sm:$0xff]  ;;  %v1720_v26 = vld [vmem:[#allocation2 + $0xb5] sm:$0xff]  ;;  %v426_v28 = vpop.f32.mrf.mxu0 }
 0x11f   :  { %907 = vst.msk [vmem:[#allocation3 + $0x558] sm:$0xff] %vm511_vm2, %v871_v23  ;;  %891 = vst.msk [vmem:[#allocation3 + $0x2d8] sm:$0xff] %vm511_vm2, %v855_v24  ;;  %702 = vrot.lane.b32.xlu1 %v5856_v19, %s5209_s25  ;;  %v502_v29 = vmax.f32 %v432_v22, 0.0  ;;  %v427_v30 = vadd.f32 %v5616_v21, %v426_v28  ;;  %v1130_v33 = vld [vmem:[#allocation2 + $0x38] sm:$0xff]  ;;  %v1131_v38 = vld [vmem:[#allocation2 + $0x40] sm:$0xff] }
 0x120   :  { %1755 = vst.msk [vmem:[#allocation3 + $0x2f0] sm:$0xff] %vm511_vm2, %v1719_v25  ;;  %1756 = vst.msk [vmem:[#allocation3 + $0x318] sm:$0xff] %vm511_vm2, %v1720_v26  ;;  %1003 = vrot.lane.b32.xlu0 %v920_v27, %s5209_s25  ;;  %v4966_v31 = vpop.f32.mrf.mxu0  ;;  %v567_v37 = vld [vmem:[#allocation2 + $0x9b] sm:$0xff]  ;;  %v921_v41 = vld [vmem:[#allocation2 + $0x6f] sm:$0xff] }
 0x121   :  { %536 = vst.msk [vmem:[#allocation2 + $0xd0] sm:$0xff] %vm511_vm2, %v499_v20  ;;  %539 = vst.msk [vmem:[#allocation2 + $0xe8] sm:$0xff] %vm511_vm2, %v502_v29  ;;  %v501_v35 = vmax.f32 %v427_v30, 0.0  ;;  %v442_v36 = vadd.f32 %v4966_v31, %v5616_v21  ;;  %v568_v47 = vld [vmem:[#allocation2 + $0xa3] sm:$0xff]  ;;  %v557_v48 = vld [vmem:[#allocation2 + $0x4b] sm:$0xff] }
 0x122   :  { %892 = vst.msk [vmem:[#allocation3 + $0x300] sm:$0xff] %vm511_vm2, %v856_v32  ;;  %1166 = vst.msk [vmem:[#allocation3 + $0xd8] sm:$0xff] %vm511_vm2, %v1130_v33  ;;  %v436_v43 = vpop.f32.mrf.mxu0  ;;  %v857_v51 = vld [vmem:[#allocation2 + $0xa5] sm:$0xff]  ;;  %v922_v54 = vld [vmem:[#allocation2 + $0x77] sm:$0xff] }
 0x123   :  { %v1721_v39 = vld [vmem:[#allocation2 + $0xbd] sm:$0xff]  ;;  %v1722_v40 = vld [vmem:[#allocation2 + $0xc5] sm:$0xff]  ;;  %603 = vst.msk [vmem:[#allocation3 + $0x2f8] sm:$0xff] %vm511_vm2, %v567_v37  ;;  %1167 = vst.msk [vmem:[#allocation3 + $0x100] sm:$0xff] %vm511_vm2, %v1131_v38  ;;  %704 = vrot.lane.b32.xlu1 %v626_v34, %s5209_s25  ;;  %v504_v44 = vmax.f32 %v442_v36, 0.0  ;;  %v437_v45 = vadd.f32 %v5616_v21, %v436_v43 }
 0x124   :  { %1465 = vst.msk [vmem:[#allocation3 + $0x298] sm:$0xff] %vm511_vm2, %v567_v37  ;;  %1757 = vst.msk [vmem:[#allocation3 + $0x340] sm:$0xff] %vm511_vm2, %v1721_v39  ;;  %1005 = vrot.lane.b32.xlu0 %v921_v41, %s5209_s25  ;;  %v4969_v46 = vpop.f32.mrf.mxu0  ;;  %v558_v58 = vld [vmem:[#allocation2 + $0x53] sm:$0xff]  ;;  %v569_v61 = vld [vmem:[#allocation2 + $0xab] sm:$0xff] }
 0x125   :  { %1758 = vst.msk [vmem:[#allocation3 + $0x368] sm:$0xff] %vm511_vm2, %v1722_v40  ;;  %538 = vst.msk [vmem:[#allocation2 + $0xe0] sm:$0xff] %vm511_vm2, %v501_v35  ;;  %v503_v49 = vmax.f32 %v437_v45, 0.0  ;;  %v452_v50 = vadd.f32 %v4969_v46, %v5616_v21  ;;  %v858_v60 = vld [vmem:[#allocation2 + $0xad] sm:$0xff]  ;;  %v923_v0 = vld [vmem:[#allocation2 + $0x7f] sm:$0xff] }
 0x126   :  { %541 = vst.msk [vmem:[#allocation2 + $0xf8] sm:$0xff] %vm511_vm2, %v504_v44  ;;  %604 = vst.msk [vmem:[#allocation3 + $0x320] sm:$0xff] %vm511_vm2, %v568_v47  ;;  %v446_v55 = vpop.f32.mrf.mxu0  ;;  %v1132_v1 = vld [vmem:[#allocation2 + $0x48] sm:$0xff]  ;;  %v859_v3 = vld [vmem:[#allocation2 + $0xb5] sm:$0xff] }
 0x127   :  { %593 = vst.msk [vmem:[#allocation3 + $0x168] sm:$0xff] %vm511_vm2, %v557_v48  ;;  %1455 = vst.msk [vmem:[#allocation3 + $0x108] sm:$0xff] %vm511_vm2, %v557_v48  ;;  %1561 = vrot.lane.b32.xlu1 %v5856_v19, %s5209_s25  ;;  %v506_v56 = vmax.f32 %v452_v50, 0.0  ;;  %v447_v57 = vadd.f32 %v5616_v21, %v446_v55  ;;  %v570_v21 = vld [vmem:[#allocation2 + $0xb3] sm:$0xff]  ;;  %v1200_v2 = vld [vmem:[#allocation2 + $0x29] sm:$0xff] }
 0x128   :  { %1466 = vst.msk [vmem:[#allocation3 + $0x2c0] sm:$0xff] %vm511_vm2, %v568_v47  ;;  %v1723_v52 = vld [vmem:[#allocation2 + $0xcd] sm:$0xff]  ;;  %v1724_v53 = vld [vmem:[#allocation2 + $0xd5] sm:$0xff]  ;;  %893 = vst.msk [vmem:[#allocation3 + $0x328] sm:$0xff] %vm511_vm2, %v857_v51  ;;  %1007 = vrot.lane.b32.xlu0 %v922_v54, %s5209_s25 }
 0x129   :  { %1759 = vst.msk [vmem:[#allocation3 + $0x390] sm:$0xff] %vm511_vm2, %v1723_v52  ;;  %1760 = vst.msk [vmem:[#allocation3 + $0x3b8] sm:$0xff] %vm511_vm2, %v1724_v53  ;;  %v505_v59 = vmax.f32 %v447_v57, 0.0  ;;  %v559_v4 = vld [vmem:[#allocation2 + $0x5b] sm:$0xff]  ;;  %v924_v7 = vld [vmem:[#allocation2 + $0x87] sm:$0xff] }
 0x12a   :  { %540 = vst.msk [vmem:[#allocation2 + $0xf0] sm:$0xff] %vm511_vm2, %v503_v49  ;;  %543 = vst.msk [vmem:[#allocation2 + $0x108] sm:$0xff] %vm511_vm2, %v506_v56  ;;  %v1201_v9 = vld [vmem:[#allocation2 + $0x31] sm:$0xff]  ;;  %v860_v11 = vld [vmem:[#allocation2 + $0xbd] sm:$0xff] }
 0x12b   :  { %594 = vst.msk [vmem:[#allocation3 + $0x190] sm:$0xff] %vm511_vm2, %v558_v58  ;;  %1456 = vst.msk [vmem:[#allocation3 + $0x130] sm:$0xff] %vm511_vm2, %v558_v58  ;;  %1563 = vrot.lane.b32.xlu1 %v626_v34, %s5209_s25  ;;  %v925_v12 = vld [vmem:[#allocation2 + $0x8f] sm:$0xff]  ;;  %v560_v15 = vld [vmem:[#allocation2 + $0x63] sm:$0xff] }
 0x12c   :  { %v1725_v62 = vld [vmem:[#allocation2 + $0xdd] sm:$0xff]  ;;  %v1726_v63 = vld [vmem:[#allocation2 + $0xe5] sm:$0xff]  ;;  %894 = vst.msk [vmem:[#allocation3 + $0x350] sm:$0xff] %vm511_vm2, %v858_v60  ;;  %605 = vst.msk [vmem:[#allocation3 + $0x348] sm:$0xff] %vm511_vm2, %v569_v61  ;;  %1009 = vrot.lane.b32.xlu0 %v923_v0, %s5209_s25 }
 0x12d   :  { %1467 = vst.msk [vmem:[#allocation3 + $0x2e8] sm:$0xff] %vm511_vm2, %v569_v61  ;;  %1761 = vst.msk [vmem:[#allocation3 + $0x3e0] sm:$0xff] %vm511_vm2, %v1725_v62  ;;  %v5931_v16 = vld [vmem:[%s7447_s3 + $0x238] sm:$0xff]  ;;  %v572_v18 = vld [vmem:[#allocation2 + $0xc3] sm:$0xff] }
 0x12e   :  { %1762 = vst.msk [vmem:[#allocation3 + $0x408] sm:$0xff] %vm511_vm2, %v1726_v63  ;;  %542 = vst.msk [vmem:[#allocation2 + $0x100] sm:$0xff] %vm511_vm2, %v505_v59  ;;  %v571_v17 = vld [vmem:[#allocation2 + $0xbb] sm:$0xff]  ;;  %4976 = vmatprep.subr.mxu1 %v5931_v16  ;;  %v561_v19 = vld [vmem:[#allocation2 + $0x6b] sm:$0xff] }
 0x12f   :  { %606 = vst.msk [vmem:[#allocation3 + $0x370] sm:$0xff] %vm511_vm2, %v570_v21  ;;  %1168 = vst.msk [vmem:[#allocation3 + $0x128] sm:$0xff] %vm511_vm2, %v1132_v1  ;;  %1275 = vrot.lane.b32.xlu1 %v1200_v2, %s5209_s25  ;;  %v926_v20 = vld [vmem:[#allocation2 + $0x97] sm:$0xff]  ;;  %v861_v23 = vld [vmem:[#allocation2 + $0xc5] sm:$0xff] }
 0x130   :  { %1468 = vst.msk [vmem:[#allocation3 + $0x310] sm:$0xff] %vm511_vm2, %v570_v21  ;;  %895 = vst.msk [vmem:[#allocation3 + $0x378] sm:$0xff] %vm511_vm2, %v859_v3  ;;  %1011 = vrot.lane.b32.xlu0 %v924_v7, %s5209_s25  ;;  %v627_v22 = vld [vmem:[#allocation2 + $0x3c] sm:$0xff]  ;;  %v562_v24 = vld [vmem:[#allocation2 + $0x73] sm:$0xff] }
 0x131   :  { %v1727_v5 = vld [vmem:[#allocation2 + $0xed] sm:$0xff]  ;;  %v1728_v6 = vld [vmem:[#allocation2 + $0xf5] sm:$0xff]  ;;  %595 = vst.msk [vmem:[#allocation3 + $0x1b8] sm:$0xff] %vm511_vm2, %v559_v4  ;;  %1457 = vst.msk [vmem:[#allocation3 + $0x158] sm:$0xff] %vm511_vm2, %v559_v4 }
 0x132   :  { %1763 = vst.msk [vmem:[#allocation3 + $0x430] sm:$0xff] %vm511_vm2, %v1727_v5  ;;  %1764 = vst.msk [vmem:[#allocation3 + $0x458] sm:$0xff] %vm511_vm2, %v1728_v6  ;;  %v1731_v8 = vld [vmem:[#allocation2 + $0x10d] sm:$0xff]  ;;  %v942_v26 = vld [vmem:[#allocation2 + $0x117] sm:$0xff] }
 0x133   :  { %1767 = vst.msk [vmem:[#allocation3 + $0x4d0] sm:$0xff] %vm511_vm2, %v1731_v8  ;;  %v870_v10 = vld [vmem:[#allocation2 + $0x10d] sm:$0xff]  ;;  %896 = vst.msk [vmem:[#allocation3 + $0x3a0] sm:$0xff] %vm511_vm2, %v860_v11  ;;  %1277 = vrot.lane.b32.xlu1 %v1201_v9, %s5209_s25  ;;  %v563_v27 = vld [vmem:[#allocation2 + $0x7b] sm:$0xff] }
 0x134   :  { %906 = vst.msk [vmem:[#allocation3 + $0x530] sm:$0xff] %vm511_vm2, %v870_v10  ;;  %1013 = vrot.lane.b32.xlu0 %v925_v12, %s5209_s25  ;;  %596 = vst.msk [vmem:[#allocation3 + $0x1e0] sm:$0xff] %vm511_vm2, %v560_v15  ;;  %v862_v25 = vld [vmem:[#allocation2 + $0xcd] sm:$0xff]  ;;  %v564_v29 = vld [vmem:[#allocation2 + $0x83] sm:$0xff] }
 0x135   :  { %v1729_v13 = vld [vmem:[#allocation2 + $0xfd] sm:$0xff]  ;;  %v1730_v14 = vld [vmem:[#allocation2 + $0x105] sm:$0xff]  ;;  %1458 = vst.msk [vmem:[#allocation3 + $0x180] sm:$0xff] %vm511_vm2, %v560_v15  ;;  %607 = vst.msk [vmem:[#allocation3 + $0x398] sm:$0xff] %vm511_vm2, %v571_v17 }
 0x136   :  { %1765 = vst.msk [vmem:[#allocation3 + $0x480] sm:$0xff] %vm511_vm2, %v1729_v13  ;;  %1766 = vst.msk [vmem:[#allocation3 + $0x4a8] sm:$0xff] %vm511_vm2, %v1730_v14  ;;  %v573_v28 = vld [vmem:[#allocation2 + $0xcb] sm:$0xff]  ;;  %v574_v30 = vld [vmem:[#allocation2 + $0xd3] sm:$0xff] }
 0x137   :  { %1469 = vst.msk [vmem:[#allocation3 + $0x338] sm:$0xff] %vm511_vm2, %v571_v17  ;;  %608 = vst.msk [vmem:[#allocation3 + $0x3c0] sm:$0xff] %vm511_vm2, %v572_v18  ;;  %706 = vrot.lane.b32.xlu1 %v627_v22, %s5209_s25  ;;  %v628_v31 = vld [vmem:[#allocation2 + $0x44] sm:$0xff]  ;;  %v863_v33 = vld [vmem:[#allocation2 + $0xd5] sm:$0xff] }
 0x138   :  { %597 = vst.msk [vmem:[#allocation3 + $0x208] sm:$0xff] %vm511_vm2, %v561_v19  ;;  %1459 = vst.msk [vmem:[#allocation3 + $0x1a8] sm:$0xff] %vm511_vm2, %v561_v19  ;;  %1015 = vrot.lane.b32.xlu0 %v926_v20, %s5209_s25  ;;  %v565_v32 = vld [vmem:[#allocation2 + $0x8b] sm:$0xff]  ;;  %v566_v34 = vld [vmem:[#allocation2 + $0x93] sm:$0xff] }
 0x139   :  { %1470 = vst.msk [vmem:[#allocation3 + $0x360] sm:$0xff] %vm511_vm2, %v572_v18  ;;  %897 = vst.msk [vmem:[#allocation3 + $0x3c8] sm:$0xff] %vm511_vm2, %v861_v23  ;;  %v864_v35 = vld [vmem:[#allocation2 + $0xdd] sm:$0xff]  ;;  %v1133_v36 = vld [vmem:[#allocation2 + $0x50] sm:$0xff] }
 0x13a   :  { %598 = vst.msk [vmem:[#allocation3 + $0x230] sm:$0xff] %vm511_vm2, %v562_v24  ;;  %898 = vst.msk [vmem:[#allocation3 + $0x3f0] sm:$0xff] %vm511_vm2, %v862_v25  ;;  %v575_v37 = vld [vmem:[#allocation2 + $0xdb] sm:$0xff]  ;;  %v576_v38 = vld [vmem:[#allocation2 + $0xe3] sm:$0xff] }
 0x13b   :  { %1460 = vst.msk [vmem:[#allocation3 + $0x1d0] sm:$0xff] %vm511_vm2, %v562_v24  ;;  %599 = vst.msk [vmem:[#allocation3 + $0x258] sm:$0xff] %vm511_vm2, %v563_v27  ;;  %708 = vrot.lane.b32.xlu1 %v628_v31, %s5209_s25  ;;  %v1134_v39 = vld [vmem:[#allocation2 + $0x58] sm:$0xff]  ;;  %v865_v41 = vld [vmem:[#allocation2 + $0xe5] sm:$0xff] }
 0x13c   :  { %609 = vst.msk [vmem:[#allocation3 + $0x3e8] sm:$0xff] %vm511_vm2, %v573_v28  ;;  %1461 = vst.msk [vmem:[#allocation3 + $0x1f8] sm:$0xff] %vm511_vm2, %v563_v27  ;;  %1047 = vrot.lane.b32.xlu0 %v942_v26, %s5209_s25  ;;  %v943_v40 = vld [vmem:[#allocation2 + $0x11f] sm:$0xff]  ;;  %v866_v43 = vld [vmem:[#allocation2 + $0xed] sm:$0xff] }
 0x13d   :  { %1471 = vst.msk [vmem:[#allocation3 + $0x388] sm:$0xff] %vm511_vm2, %v573_v28  ;;  %600 = vst.msk [vmem:[#allocation3 + $0x280] sm:$0xff] %vm511_vm2, %v564_v29  ;;  %v1135_v44 = vld [vmem:[#allocation2 + $0x60] sm:$0xff]  ;;  %v577_v45 = vld [vmem:[#allocation2 + $0xeb] sm:$0xff] }
 0x13e   :  { %610 = vst.msk [vmem:[#allocation3 + $0x410] sm:$0xff] %vm511_vm2, %v574_v30  ;;  %1462 = vst.msk [vmem:[#allocation3 + $0x220] sm:$0xff] %vm511_vm2, %v564_v29  ;;  %v927_v46 = vld [vmem:[#allocation2 + $0x9f] sm:$0xff]  ;;  %v578_v47 = vld [vmem:[#allocation2 + $0xf3] sm:$0xff] }
 0x13f   :  { %1472 = vst.msk [vmem:[#allocation3 + $0x3b0] sm:$0xff] %vm511_vm2, %v574_v30  ;;  %601 = vst.msk [vmem:[#allocation3 + $0x2a8] sm:$0xff] %vm511_vm2, %v565_v32  ;;  %1565 = vrot.lane.b32.xlu1 %v627_v22, %s5209_s25  ;;  %v1136_v48 = vld [vmem:[#allocation2 + $0x68] sm:$0xff]  ;;  %v1137_v50 = vld [vmem:[#allocation2 + $0x70] sm:$0xff] }
 0x140   :  { %899 = vst.msk [vmem:[#allocation3 + $0x418] sm:$0xff] %vm511_vm2, %v863_v33  ;;  %1463 = vst.msk [vmem:[#allocation3 + $0x248] sm:$0xff] %vm511_vm2, %v565_v32  ;;  %1049 = vrot.lane.b32.xlu0 %v943_v40, %s5209_s25  ;;  %v581_v49 = vld [vmem:[#allocation2 + $0x10b] sm:$0xff]  ;;  %v867_v51 = vld [vmem:[#allocation2 + $0xf5] sm:$0xff] }
 0x141   :  { %602 = vst.msk [vmem:[#allocation3 + $0x2d0] sm:$0xff] %vm511_vm2, %v566_v34  ;;  %900 = vst.msk [vmem:[#allocation3 + $0x440] sm:$0xff] %vm511_vm2, %v864_v35  ;;  %v868_v52 = vld [vmem:[#allocation2 + $0xfd] sm:$0xff]  ;;  %v582_v57 = vld [vmem:[#allocation2 + $0x113] sm:$0xff] }
 0x142   :  { %1464 = vst.msk [vmem:[#allocation3 + $0x270] sm:$0xff] %vm511_vm2, %v566_v34  ;;  %1169 = vst.msk [vmem:[#allocation3 + $0x150] sm:$0xff] %vm511_vm2, %v1133_v36  ;;  %v1138_v53 = vld [vmem:[#allocation2 + $0x78] sm:$0xff]  ;;  %v1139_v56 = vld [vmem:[#allocation2 + $0x80] sm:$0xff] }
 0x143   :  { %611 = vst.msk [vmem:[#allocation3 + $0x438] sm:$0xff] %vm511_vm2, %v575_v37  ;;  %1473 = vst.msk [vmem:[#allocation3 + $0x3d8] sm:$0xff] %vm511_vm2, %v575_v37  ;;  %1567 = vrot.lane.b32.xlu1 %v628_v31, %s5209_s25  ;;  %v579_v54 = vld [vmem:[#allocation2 + $0xfb] sm:$0xff]  ;;  %v1140_v59 = vld [vmem:[#allocation2 + $0x88] sm:$0xff] }
 0x144   :  { %612 = vst.msk [vmem:[#allocation3 + $0x460] sm:$0xff] %vm511_vm2, %v576_v38  ;;  %1170 = vst.msk [vmem:[#allocation3 + $0x178] sm:$0xff] %vm511_vm2, %v1134_v39  ;;  %1017 = vrot.lane.b32.xlu0 %v927_v46, %s5209_s25  ;;  %v1202_v55 = vld [vmem:[#allocation2 + $0x39] sm:$0xff]  ;;  %v1141_v61 = vld [vmem:[#allocation2 + $0x90] sm:$0xff] }
 0x145   :  { %1474 = vst.msk [vmem:[#allocation3 + $0x400] sm:$0xff] %vm511_vm2, %v576_v38  ;;  %901 = vst.msk [vmem:[#allocation3 + $0x468] sm:$0xff] %vm511_vm2, %v865_v41  ;;  %v872_v58 = vld [vmem:[#allocation2 + $0x11d] sm:$0xff]  ;;  %v928_v62 = vld [vmem:[#allocation2 + $0xa7] sm:$0xff] }
 0x146   :  { %902 = vst.msk [vmem:[#allocation3 + $0x490] sm:$0xff] %vm511_vm2, %v866_v43  ;;  %1171 = vst.msk [vmem:[#allocation3 + $0x1a0] sm:$0xff] %vm511_vm2, %v1135_v44  ;;  %v583_v60 = vld [vmem:[#allocation2 + $0x11b] sm:$0xff]  ;;  %v1144_v21 = vld [vmem:[#allocation2 + $0xa8] sm:$0xff] }
 0x147   :  { %613 = vst.msk [vmem:[#allocation3 + $0x488] sm:$0xff] %vm511_vm2, %v577_v45  ;;  %1475 = vst.msk [vmem:[#allocation3 + $0x428] sm:$0xff] %vm511_vm2, %v577_v45  ;;  %v1142_v63 = vld [vmem:[#allocation2 + $0x98] sm:$0xff]  ;;  %v1143_v0 = vld [vmem:[#allocation2 + $0xa0] sm:$0xff]  ;;  %1279 = vrot.lane.b32.xlu1 %v1202_v55, %s5209_s25 }
 0x148   :  { %614 = vst.msk [vmem:[#allocation3 + $0x4b0] sm:$0xff] %vm511_vm2, %v578_v47  ;;  %1172 = vst.msk [vmem:[#allocation3 + $0x1c8] sm:$0xff] %vm511_vm2, %v1136_v48  ;;  %1019 = vrot.lane.b32.xlu0 %v928_v62, %s5209_s25  ;;  %v1145_v1 = vld [vmem:[#allocation2 + $0xb0] sm:$0xff]  ;;  %v1146_v2 = vld [vmem:[#allocation2 + $0xb8] sm:$0xff] }
 0x149   :  { %1476 = vst.msk [vmem:[#allocation3 + $0x450] sm:$0xff] %vm511_vm2, %v578_v47  ;;  %617 = vst.msk [vmem:[#allocation3 + $0x528] sm:$0xff] %vm511_vm2, %v581_v49  ;;  %v639_v3 = vld [vmem:[#allocation2 + $0x9c] sm:$0xff]  ;;  %v1148_v6 = vld [vmem:[#allocation2 + $0xc8] sm:$0xff] }
 0x14a   :  { %1173 = vst.msk [vmem:[#allocation3 + $0x1f0] sm:$0xff] %vm511_vm2, %v1137_v50  ;;  %903 = vst.msk [vmem:[#allocation3 + $0x4b8] sm:$0xff] %vm511_vm2, %v867_v51  ;;  %v1203_v4 = vld [vmem:[#allocation2 + $0x41] sm:$0xff]  ;;  %v1149_v7 = vld [vmem:[#allocation2 + $0xd0] sm:$0xff] }
 0x14b   :  { %1479 = vst.msk [vmem:[#allocation3 + $0x4c8] sm:$0xff] %vm511_vm2, %v581_v49  ;;  %904 = vst.msk [vmem:[#allocation3 + $0x4e0] sm:$0xff] %vm511_vm2, %v868_v52  ;;  %v1147_v5 = vld [vmem:[#allocation2 + $0xc0] sm:$0xff]  ;;  %1281 = vrot.lane.b32.xlu1 %v1203_v4, %s5209_s25  ;;  %v1150_v8 = vld [vmem:[#allocation2 + $0xd8] sm:$0xff] }
 0x14c   :  { %1174 = vst.msk [vmem:[#allocation3 + $0x218] sm:$0xff] %vm511_vm2, %v1138_v53  ;;  %615 = vst.msk [vmem:[#allocation3 + $0x4d8] sm:$0xff] %vm511_vm2, %v579_v54  ;;  %730 = vrot.lane.b32.xlu0 %v639_v3, %s5209_s25  ;;  %v640_v9 = vld [vmem:[#allocation2 + $0xa4] sm:$0xff]  ;;  %v629_v10 = vld [vmem:[#allocation2 + $0x4c] sm:$0xff] }
 0x14d   :  { %1477 = vst.msk [vmem:[#allocation3 + $0x478] sm:$0xff] %vm511_vm2, %v579_v54  ;;  %1175 = vst.msk [vmem:[#allocation3 + $0x240] sm:$0xff] %vm511_vm2, %v1139_v56  ;;  %v1151_v11 = vld [vmem:[#allocation2 + $0xe0] sm:$0xff]  ;;  %v1152_v14 = vld [vmem:[#allocation2 + $0xe8] sm:$0xff] }
 0x14e   :  { %618 = vst.msk [vmem:[#allocation3 + $0x550] sm:$0xff] %vm511_vm2, %v582_v57  ;;  %908 = vst.msk [vmem:[#allocation3 + $0x580] sm:$0xff] %vm511_vm2, %v872_v58  ;;  %v869_v12 = vld [vmem:[#allocation2 + $0x105] sm:$0xff]  ;;  %v929_v15 = vld [vmem:[#allocation2 + $0xaf] sm:$0xff] }
 0x14f   :  { %1480 = vst.msk [vmem:[#allocation3 + $0x4f0] sm:$0xff] %vm511_vm2, %v582_v57  ;;  %1176 = vst.msk [vmem:[#allocation3 + $0x268] sm:$0xff] %vm511_vm2, %v1140_v59  ;;  %710 = vrot.lane.b32.xlu1 %v629_v10, %s5209_s25  ;;  %v580_v13 = vld [vmem:[#allocation2 + $0x103] sm:$0xff]  ;;  %v630_v17 = vld [vmem:[#allocation2 + $0x54] sm:$0xff] }
 0x150   :  { %619 = vst.msk [vmem:[#allocation3 + $0x578] sm:$0xff] %vm511_vm2, %v583_v60  ;;  %1177 = vst.msk [vmem:[#allocation3 + $0x290] sm:$0xff] %vm511_vm2, %v1141_v61  ;;  %732 = vrot.lane.b32.xlu0 %v640_v9, %s5209_s25  ;;  %v1446_v18 = vld [vmem:[#allocation2 + $0x123] sm:$0xff]  ;;  %v1157_v19 = vld [vmem:[#allocation2 + $0x110] sm:$0xff] }
 0x151   :  { %1481 = vst.msk [vmem:[#allocation3 + $0x518] sm:$0xff] %vm511_vm2, %v583_v60  ;;  %1178 = vst.msk [vmem:[#allocation3 + $0x2b8] sm:$0xff] %vm511_vm2, %v1142_v63  ;;  %v1447_v20 = vld [vmem:[#allocation2 + $0x12b] sm:$0xff]  ;;  %v1158_v22 = vld [vmem:[#allocation2 + $0x118] sm:$0xff] }
 0x152   :  { %1179 = vst.msk [vmem:[#allocation3 + $0x2e0] sm:$0xff] %vm511_vm2, %v1143_v0  ;;  %1180 = vst.msk [vmem:[#allocation3 + $0x308] sm:$0xff] %vm511_vm2, %v1144_v21  ;;  %v1159_v23 = vld [vmem:[#allocation2 + $0x120] sm:$0xff]  ;;  %v930_v24 = vld [vmem:[#allocation2 + $0xb7] sm:$0xff] }
 0x153   :  { %1181 = vst.msk [vmem:[#allocation3 + $0x330] sm:$0xff] %vm511_vm2, %v1145_v1  ;;  %1182 = vst.msk [vmem:[#allocation3 + $0x358] sm:$0xff] %vm511_vm2, %v1146_v2  ;;  %712 = vrot.lane.b32.xlu1 %v630_v17, %s5209_s25  ;;  %v1160_v25 = vld [vmem:[#allocation2 + $0x128] sm:$0xff]  ;;  %v1153_v26 = vld [vmem:[#allocation2 + $0xf0] sm:$0xff] }
 0x154   :  { %1183 = vst.msk [vmem:[#allocation3 + $0x380] sm:$0xff] %vm511_vm2, %v1147_v5  ;;  %1184 = vst.msk [vmem:[#allocation3 + $0x3a8] sm:$0xff] %vm511_vm2, %v1148_v6  ;;  %1021 = vrot.lane.b32.xlu0 %v929_v15, %s5209_s25  ;;  %v1154_v27 = vld [vmem:[#allocation2 + $0xf8] sm:$0xff]  ;;  %v6030_v28 = vld [vmem:[#allocation2 + $0xac] sm:$0xff] }
 0x155   :  { %1185 = vst.msk [vmem:[#allocation3 + $0x3d0] sm:$0xff] %vm511_vm2, %v1149_v7  ;;  %1186 = vst.msk [vmem:[#allocation3 + $0x3f8] sm:$0xff] %vm511_vm2, %v1150_v8  ;;  %v6035_v29 = vld [vmem:[#allocation2 + $0xb4] sm:$0xff]  ;;  %v1204_v30 = vld [vmem:[#allocation2 + $0x49] sm:$0xff] }
 0x156   :  { %1187 = vst.msk [vmem:[#allocation3 + $0x420] sm:$0xff] %vm511_vm2, %v1151_v11  ;;  %905 = vst.msk [vmem:[#allocation3 + $0x508] sm:$0xff] %vm511_vm2, %v869_v12  ;;  %v931_v31 = vld [vmem:[#allocation2 + $0xbf] sm:$0xff]  ;;  %v932_v33 = vld [vmem:[#allocation2 + $0xc7] sm:$0xff] }
 0x157   :  { %616 = vst.msk [vmem:[#allocation3 + $0x500] sm:$0xff] %vm511_vm2, %v580_v13  ;;  %1478 = vst.msk [vmem:[#allocation3 + $0x4a0] sm:$0xff] %vm511_vm2, %v580_v13  ;;  %1569 = vrot.lane.b32.xlu1 %v629_v10, %s5209_s25  ;;  %v631_v32 = vld [vmem:[#allocation2 + $0x5c] sm:$0xff]  ;;  %v6042_v34 = vld [vmem:[#allocation2 + $0x64] sm:$0xff] }
 0x158   :  { %1188 = vst.msk [vmem:[#allocation3 + $0x448] sm:$0xff] %vm511_vm2, %v1152_v14  ;;  %1482 = vst.msk [vmem:[#allocation3 + $0x540] sm:$0xff] %vm511_vm2, %v1446_v18  ;;  %1023 = vrot.lane.b32.xlu0 %v930_v24, %s5209_s25  ;;  %v6049_v37 = vld [vmem:[#allocation2 + $0xbc] sm:$0xff]  ;;  %v1156_v39 = vld [vmem:[#allocation2 + $0x108] sm:$0xff] }
 0x159   :  { %1193 = vst.msk [vmem:[#allocation3 + $0x510] sm:$0xff] %vm511_vm2, %v1157_v19  ;;  %1483 = vst.msk [vmem:[#allocation3 + $0x568] sm:$0xff] %vm511_vm2, %v1447_v20  ;;  %v1155_v38 = vld [vmem:[#allocation2 + $0x100] sm:$0xff]  ;;  %v6060_v44 = vld [vmem:[#allocation2 + $0x6c] sm:$0xff] }
 0x15a   :  { %1194 = vst.msk [vmem:[#allocation3 + $0x538] sm:$0xff] %vm511_vm2, %v1158_v22  ;;  %1195 = vst.msk [vmem:[#allocation3 + $0x560] sm:$0xff] %vm511_vm2, %v1159_v23  ;;  %v6058_v43 = vld [vmem:[#allocation2 + $0xc4] sm:$0xff]  ;;  %v933_v48 = vld [vmem:[#allocation2 + $0xcf] sm:$0xff] }
 0x15b   :  { %1196 = vst.msk [vmem:[#allocation3 + $0x588] sm:$0xff] %vm511_vm2, %v1160_v25  ;;  %1189 = vst.msk [vmem:[#allocation3 + $0x470] sm:$0xff] %vm511_vm2, %v1153_v26  ;;  %1571 = vrot.lane.b32.xlu1 %v630_v17, %s5209_s25  ;;  %v1773_v49 = vld [vmem:[#allocation3] sm:$0xff]  ;;  %v6069_v50 = vld [vmem:[#allocation2 + $0x74] sm:$0xff] }
 0x15c   :  { %1190 = vst.msk [vmem:[#allocation3 + $0x498] sm:$0xff] %vm511_vm2, %v1154_v27  ;;  %734 = vrot.lane.b32.xlu0 %v6030_v28, %s5209_s25  ;;  %1191 = vst.msk [vmem:[#allocation3 + $0x4c0] sm:$0xff] %vm511_vm2, %v1155_v38  ;;  %v2023_v52 = vld [vmem:[%s7447_s3 + $0x230] sm:$0xff]  ;;  %v6080_v57 = vld [vmem:[#allocation2 + $0x7c] sm:$0xff] }
 0x15d   :  { %1192 = vst.msk [vmem:[#allocation3 + $0x4e8] sm:$0xff] %vm511_vm2, %v1156_v39  ;;  %v934_v56 = vld [vmem:[#allocation2 + $0xd7] sm:$0xff]  ;;  %v2022_v59 = vld [vmem:[%s7447_s3 + $0x228] sm:$0xff]  ;;  %v2021_v21 = vld [vmem:[%s7447_s3 + $0x220] sm:$0xff] }
 0x15e   :  { %v6089_v62 = vld [vmem:[#allocation2 + $0xcc] sm:$0xff]  ;;  %v6093_v63 = vld [vmem:[#allocation2 + $0x84] sm:$0xff]  ;;  %v2020_v3 = vld [vmem:[%s7447_s3 + $0x218] sm:$0xff] }
 0x15f   :  { %1283 = vrot.lane.b32.xlu1 %v1204_v30, %s5209_s25  ;;  %v6105_v4 = vld [vmem:[#allocation2 + $0xd4] sm:$0xff]  ;;  %v6109_v5 = vld [vmem:[#allocation2 + $0x8c] sm:$0xff]  ;;  %v935_v9 = vld [vmem:[#allocation2 + $0xdf] sm:$0xff] }
 0x160   :  { %736 = vrot.lane.b32.xlu0 %v6035_v29, %s5209_s25  ;;  %v6116_v11 = vld [vmem:[#allocation2 + $0x94] sm:$0xff]  ;;  %v936_v15 = vld [vmem:[#allocation2 + $0xe7] sm:$0xff]  ;;  %v6126_v23 = vld [vmem:[#allocation2 + $0xdc] sm:$0xff] }
 0x161   :  { %v1205_v18 = vld [vmem:[#allocation2 + $0x51] sm:$0xff]  ;;  %v6134_v30 = vld [vmem:[#allocation2 + $0xe4] sm:$0xff] }
 0x163   :  { %714 = vrot.lane.b32.xlu1 %v631_v32, %s5209_s25 }
 0x164   :  { %1025 = vrot.lane.b32.xlu0 %v931_v31, %s5209_s25  ;;  %v1206_v31 = vld [vmem:[#allocation2 + $0x59] sm:$0xff] }
 0x167   :  { %716 = vrot.lane.b32.xlu1 %v6042_v34, %s5209_s25 }
 0x168   :  { %1027 = vrot.lane.b32.xlu0 %v932_v33, %s5209_s25 }
 0x169   :  { %v984_v35 = vpop.permute.xlu1 %983  ;;  %v982_v36 = vpop.permute.xlu0 %981 }
 0x16a   :  { %1090 = vst.msk [vmem:[#allocation3 + $0x30] sm:$0xff] %vm800_vm3, %v984_v35  ;;  %1089 = vst.msk [vmem:[#allocation3 + $0x8] sm:$0xff] %vm800_vm3, %v982_v36  ;;  %v937_v36 = vld [vmem:[#allocation2 + $0xef] sm:$0xff] }
 0x16b   :  { %1573 = vrot.lane.b32.xlu1 %v631_v32, %s5209_s25  ;;  %v2019_v32 = vld [vmem:[%s7447_s3 + $0x210] sm:$0xff] }
 0x16c   :  { %738 = vrot.lane.b32.xlu0 %v6049_v37, %s5209_s25 }
 0x16d   :  { %v695_v41 = vpop.permute.xlu1 %694 }
 0x16e   :  { %v986_v40 = vpop.permute.xlu0 %985  ;;  %802 = vst.msk [vmem:[#allocation3 + $0x28] sm:$0xff] %vm800_vm3, %v695_v41  ;;  %v1207_v41 = vld [vmem:[#allocation2 + $0x61] sm:$0xff] }
 0x16f   :  { %1091 = vst.msk [vmem:[#allocation3 + $0x58] sm:$0xff] %vm800_vm3, %v986_v40  ;;  %718 = vrot.lane.b32.xlu1 %v6060_v44, %s5209_s25  ;;  %v938_v40 = vld [vmem:[#allocation2 + $0xf7] sm:$0xff] }
 0x170   :  { %740 = vrot.lane.b32.xlu0 %v6058_v43, %s5209_s25 }
 0x171   :  { %v697_v46 = vpop.permute.xlu1 %696  ;;  %v1774_v47 = vld [vmem:[#allocation3 + $0x8] sm:$0xff]  ;;  %v1779_v51 = vld [vmem:[#allocation3 + $0x30] sm:$0xff] }
 0x172   :  { %v988_v45 = vpop.permute.xlu0 %987  ;;  %803 = vst.msk [vmem:[#allocation3 + $0x50] sm:$0xff] %vm800_vm3, %v697_v46  ;;  %2204 = vmatprep.mubr.f32.mxu1 %v1774_v47 }
 0x173   :  { %1092 = vst.msk [vmem:[#allocation3 + $0x80] sm:$0xff] %vm800_vm3, %v988_v45  ;;  %2205 = vmatmul.mubr.f32.vlgmr.msra.gmra.mxu1 %v1773_v49  ;;  %720 = vrot.lane.b32.xlu1 %v6069_v50, %s5209_s25 }
 0x174   :  { %1029 = vrot.lane.b32.xlu0 %v933_v48, %s5209_s25  ;;  %2209 = vmatprep.mubr.f32.mxu1 %v1779_v51 }
 0x175   :  { %v1270_v54 = vpop.permute.xlu1 %1269  ;;  %v1778_v55 = vld [vmem:[#allocation3 + $0x28] sm:$0xff]  ;;  %4977 = vmatpush3.msra.mxu1 %v5931_v16 }
 0x176   :  { %v990_v53 = vpop.permute.xlu0 %989  ;;  %1377 = vst.msk [vmem:[#allocation3 + $0x10] sm:$0xff] %vm800_vm3, %v1270_v54  ;;  %4978 = vmatprep.subr.mxu1 %v2023_v52  ;;  %v1784_v58 = vld [vmem:[#allocation3 + $0x58] sm:$0xff] }
 0x177   :  { %1093 = vst.msk [vmem:[#allocation3 + $0xa8] sm:$0xff] %vm800_vm3, %v990_v53  ;;  %2210 = vmatmul.mubr.f32.gmra.mxu1 %v1778_v55  ;;  %722 = vrot.lane.b32.xlu1 %v6080_v57, %s5209_s25  ;;  %v6161_v53 = vld [vmem:[#allocation2 + $0xf4] sm:$0xff]  ;;  %v1208_v55 = vld [vmem:[#allocation2 + $0x69] sm:$0xff] }
 0x178   :  { %1031 = vrot.lane.b32.xlu0 %v934_v56, %s5209_s25  ;;  %2214 = vmatprep.mubr.f32.mxu1 %v1784_v58 }
 0x179   :  { %v699_v60 = vpop.permute.xlu1 %698  ;;  %v1783_v61 = vld [vmem:[#allocation3 + $0x50] sm:$0xff]  ;;  %4979 = vmatpush3.msra.mxu1 %v2023_v52 }
 0x17a   :  { %v992_v16 = vpop.permute.xlu0 %991  ;;  %804 = vst.msk [vmem:[#allocation3 + $0x78] sm:$0xff] %vm800_vm3, %v699_v60  ;;  %4980 = vmatprep.subr.mxu1 %v2022_v59  ;;  %v1789_v0 = vld [vmem:[#allocation3 + $0x80] sm:$0xff] }
 0x17b   :  { %1094 = vst.msk [vmem:[#allocation3 + $0xd0] sm:$0xff] %vm800_vm3, %v992_v16  ;;  %2215 = vmatmul.mubr.f32.gmra.mxu1 %v1783_v61  ;;  %724 = vrot.lane.b32.xlu1 %v6093_v63, %s5209_s25  ;;  %v941_v16 = vld [vmem:[#allocation2 + $0x10f] sm:$0xff] }
 0x17c   :  { %742 = vrot.lane.b32.xlu0 %v6089_v62, %s5209_s25  ;;  %2219 = vmatprep.mubr.f32.mxu1 %v1789_v0 }
 0x17d   :  { %v701_v2 = vpop.permute.xlu1 %700  ;;  %4981 = vmatpush3.msra.mxu1 %v2022_v59  ;;  %v1775_v24 = vld [vmem:[#allocation3 + $0x10] sm:$0xff] }
 0x17e   :  { %v994_v1 = vpop.permute.xlu0 %993  ;;  %805 = vst.msk [vmem:[#allocation3 + $0xa0] sm:$0xff] %vm800_vm3, %v701_v2  ;;  %4982 = vmatprep.subr.mxu1 %v2021_v21  ;;  %v1794_v10 = vld [vmem:[#allocation3 + $0xa8] sm:$0xff]  ;;  %v1209_v2 = vld [vmem:[#allocation2 + $0x71] sm:$0xff] }
 0x17f   :  { %1095 = vst.msk [vmem:[#allocation3 + $0xf8] sm:$0xff] %vm800_vm3, %v994_v1  ;;  %4983 = vmatpush3.msra.mxu1 %v2021_v21  ;;  %726 = vrot.lane.b32.xlu1 %v6109_v5, %s5209_s25  ;;  %v6176_v1 = vld [vmem:[#allocation2 + $0x10c] sm:$0xff] }
 0x180   :  { %744 = vrot.lane.b32.xlu0 %v6105_v4, %s5209_s25  ;;  %4984 = vmatprep.subr.mxu1 %v2020_v3 }
 0x181   :  { %v1558_v7 = vpop.permute.xlu1 %1557  ;;  %v1788_v8 = vld [vmem:[#allocation3 + $0x78] sm:$0xff]  ;;  %4985 = vmatpush3.msra.mxu1 %v2020_v3 }
 0x182   :  { %v996_v6 = vpop.permute.xlu0 %995  ;;  %1665 = vst.msk [vmem:[#allocation3 + $0x18] sm:$0xff] %vm800_vm3, %v1558_v7  ;;  %2220 = vmatmul.mubr.f32.gmra.mxu1 %v1788_v8  ;;  %v1799_v17 = vld [vmem:[#allocation3 + $0xd0] sm:$0xff]  ;;  %4986 = vmatprep.subr.mxu1 %v2019_v32 }
 0x183   :  { %1096 = vst.msk [vmem:[#allocation3 + $0x120] sm:$0xff] %vm800_vm3, %v996_v6  ;;  %2224 = vmatprep.mubr.f32.mxu1 %v1794_v10  ;;  %728 = vrot.lane.b32.xlu1 %v6116_v11, %s5209_s25  ;;  %v940_v10 = vld [vmem:[#allocation2 + $0x107] sm:$0xff] }
 0x184   :  { %1033 = vrot.lane.b32.xlu0 %v935_v9, %s5209_s25  ;;  %4987 = vmatpush3.msra.mxu1 %v2019_v32 }
 0x185   :  { %v1560_v13 = vpop.permute.xlu1 %1559  ;;  %v1793_v14 = vld [vmem:[#allocation3 + $0xa0] sm:$0xff] }
 0x186   :  { %v998_v12 = vpop.permute.xlu0 %997  ;;  %1666 = vst.msk [vmem:[#allocation3 + $0x40] sm:$0xff] %vm800_vm3, %v1560_v13  ;;  %2225 = vmatmul.mubr.f32.gmra.mxu1 %v1793_v14  ;;  %v1804_v48 = vld [vmem:[#allocation3 + $0xf8] sm:$0xff] }
 0x187   :  { %1097 = vst.msk [vmem:[#allocation3 + $0x148] sm:$0xff] %vm800_vm3, %v998_v12  ;;  %2229 = vmatprep.mubr.f32.mxu1 %v1799_v17  ;;  %1285 = vrot.lane.b32.xlu1 %v1205_v18, %s5209_s25  ;;  %v1210_v12 = vld [vmem:[#allocation2 + $0x79] sm:$0xff]  ;;  %v1211_v18 = vld [vmem:[#allocation2 + $0x81] sm:$0xff] }
 0x188   :  { %1035 = vrot.lane.b32.xlu0 %v936_v15, %s5209_s25 }
 0x189   :  { %v1272_v20 = vpop.permute.xlu1 %1271  ;;  %v1776_v22 = vld [vmem:[#allocation3 + $0x18] sm:$0xff] }
 0x18a   :  { %v1000_v19 = vpop.permute.xlu0 %999  ;;  %1378 = vst.msk [vmem:[#allocation3 + $0x38] sm:$0xff] %vm800_vm3, %v1272_v20  ;;  %2449 = vmatprep.mubr.f32.mxu0 %v1776_v22  ;;  %v1809_v54 = vld [vmem:[#allocation3 + $0x120] sm:$0xff] }
 0x18b   :  { %1098 = vst.msk [vmem:[#allocation3 + $0x170] sm:$0xff] %vm800_vm3, %v1000_v19  ;;  %2450 = vmatmul.mubr.f32.vlgmr.msra.gmra.mxu0 %v1775_v24  ;;  %1575 = vrot.lane.b32.xlu1 %v6042_v34, %s5209_s25  ;;  %v2017_v19 = vld [vmem:[%s7447_s3 + $0x200] sm:$0xff] }
 0x18c   :  { %746 = vrot.lane.b32.xlu0 %v6126_v23, %s5209_s25 }
 0x18d   :  { %v1274_v26 = vpop.permute.xlu1 %1273  ;;  %v1781_v27 = vld [vmem:[#allocation3 + $0x40] sm:$0xff] }
 0x18e   :  { %v1002_v25 = vpop.permute.xlu0 %1001  ;;  %1379 = vst.msk [vmem:[#allocation3 + $0x60] sm:$0xff] %vm800_vm3, %v1274_v26  ;;  %2454 = vmatprep.mubr.f32.mxu0 %v1781_v27  ;;  %v1814_v17 = vld [vmem:[#allocation3 + $0x148] sm:$0xff] }
 0x18f   :  { %1099 = vst.msk [vmem:[#allocation3 + $0x198] sm:$0xff] %vm800_vm3, %v1002_v25  ;;  %1287 = vrot.lane.b32.xlu1 %v1206_v31, %s5209_s25  ;;  %v6202_v25 = vld [vmem:[#allocation2 + $0x104] sm:$0xff] }
 0x190   :  { %748 = vrot.lane.b32.xlu0 %v6134_v30, %s5209_s25 }
 0x191   :  { %v703_v34 = vpop.permute.xlu1 %702  ;;  %v1780_v35 = vld [vmem:[#allocation3 + $0x38] sm:$0xff] }
 0x192   :  { %v1004_v33 = vpop.permute.xlu0 %1003  ;;  %806 = vst.msk [vmem:[#allocation3 + $0xc8] sm:$0xff] %vm800_vm3, %v703_v34  ;;  %2455 = vmatmul.mubr.f32.gmra.mxu0 %v1780_v35  ;;  %v1819_v26 = vld [vmem:[#allocation3 + $0x170] sm:$0xff] }
 0x193   :  { %1100 = vst.msk [vmem:[#allocation3 + $0x1c0] sm:$0xff] %vm800_vm3, %v1004_v33  ;;  %1577 = vrot.lane.b32.xlu1 %v6060_v44, %s5209_s25  ;;  %v6153_v44 = vld [vmem:[#allocation2 + $0xec] sm:$0xff]  ;;  %v6211_v33 = vld [vmem:[#allocation2 + $0x114] sm:$0xff] }
 0x194   :  { %1037 = vrot.lane.b32.xlu0 %v937_v36, %s5209_s25 }
 0x195   :  { %v705_v39 = vpop.permute.xlu1 %704  ;;  %v1785_v60 = vld [vmem:[#allocation3 + $0x60] sm:$0xff] }
 0x196   :  { %v1006_v38 = vpop.permute.xlu0 %1005  ;;  %807 = vst.msk [vmem:[#allocation3 + $0xf0] sm:$0xff] %vm800_vm3, %v705_v39  ;;  %v1212_v39 = vld [vmem:[#allocation2 + $0x89] sm:$0xff] }
 0x197   :  { %1101 = vst.msk [vmem:[#allocation3 + $0x1e8] sm:$0xff] %vm800_vm3, %v1006_v38  ;;  %1289 = vrot.lane.b32.xlu1 %v1207_v41, %s5209_s25  ;;  %v944_v38 = vld [vmem:[#allocation2 + $0x127] sm:$0xff] }
 0x198   :  { %1039 = vrot.lane.b32.xlu0 %v938_v40, %s5209_s25 }
 0x199   :  { %v1562_v46 = vpop.permute.xlu1 %1561  ;;  %v1798_v47 = vld [vmem:[#allocation3 + $0xc8] sm:$0xff] }
 0x19a   :  { %v1008_v45 = vpop.permute.xlu0 %1007  ;;  %1667 = vst.msk [vmem:[#allocation3 + $0x68] sm:$0xff] %vm800_vm3, %v1562_v46  ;;  %2230 = vmatmul.mubr.f32.gmra.mxu1 %v1798_v47  ;;  %v1501_v46 = vld [vmem:[#allocation2 + $0x9c] sm:$0xff] }
 0x19b   :  { %1102 = vst.msk [vmem:[#allocation3 + $0x210] sm:$0xff] %vm800_vm3, %v1008_v45  ;;  %2234 = vmatprep.mubr.f32.mxu1 %v1804_v48  ;;  %1579 = vrot.lane.b32.xlu1 %v6069_v50, %s5209_s25  ;;  %v2018_v50 = vld [vmem:[%s7447_s3 + $0x208] sm:$0xff]  ;;  %s4604_s3 = sld [smem:[#allocation15 + $0x1]] }
 0x19c   :  { %750 = vrot.lane.b32.xlu0 %v6153_v44, %s5209_s25  ;;  %4988 = vmatprep.subr.mxu1 %v2018_v50 }
 0x19d   :  { %v1564_v51 = vpop.permute.xlu1 %1563  ;;  %v1803_v52 = vld [vmem:[#allocation3 + $0xf0] sm:$0xff]  ;;  %4989 = vmatpush3.msra.mxu1 %v2018_v50  ;;  %v1824_v50 = vld [vmem:[#allocation3 + $0x198] sm:$0xff] }
 0x19e   :  { %v1010_v49 = vpop.permute.xlu0 %1009  ;;  %1668 = vst.msk [vmem:[#allocation3 + $0x90] sm:$0xff] %vm800_vm3, %v1564_v51  ;;  %2235 = vmatmul.mubr.f32.gmra.mxu1 %v1803_v52  ;;  %4990 = vmatprep.subr.mxu1 %v2017_v19  ;;  %v1213_v51 = vld [vmem:[#allocation2 + $0x91] sm:$0xff] }
 0x19f   :  { %1103 = vst.msk [vmem:[#allocation3 + $0x238] sm:$0xff] %vm800_vm3, %v1010_v49  ;;  %2239 = vmatprep.mubr.f32.mxu1 %v1809_v54  ;;  %1291 = vrot.lane.b32.xlu1 %v1208_v55, %s5209_s25  ;;  %v1502_v49 = vld [vmem:[#allocation2 + $0xa4] sm:$0xff] }
 0x1a0   :  { %752 = vrot.lane.b32.xlu0 %v6161_v53, %s5209_s25  ;;  %4991 = vmatpush3.msra.mxu1 %v2017_v19 }
 0x1a1   :  { %v1276_v58 = vpop.permute.xlu1 %1275  ;;  %v1786_v59 = vld [vmem:[#allocation3 + $0x68] sm:$0xff]  ;;  %5046 = vmatprep.subr.mxu1 %v5210_v42 }
 0x1a2   :  { %v1012_v56 = vpop.permute.xlu0 %1011  ;;  %1380 = vst.msk [vmem:[#allocation3 + $0x88] sm:$0xff] %vm800_vm3, %v1276_v58  ;;  %2459 = vmatprep.mubr.f32.mxu0 %v1786_v59  ;;  %v1839_v19 = vld [vmem:[#allocation3 + $0x210] sm:$0xff] }
 0x1a3   :  { %1104 = vst.msk [vmem:[#allocation3 + $0x260] sm:$0xff] %vm800_vm3, %v1012_v56  ;;  %2460 = vmatmul.mubr.f32.gmra.mxu0 %v1785_v60  ;;  %1581 = vrot.lane.b32.xlu1 %v6080_v57, %s5209_s25  ;;  %v939_v57 = vld [vmem:[#allocation2 + $0xff] sm:$0xff] }
 0x1a4   :  { %1045 = vrot.lane.b32.xlu0 %v941_v16, %s5209_s25  ;;  %v1214_v56 = vld [vmem:[#allocation2 + $0x99] sm:$0xff] }
 0x1a5   :  { %v1278_v0 = vpop.permute.xlu1 %1277  ;;  %v1791_v21 = vld [vmem:[#allocation3 + $0x90] sm:$0xff]  ;;  %v1829_v60 = vld [vmem:[#allocation3 + $0x1c0] sm:$0xff] }
 0x1a6   :  { %v1014_v61 = vpop.permute.xlu0 %1013  ;;  %1381 = vst.msk [vmem:[#allocation3 + $0xb0] sm:$0xff] %vm800_vm3, %v1278_v0  ;;  %2464 = vmatprep.mubr.f32.mxu0 %v1791_v21 }
 0x1a7   :  { %1105 = vst.msk [vmem:[#allocation3 + $0x288] sm:$0xff] %vm800_vm3, %v1014_v61  ;;  %1293 = vrot.lane.b32.xlu1 %v1209_v2, %s5209_s25  ;;  %v1215_v61 = vld [vmem:[#allocation2 + $0xa1] sm:$0xff] }
 0x1a8   :  { %758 = vrot.lane.b32.xlu0 %v6176_v1, %s5209_s25 }
 0x1a9   :  { %v707_v6 = vpop.permute.xlu1 %706  ;;  %v1790_v7 = vld [vmem:[#allocation3 + $0x88] sm:$0xff] }
 0x1aa   :  { %v1016_v3 = vpop.permute.xlu0 %1015  ;;  %808 = vst.msk [vmem:[#allocation3 + $0x118] sm:$0xff] %vm800_vm3, %v707_v6  ;;  %2465 = vmatmul.mubr.f32.gmra.mxu0 %v1790_v7 }
 0x1ab   :  { %1106 = vst.msk [vmem:[#allocation3 + $0x2b0] sm:$0xff] %vm800_vm3, %v1016_v3  ;;  %1583 = vrot.lane.b32.xlu1 %v6093_v63, %s5209_s25  ;;  %v6192_v63 = vld [vmem:[#allocation2 + $0xfc] sm:$0xff]  ;;  %v1216_v3 = vld [vmem:[#allocation2 + $0xa9] sm:$0xff] }
 0x1ac   :  { %1041 = vrot.lane.b32.xlu0 %v939_v57, %s5209_s25  ;;  %v1217_v57 = vld [vmem:[#allocation2 + $0xb1] sm:$0xff] }
 0x1ad   :  { %v709_v9 = vpop.permute.xlu1 %708  ;;  %v1795_v34 = vld [vmem:[#allocation3 + $0xb0] sm:$0xff] }
 0x1ae   :  { %v1048_v8 = vpop.permute.xlu0 %1047  ;;  %809 = vst.msk [vmem:[#allocation3 + $0x140] sm:$0xff] %vm800_vm3, %v709_v9 }
 0x1af   :  { %1122 = vst.msk [vmem:[#allocation3 + $0x530] sm:$0xff] %vm800_vm3, %v1048_v8  ;;  %1295 = vrot.lane.b32.xlu1 %v1210_v12, %s5209_s25 }
 0x1b0   :  { %1043 = vrot.lane.b32.xlu0 %v940_v10, %s5209_s25  ;;  %v1218_v10 = vld [vmem:[#allocation2 + $0xb9] sm:$0xff] }
 0x1b1   :  { %v1566_v14 = vpop.permute.xlu1 %1565  ;;  %v1808_v15 = vld [vmem:[#allocation3 + $0x118] sm:$0xff] }
 0x1b2   :  { %v1050_v13 = vpop.permute.xlu0 %1049  ;;  %1669 = vst.msk [vmem:[#allocation3 + $0xb8] sm:$0xff] %vm800_vm3, %v1566_v14  ;;  %2240 = vmatmul.mubr.f32.gmra.mxu1 %v1808_v15  ;;  %v1834_v14 = vld [vmem:[#allocation3 + $0x1e8] sm:$0xff] }
 0x1b3   :  { %1123 = vst.msk [vmem:[#allocation3 + $0x558] sm:$0xff] %vm800_vm3, %v1050_v13  ;;  %2244 = vmatprep.mubr.f32.mxu1 %v1814_v17  ;;  %1297 = vrot.lane.b32.xlu1 %v1211_v18, %s5209_s25  ;;  %v1219_v15 = vld [vmem:[#allocation2 + $0xc1] sm:$0xff] }
 0x1b4   :  { %754 = vrot.lane.b32.xlu0 %v6192_v63, %s5209_s25 }
 0x1b5   :  { %v1568_v22 = vpop.permute.xlu1 %1567  ;;  %v1813_v24 = vld [vmem:[#allocation3 + $0x140] sm:$0xff] }
 0x1b6   :  { %v1018_v20 = vpop.permute.xlu0 %1017  ;;  %1670 = vst.msk [vmem:[#allocation3 + $0xe0] sm:$0xff] %vm800_vm3, %v1568_v22  ;;  %2245 = vmatmul.mubr.f32.gmra.mxu1 %v1813_v24 }
 0x1b7   :  { %1107 = vst.msk [vmem:[#allocation3 + $0x2d8] sm:$0xff] %vm800_vm3, %v1018_v20  ;;  %2249 = vmatprep.mubr.f32.mxu1 %v1819_v26  ;;  %1585 = vrot.lane.b32.xlu1 %v6109_v5, %s5209_s25  ;;  %v1220_v20 = vld [vmem:[#allocation2 + $0xc9] sm:$0xff]  ;;  %v1221_v26 = vld [vmem:[#allocation2 + $0xd1] sm:$0xff] }
 0x1b8   :  { %756 = vrot.lane.b32.xlu0 %v6202_v25, %s5209_s25 }
 0x1b9   :  { %v1280_v31 = vpop.permute.xlu1 %1279  ;;  %v1796_v32 = vld [vmem:[#allocation3 + $0xb8] sm:$0xff] }
 0x1ba   :  { %v1020_v27 = vpop.permute.xlu0 %1019  ;;  %1382 = vst.msk [vmem:[#allocation3 + $0xd8] sm:$0xff] %vm800_vm3, %v1280_v31  ;;  %2469 = vmatprep.mubr.f32.mxu0 %v1796_v32  ;;  %v1844_v32 = vld [vmem:[#allocation3 + $0x238] sm:$0xff] }
 0x1bb   :  { %1108 = vst.msk [vmem:[#allocation3 + $0x300] sm:$0xff] %vm800_vm3, %v1020_v27  ;;  %2470 = vmatmul.mubr.f32.gmra.mxu0 %v1795_v34  ;;  %1587 = vrot.lane.b32.xlu1 %v6116_v11, %s5209_s25  ;;  %v6223_v11 = vld [vmem:[#allocation2 + $0x11c] sm:$0xff] }
 0x1bc   :  { %760 = vrot.lane.b32.xlu0 %v6211_v33, %s5209_s25  ;;  %v1222_v34 = vld [vmem:[#allocation2 + $0xd9] sm:$0xff] }
 0x1bd   :  { %v1282_v35 = vpop.permute.xlu1 %1281  ;;  %v1801_v36 = vld [vmem:[#allocation3 + $0xe0] sm:$0xff] }
 0x1be   :  { %v731_v5 = vpop.permute.xlu0 %730  ;;  %1383 = vst.msk [vmem:[#allocation3 + $0x100] sm:$0xff] %vm800_vm3, %v1282_v35  ;;  %2474 = vmatprep.mubr.f32.mxu0 %v1801_v36  ;;  %v1223_v36 = vld [vmem:[#allocation2 + $0xe1] sm:$0xff] }
 0x1bf   :  { %820 = vst.msk [vmem:[#allocation3 + $0x2f8] sm:$0xff] %vm800_vm3, %v731_v5  ;;  %1299 = vrot.lane.b32.xlu1 %v1212_v39, %s5209_s25 }
 0x1c0   :  { %1051 = vrot.lane.b32.xlu0 %v944_v38, %s5209_s25  ;;  %v1849_v38 = vld [vmem:[#allocation3 + $0x260] sm:$0xff] }
 0x1c1   :  { %v711_v41 = vpop.permute.xlu1 %710  ;;  %v1800_v45 = vld [vmem:[#allocation3 + $0xd8] sm:$0xff] }
 0x1c2   :  { %v733_v40 = vpop.permute.xlu0 %732  ;;  %810 = vst.msk [vmem:[#allocation3 + $0x168] sm:$0xff] %vm800_vm3, %v711_v41  ;;  %2475 = vmatmul.mubr.f32.gmra.mxu0 %v1800_v45  ;;  %v1224_v41 = vld [vmem:[#allocation2 + $0xe9] sm:$0xff] }
 0x1c3   :  { %821 = vst.msk [vmem:[#allocation3 + $0x320] sm:$0xff] %vm800_vm3, %v733_v40  ;;  %1589 = vrot.lane.b32.xlu1 %v1501_v46, %s5209_s25  ;;  %v1854_v45 = vld [vmem:[#allocation3 + $0x288] sm:$0xff] }
 0x1c4   :  { %762 = vrot.lane.b32.xlu0 %v6223_v11, %s5209_s25 }
 0x1c5   :  { %v713_v48 = vpop.permute.xlu1 %712  ;;  %v1805_v2 = vld [vmem:[#allocation3 + $0x100] sm:$0xff] }
 0x1c6   :  { %v1022_v47 = vpop.permute.xlu0 %1021  ;;  %811 = vst.msk [vmem:[#allocation3 + $0x190] sm:$0xff] %vm800_vm3, %v713_v48  ;;  %v1225_v48 = vld [vmem:[#allocation2 + $0xf1] sm:$0xff] }
 0x1c7   :  { %1109 = vst.msk [vmem:[#allocation3 + $0x328] sm:$0xff] %vm800_vm3, %v1022_v47  ;;  %1301 = vrot.lane.b32.xlu1 %v1213_v51, %s5209_s25 }
 0x1c8   :  { %1591 = vrot.lane.b32.xlu0 %v1502_v49, %s5209_s25  ;;  %v1859_v49 = vld [vmem:[#allocation3 + $0x2b0] sm:$0xff] }
 0x1c9   :  { %v1570_v54 = vpop.permute.xlu1 %1569  ;;  %v1818_v55 = vld [vmem:[#allocation3 + $0x168] sm:$0xff] }
 0x1ca   :  { %v1024_v52 = vpop.permute.xlu0 %1023  ;;  %1671 = vst.msk [vmem:[#allocation3 + $0x108] sm:$0xff] %vm800_vm3, %v1570_v54  ;;  %2250 = vmatmul.mubr.f32.gmra.mxu1 %v1818_v55  ;;  %v1226_v54 = vld [vmem:[#allocation2 + $0xf9] sm:$0xff] }
 0x1cb   :  { %1110 = vst.msk [vmem:[#allocation3 + $0x350] sm:$0xff] %vm800_vm3, %v1024_v52  ;;  %2254 = vmatprep.mubr.f32.mxu1 %v1824_v50  ;;  %1303 = vrot.lane.b32.xlu1 %v1214_v56, %s5209_s25  ;;  %v1864_v55 = vld [vmem:[#allocation3 + $0x2d8] sm:$0xff] }
 0x1cc   :  { %1593 = vrot.lane.b32.xlu0 %v6030_v28, %s5209_s25 }
 0x1cd   :  { %v1572_v59 = vpop.permute.xlu1 %1571  ;;  %v1823_v16 = vld [vmem:[#allocation3 + $0x190] sm:$0xff] }
 0x1ce   :  { %v735_v58 = vpop.permute.xlu0 %734  ;;  %1672 = vst.msk [vmem:[#allocation3 + $0x130] sm:$0xff] %vm800_vm3, %v1572_v59  ;;  %2255 = vmatmul.mubr.f32.gmra.mxu1 %v1823_v16  ;;  %v1869_v59 = vld [vmem:[#allocation3 + $0x300] sm:$0xff] }
 0x1cf   :  { %822 = vst.msk [vmem:[#allocation3 + $0x348] sm:$0xff] %vm800_vm3, %v735_v58  ;;  %2259 = vmatprep.mubr.f32.mxu1 %v1829_v60  ;;  %1305 = vrot.lane.b32.xlu1 %v1215_v61, %s5209_s25  ;;  %v1227_v58 = vld [vmem:[#allocation2 + $0x101] sm:$0xff]  ;;  %v1868_v60 = vld [vmem:[#allocation3 + $0x2f8] sm:$0xff] }
 0x1d0   :  { %1595 = vrot.lane.b32.xlu0 %v6035_v29, %s5209_s25 }
 0x1d1   :  { %v1284_v0 = vpop.permute.xlu1 %1283  ;;  %v1806_v21 = vld [vmem:[#allocation3 + $0x108] sm:$0xff] }
 0x1d2   :  { %v737_v28 = vpop.permute.xlu0 %736  ;;  %1384 = vst.msk [vmem:[#allocation3 + $0x128] sm:$0xff] %vm800_vm3, %v1284_v0  ;;  %2479 = vmatprep.mubr.f32.mxu0 %v1806_v21  ;;  %v1448_v0 = vld [vmem:[#allocation2 + $0x133] sm:$0xff] }
 0x1d3   :  { %823 = vst.msk [vmem:[#allocation3 + $0x370] sm:$0xff] %vm800_vm3, %v737_v28  ;;  %2480 = vmatmul.mubr.f32.gmra.mxu0 %v1805_v2  ;;  %1307 = vrot.lane.b32.xlu1 %v1216_v3, %s5209_s25  ;;  %v1228_v28 = vld [vmem:[#allocation2 + $0x109] sm:$0xff]  ;;  %v1873_v3 = vld [vmem:[#allocation3 + $0x320] sm:$0xff] }
 0x1d4   :  { %1597 = vrot.lane.b32.xlu0 %v6049_v37, %s5209_s25  ;;  %1484 = vst.msk [vmem:[#allocation3 + $0x590] sm:$0xff] %vm511_vm2, %v1448_v0 }
 0x1d5   :  { %v715_v6 = vpop.permute.xlu1 %714  ;;  %v1811_v7 = vld [vmem:[#allocation3 + $0x130] sm:$0xff] }
 0x1d6   :  { %v1026_v29 = vpop.permute.xlu0 %1025  ;;  %812 = vst.msk [vmem:[#allocation3 + $0x1b8] sm:$0xff] %vm800_vm3, %v715_v6  ;;  %2484 = vmatprep.mubr.f32.mxu0 %v1811_v7  ;;  %v1518_v6 = vld [vmem:[#allocation2 + $0x124] sm:$0xff]  ;;  %v1229_v7 = vld [vmem:[#allocation2 + $0x111] sm:$0xff] }
 0x1d7   :  { %1111 = vst.msk [vmem:[#allocation3 + $0x378] sm:$0xff] %vm800_vm3, %v1026_v29  ;;  %1309 = vrot.lane.b32.xlu1 %v1217_v57, %s5209_s25 }
 0x1d8   :  { %1599 = vrot.lane.b32.xlu0 %v6058_v43, %s5209_s25 }
 0x1d9   :  { %v717_v37 = vpop.permute.xlu1 %716  ;;  %v1810_v9 = vld [vmem:[#allocation3 + $0x128] sm:$0xff] }
 0x1da   :  { %v1028_v8 = vpop.permute.xlu0 %1027  ;;  %813 = vst.msk [vmem:[#allocation3 + $0x1e0] sm:$0xff] %vm800_vm3, %v717_v37  ;;  %2485 = vmatmul.mubr.f32.gmra.mxu0 %v1810_v9  ;;  %v1878_v37 = vld [vmem:[#allocation3 + $0x348] sm:$0xff] }
 0x1db   :  { %1112 = vst.msk [vmem:[#allocation3 + $0x3a0] sm:$0xff] %vm800_vm3, %v1028_v8  ;;  %1311 = vrot.lane.b32.xlu1 %v1218_v10, %s5209_s25  ;;  %v1519_v10 = vld [vmem:[#allocation2 + $0x12c] sm:$0xff] }
 0x1dc   :  { %1601 = vrot.lane.b32.xlu0 %v6089_v62, %s5209_s25 }
 0x1dd   :  { %v1574_v13 = vpop.permute.xlu1 %1573  ;;  %v1828_v43 = vld [vmem:[#allocation3 + $0x1b8] sm:$0xff] }
 0x1de   :  { %v739_v12 = vpop.permute.xlu0 %738  ;;  %1673 = vst.msk [vmem:[#allocation3 + $0x158] sm:$0xff] %vm800_vm3, %v1574_v13  ;;  %2260 = vmatmul.mubr.f32.gmra.mxu1 %v1828_v43  ;;  %v1736_v13 = vld [vmem:[#allocation2 + $0x135] sm:$0xff] }
 0x1df   :  { %824 = vst.msk [vmem:[#allocation3 + $0x398] sm:$0xff] %vm800_vm3, %v739_v12  ;;  %2264 = vmatprep.mubr.f32.mxu1 %v1834_v14  ;;  %1313 = vrot.lane.b32.xlu1 %v1219_v15, %s5209_s25  ;;  %v1230_v12 = vld [vmem:[#allocation2 + $0x119] sm:$0xff] }
 0x1e0   :  { %1603 = vrot.lane.b32.xlu0 %v6105_v4, %s5209_s25  ;;  %v1884_v43 = vld [vmem:[#allocation3 + $0x378] sm:$0xff]  ;;  %1772 = vst.msk [vmem:[#allocation3 + $0x598] sm:$0xff] %vm511_vm2, %v1736_v13 }
 0x1e1   :  { %v719_v17 = vpop.permute.xlu1 %718  ;;  %v1833_v18 = vld [vmem:[#allocation3 + $0x1e0] sm:$0xff] }
 0x1e2   :  { %v741_v62 = vpop.permute.xlu0 %740  ;;  %814 = vst.msk [vmem:[#allocation3 + $0x208] sm:$0xff] %vm800_vm3, %v719_v17  ;;  %2265 = vmatmul.mubr.f32.gmra.mxu1 %v1833_v18  ;;  %v1520_v18 = vld [vmem:[#allocation2 + $0x134] sm:$0xff] }
 0x1e3   :  { %825 = vst.msk [vmem:[#allocation3 + $0x3c0] sm:$0xff] %vm800_vm3, %v741_v62  ;;  %2269 = vmatprep.mubr.f32.mxu1 %v1839_v19  ;;  %1315 = vrot.lane.b32.xlu1 %v1220_v20, %s5209_s25  ;;  %v1883_v62 = vld [vmem:[#allocation3 + $0x370] sm:$0xff]  ;;  %v1231_v19 = vld [vmem:[#allocation2 + $0x121] sm:$0xff] }
 0x1e4   :  { %1605 = vrot.lane.b32.xlu0 %v6126_v23, %s5209_s25  ;;  %v1889_v20 = vld [vmem:[#allocation3 + $0x3a0] sm:$0xff] }
 0x1e5   :  { %v1816_v22 = vld [vmem:[#allocation3 + $0x158] sm:$0xff]  ;;  %v721_v24 = vpop.permute.xlu1 %720 }
 0x1e6   :  { %v1030_v4 = vpop.permute.xlu0 %1029  ;;  %2489 = vmatprep.mubr.f32.mxu0 %v1816_v22  ;;  %815 = vst.msk [vmem:[#allocation3 + $0x230] sm:$0xff] %vm800_vm3, %v721_v24  ;;  %v1888_v24 = vld [vmem:[#allocation3 + $0x398] sm:$0xff] }
 0x1e7   :  { %1113 = vst.msk [vmem:[#allocation3 + $0x3c8] sm:$0xff] %vm800_vm3, %v1030_v4  ;;  %1317 = vrot.lane.b32.xlu1 %v1221_v26, %s5209_s25 }
 0x1e8   :  { %1607 = vrot.lane.b32.xlu0 %v6134_v30, %s5209_s25 }
 0x1e9   :  { %v1838_v23 = vld [vmem:[#allocation3 + $0x208] sm:$0xff]  ;;  %v723_v31 = vpop.permute.xlu1 %722 }
 0x1ea   :  { %v1032_v27 = vpop.permute.xlu0 %1031  ;;  %2270 = vmatmul.mubr.f32.gmra.mxu1 %v1838_v23  ;;  %816 = vst.msk [vmem:[#allocation3 + $0x258] sm:$0xff] %vm800_vm3, %v723_v31 }
 0x1eb   :  { %1114 = vst.msk [vmem:[#allocation3 + $0x3f0] sm:$0xff] %vm800_vm3, %v1032_v27  ;;  %2274 = vmatprep.mubr.f32.mxu1 %v1844_v32  ;;  %1319 = vrot.lane.b32.xlu1 %v1222_v34, %s5209_s25  ;;  %v1232_v27 = vld [vmem:[#allocation2 + $0x129] sm:$0xff]  ;;  %v1893_v34 = vld [vmem:[#allocation3 + $0x3c0] sm:$0xff] }
 0x1ec   :  { %1609 = vrot.lane.b32.xlu0 %v6153_v44, %s5209_s25 }
 0x1ed   :  { %v725_v5 = vpop.permute.xlu1 %724  ;;  %v1843_v35 = vld [vmem:[#allocation3 + $0x230] sm:$0xff] }
 0x1ee   :  { %v743_v30 = vpop.permute.xlu0 %742  ;;  %817 = vst.msk [vmem:[#allocation3 + $0x280] sm:$0xff] %vm800_vm3, %v725_v5  ;;  %2275 = vmatmul.mubr.f32.gmra.mxu1 %v1843_v35  ;;  %v1894_v23 = vld [vmem:[#allocation3 + $0x3c8] sm:$0xff] }
 0x1ef   :  { %826 = vst.msk [vmem:[#allocation3 + $0x3e8] sm:$0xff] %vm800_vm3, %v743_v30  ;;  %1321 = vrot.lane.b32.xlu1 %v1223_v36, %s5209_s25  ;;  %2279 = vmatprep.mubr.f32.mxu1 %v1849_v38 }
 0x1f0   :  { %1611 = vrot.lane.b32.xlu0 %v6161_v53, %s5209_s25 }
 0x1f1   :  { %v727_v39 = vpop.permute.xlu1 %726  ;;  %v1848_v40 = vld [vmem:[#allocation3 + $0x258] sm:$0xff] }
 0x1f2   :  { %v745_v44 = vpop.permute.xlu0 %744  ;;  %818 = vst.msk [vmem:[#allocation3 + $0x2a8] sm:$0xff] %vm800_vm3, %v727_v39  ;;  %2280 = vmatmul.mubr.f32.gmra.mxu1 %v1848_v40  ;;  %v1899_v5 = vld [vmem:[#allocation3 + $0x3f0] sm:$0xff] }
 0x1f3   :  { %827 = vst.msk [vmem:[#allocation3 + $0x410] sm:$0xff] %vm800_vm3, %v745_v44  ;;  %1323 = vrot.lane.b32.xlu1 %v1224_v41, %s5209_s25  ;;  %2284 = vmatprep.mubr.f32.mxu1 %v1854_v45 }
 0x1f4   :  { %1613 = vrot.lane.b32.xlu0 %v6192_v63, %s5209_s25 }
 0x1f5   :  { %v729_v46 = vpop.permute.xlu1 %728  ;;  %v1853_v47 = vld [vmem:[#allocation3 + $0x280] sm:$0xff] }
 0x1f6   :  { %v1034_v53 = vpop.permute.xlu0 %1033  ;;  %819 = vst.msk [vmem:[#allocation3 + $0x2d0] sm:$0xff] %vm800_vm3, %v729_v46  ;;  %2285 = vmatmul.mubr.f32.gmra.mxu1 %v1853_v47  ;;  %v1898_v38 = vld [vmem:[#allocation3 + $0x3e8] sm:$0xff] }
 0x1f7   :  { %1115 = vst.msk [vmem:[#allocation3 + $0x418] sm:$0xff] %vm800_vm3, %v1034_v53  ;;  %1325 = vrot.lane.b32.xlu1 %v1225_v48, %s5209_s25  ;;  %2289 = vmatprep.mubr.f32.mxu1 %v1859_v49 }
 0x1f8   :  { %1615 = vrot.lane.b32.xlu0 %v6202_v25, %s5209_s25 }
 0x1f9   :  { %v1286_v51 = vpop.permute.xlu1 %1285  ;;  %v1858_v52 = vld [vmem:[#allocation3 + $0x2a8] sm:$0xff] }
 0x1fa   :  { %v1036_v63 = vpop.permute.xlu0 %1035  ;;  %1385 = vst.msk [vmem:[#allocation3 + $0x150] sm:$0xff] %vm800_vm3, %v1286_v51  ;;  %2290 = vmatmul.mubr.f32.gmra.mxu1 %v1858_v52  ;;  %v1903_v45 = vld [vmem:[#allocation3 + $0x410] sm:$0xff] }
 0x1fb   :  { %1116 = vst.msk [vmem:[#allocation3 + $0x440] sm:$0xff] %vm800_vm3, %v1036_v63  ;;  %1327 = vrot.lane.b32.xlu1 %v1226_v54, %s5209_s25  ;;  %2294 = vmatprep.mubr.f32.mxu1 %v1864_v55 }
 0x1fc   :  { %1617 = vrot.lane.b32.xlu0 %v6176_v1, %s5209_s25 }
 0x1fd   :  { %v1576_v50 = vpop.permute.xlu1 %1575  ;;  %v1863_v56 = vld [vmem:[#allocation3 + $0x2d0] sm:$0xff] }
 0x1fe   :  { %v747_v25 = vpop.permute.xlu0 %746  ;;  %1674 = vst.msk [vmem:[#allocation3 + $0x180] sm:$0xff] %vm800_vm3, %v1576_v50  ;;  %2295 = vmatmul.mubr.f32.gmra.mxu1 %v1863_v56  ;;  %v1904_v39 = vld [vmem:[#allocation3 + $0x418] sm:$0xff] }
 0x1ff   :  { %828 = vst.msk [vmem:[#allocation3 + $0x438] sm:$0xff] %vm800_vm3, %v747_v25  ;;  %1329 = vrot.lane.b32.xlu1 %v1227_v58, %s5209_s25  ;;  %2299 = vmatprep.mubr.f32.mxu1 %v1869_v59 }
 0x200   :  { %1619 = vrot.lane.b32.xlu0 %v6211_v33, %s5209_s25  ;;  %v1874_v33 = vld [vmem:[#allocation3 + $0x328] sm:$0xff] }
 0x201   :  { %v1288_v16 = vpop.permute.xlu1 %1287  ;;  %v1815_v61 = vld [vmem:[#allocation3 + $0x150] sm:$0xff] }
 0x202   :  { %v749_v1 = vpop.permute.xlu0 %748  ;;  %1386 = vst.msk [vmem:[#allocation3 + $0x178] sm:$0xff] %vm800_vm3, %v1288_v16  ;;  %2300 = vmatmul.mubr.f32.gmra.mxu1 %v1868_v60  ;;  %2490 = vmatmul.mubr.f32.gmra.mxu0 %v1815_v61  ;;  %v1909_v46 = vld [vmem:[#allocation3 + $0x440] sm:$0xff] }
 0x203   :  { %829 = vst.msk [vmem:[#allocation3 + $0x460] sm:$0xff] %vm800_vm3, %v749_v1  ;;  %1331 = vrot.lane.b32.xlu1 %v1228_v28, %s5209_s25  ;;  %2304 = vmatprep.mubr.f32.mxu1 %v1874_v33 }
 0x204   :  { %1621 = vrot.lane.b32.xlu0 %v6223_v11, %s5209_s25  ;;  %v1879_v11 = vld [vmem:[#allocation3 + $0x350] sm:$0xff] }
 0x205   :  { %v1578_v2 = vpop.permute.xlu1 %1577  ;;  %v1821_v29 = vld [vmem:[#allocation3 + $0x180] sm:$0xff] }
 0x206   :  { %v1038_v21 = vpop.permute.xlu0 %1037  ;;  %1675 = vst.msk [vmem:[#allocation3 + $0x1a8] sm:$0xff] %vm800_vm3, %v1578_v2  ;;  %2305 = vmatmul.mubr.f32.gmra.mxu1 %v1873_v3  ;;  %2494 = vmatprep.mubr.f32.mxu0 %v1821_v29  ;;  %v1908_v49 = vld [vmem:[#allocation3 + $0x438] sm:$0xff] }
 0x207   :  { %1117 = vst.msk [vmem:[#allocation3 + $0x468] sm:$0xff] %vm800_vm3, %v1038_v21  ;;  %1333 = vrot.lane.b32.xlu1 %v1229_v7, %s5209_s25  ;;  %2309 = vmatprep.mubr.f32.mxu1 %v1879_v11 }
 0x208   :  { %1623 = vrot.lane.b32.xlu0 %v1518_v6, %s5209_s25 }
 0x209   :  { %v1290_v8 = vpop.permute.xlu1 %1289  ;;  %v1820_v9 = vld [vmem:[#allocation3 + $0x178] sm:$0xff] }
 0x20a   :  { %v1040_v57 = vpop.permute.xlu0 %1039  ;;  %1387 = vst.msk [vmem:[#allocation3 + $0x1a0] sm:$0xff] %vm800_vm3, %v1290_v8  ;;  %2310 = vmatmul.mubr.f32.gmra.mxu1 %v1878_v37  ;;  %2495 = vmatmul.mubr.f32.gmra.mxu0 %v1820_v9  ;;  %v1913_v55 = vld [vmem:[#allocation3 + $0x460] sm:$0xff] }
 0x20b   :  { %1118 = vst.msk [vmem:[#allocation3 + $0x490] sm:$0xff] %vm800_vm3, %v1040_v57  ;;  %1335 = vrot.lane.b32.xlu1 %v1230_v12, %s5209_s25  ;;  %2314 = vmatprep.mubr.f32.mxu1 %v1884_v43  ;;  %v1939_v12 = vld [vmem:[#allocation3 + $0x530] sm:$0xff] }
 0x20c   :  { %1625 = vrot.lane.b32.xlu0 %v1519_v10, %s5209_s25 }
 0x20d   :  { %v1580_v15 = vpop.permute.xlu1 %1579  ;;  %v1826_v17 = vld [vmem:[#allocation3 + $0x1a8] sm:$0xff] }
 0x20e   :  { %v751_v14 = vpop.permute.xlu0 %750  ;;  %1676 = vst.msk [vmem:[#allocation3 + $0x1d0] sm:$0xff] %vm800_vm3, %v1580_v15  ;;  %2315 = vmatmul.mubr.f32.gmra.mxu1 %v1883_v62  ;;  %2499 = vmatprep.mubr.f32.mxu0 %v1826_v17  ;;  %v1914_v51 = vld [vmem:[#allocation3 + $0x468] sm:$0xff] }
 0x20f   :  { %830 = vst.msk [vmem:[#allocation3 + $0x488] sm:$0xff] %vm800_vm3, %v751_v14  ;;  %1337 = vrot.lane.b32.xlu1 %v1231_v19, %s5209_s25  ;;  %2319 = vmatprep.mubr.f32.mxu1 %v1889_v20 }
 0x210   :  { %1627 = vrot.lane.b32.xlu0 %v1520_v18, %s5209_s25  ;;  %v1944_v18 = vld [vmem:[#allocation3 + $0x558] sm:$0xff] }
 0x211   :  { %v1292_v22 = vpop.permute.xlu1 %1291  ;;  %v1825_v26 = vld [vmem:[#allocation3 + $0x1a0] sm:$0xff] }
 0x212   :  { %v753_v4 = vpop.permute.xlu0 %752  ;;  %1388 = vst.msk [vmem:[#allocation3 + $0x1c8] sm:$0xff] %vm800_vm3, %v1292_v22  ;;  %2320 = vmatmul.mubr.f32.gmra.mxu1 %v1888_v24  ;;  %2500 = vmatmul.mubr.f32.gmra.mxu0 %v1825_v26  ;;  %v1919_v50 = vld [vmem:[#allocation3 + $0x490] sm:$0xff] }
 0x213   :  { %831 = vst.msk [vmem:[#allocation3 + $0x4b0] sm:$0xff] %vm800_vm3, %v753_v4  ;;  %1339 = vrot.lane.b32.xlu1 %v1232_v27, %s5209_s25  ;;  %2324 = vmatprep.mubr.f32.mxu1 %v1894_v23 }
 0x215   :  { %v1582_v32 = vpop.permute.xlu1 %1581  ;;  %v1831_v30 = vld [vmem:[#allocation3 + $0x1d0] sm:$0xff] }
 0x216   :  { %v1046_v31 = vpop.permute.xlu0 %1045  ;;  %1677 = vst.msk [vmem:[#allocation3 + $0x1f8] sm:$0xff] %vm800_vm3, %v1582_v32  ;;  %2325 = vmatmul.mubr.f32.gmra.mxu1 %v1893_v34  ;;  %2504 = vmatprep.mubr.f32.mxu0 %v1831_v30  ;;  %v1918_v59 = vld [vmem:[#allocation3 + $0x488] sm:$0xff] }
 0x217   :  { %1121 = vst.msk [vmem:[#allocation3 + $0x508] sm:$0xff] %vm800_vm3, %v1046_v31  ;;  %2329 = vmatprep.mubr.f32.mxu1 %v1899_v5  ;;  %v1777_v5 = vld [vmem:[#allocation3 + $0x20] sm:$0xff] }
 0x219   :  { %v1294_v36 = vpop.permute.xlu1 %1293  ;;  %v1830_v44 = vld [vmem:[#allocation3 + $0x1c8] sm:$0xff] }
 0x21a   :  { %v759_v35 = vpop.permute.xlu0 %758  ;;  %1389 = vst.msk [vmem:[#allocation3 + $0x1f0] sm:$0xff] %vm800_vm3, %v1294_v36  ;;  %2330 = vmatmul.mubr.f32.gmra.mxu1 %v1898_v38  ;;  %2505 = vmatmul.mubr.f32.gmra.mxu0 %v1830_v44  ;;  %v1923_v28 = vld [vmem:[#allocation3 + $0x4b0] sm:$0xff] }
 0x21b   :  { %834 = vst.msk [vmem:[#allocation3 + $0x528] sm:$0xff] %vm800_vm3, %v759_v35  ;;  %2334 = vmatprep.mubr.f32.mxu1 %v1904_v39 }
 0x21d   :  { %v1584_v41 = vpop.permute.xlu1 %1583  ;;  %v1836_v53 = vld [vmem:[#allocation3 + $0x1f8] sm:$0xff] }
 0x21e   :  { %v1042_v40 = vpop.permute.xlu0 %1041  ;;  %1678 = vst.msk [vmem:[#allocation3 + $0x220] sm:$0xff] %vm800_vm3, %v1584_v41  ;;  %2335 = vmatmul.mubr.f32.gmra.mxu1 %v1903_v45  ;;  %2509 = vmatprep.mubr.f32.mxu0 %v1836_v53  ;;  %v1934_v6 = vld [vmem:[#allocation3 + $0x508] sm:$0xff]  ;;  %v6363_v45 = vld [vmem:[%s7448_s4] ss:$0 sm:$0xff]  ;;  %v1787_v53 = vld [vmem:[#allocation3 + $0x70] sm:$0xff] }
 0x21f   :  { %1119 = vst.msk [vmem:[#allocation3 + $0x4b8] sm:$0xff] %vm800_vm3, %v1042_v40  ;;  %2339 = vmatprep.mubr.f32.mxu1 %v1909_v46  ;;  %v1782_v41 = vld [vmem:[#allocation3 + $0x48] sm:$0xff] }
 0x221   :  { %v1296_v48 = vpop.permute.xlu1 %1295  ;;  %v1835_v63 = vld [vmem:[#allocation3 + $0x1f0] sm:$0xff] }
 0x222   :  { %v1044_v47 = vpop.permute.xlu0 %1043  ;;  %1390 = vst.msk [vmem:[#allocation3 + $0x218] sm:$0xff] %vm800_vm3, %v1296_v48  ;;  %2340 = vmatmul.mubr.f32.gmra.mxu1 %v1908_v49  ;;  %2510 = vmatmul.mubr.f32.gmra.mxu0 %v1835_v63  ;;  %v1938_v15 = vld [vmem:[#allocation3 + $0x528] sm:$0xff] }
 0x223   :  { %1120 = vst.msk [vmem:[#allocation3 + $0x4e0] sm:$0xff] %vm800_vm3, %v1044_v47  ;;  %2344 = vmatprep.mubr.f32.mxu1 %v1914_v51 }
 0x225   :  { %v1298_v54 = vpop.permute.xlu1 %1297  ;;  %v1841_v25 = vld [vmem:[#allocation3 + $0x220] sm:$0xff] }
 0x226   :  { %v755_v52 = vpop.permute.xlu0 %754  ;;  %1391 = vst.msk [vmem:[#allocation3 + $0x240] sm:$0xff] %vm800_vm3, %v1298_v54  ;;  %2345 = vmatmul.mubr.f32.gmra.mxu1 %v1913_v55  ;;  %2514 = vmatprep.mubr.f32.mxu0 %v1841_v25  ;;  %v1924_v16 = vld [vmem:[#allocation3 + $0x4b8] sm:$0xff]  ;;  %v1797_v55 = vld [vmem:[#allocation3 + $0xc0] sm:$0xff] }
 0x227   :  { %832 = vst.msk [vmem:[#allocation3 + $0x4d8] sm:$0xff] %vm800_vm3, %v755_v52  ;;  %2349 = vmatprep.mubr.f32.mxu1 %v1919_v50  ;;  %v1792_v52 = vld [vmem:[#allocation3 + $0x98] sm:$0xff] }
 0x229   :  { %v1586_v58 = vpop.permute.xlu1 %1585  ;;  %v1840_v1 = vld [vmem:[#allocation3 + $0x218] sm:$0xff] }
 0x22a   :  { %v757_v56 = vpop.permute.xlu0 %756  ;;  %1679 = vst.msk [vmem:[#allocation3 + $0x248] sm:$0xff] %vm800_vm3, %v1586_v58  ;;  %2350 = vmatmul.mubr.f32.gmra.mxu1 %v1918_v59  ;;  %2515 = vmatmul.mubr.f32.gmra.mxu0 %v1840_v1  ;;  %v1929_v33 = vld [vmem:[#allocation3 + $0x4e0] sm:$0xff] }
 0x22b   :  { %833 = vst.msk [vmem:[#allocation3 + $0x500] sm:$0xff] %vm800_vm3, %v757_v56  ;;  %2354 = vmatprep.mubr.f32.mxu1 %v1924_v16  ;;  %v1802_v16 = vld [vmem:[#allocation3 + $0xe8] sm:$0xff] }
 0x22d   :  { %v1588_v61 = vpop.permute.xlu1 %1587  ;;  %v1845_v7 = vld [vmem:[#allocation3 + $0x240] sm:$0xff] }
 0x22e   :  { %v761_v60 = vpop.permute.xlu0 %760  ;;  %1680 = vst.msk [vmem:[#allocation3 + $0x270] sm:$0xff] %vm800_vm3, %v1588_v61  ;;  %2355 = vmatmul.mubr.f32.gmra.mxu1 %v1923_v28  ;;  %v1928_v2 = vld [vmem:[#allocation3 + $0x4d8] sm:$0xff] }
 0x22f   :  { %835 = vst.msk [vmem:[#allocation3 + $0x550] sm:$0xff] %vm800_vm3, %v761_v60  ;;  %2359 = vmatprep.mubr.f32.mxu1 %v1929_v33  ;;  %v1807_v60 = vld [vmem:[#allocation3 + $0x110] sm:$0xff] }
 0x231   :  { %v1300_v21 = vpop.permute.xlu1 %1299  ;;  %v1846_v3 = vld [vmem:[#allocation3 + $0x248] sm:$0xff] }
 0x232   :  { %v1052_v0 = vpop.permute.xlu0 %1051  ;;  %1392 = vst.msk [vmem:[#allocation3 + $0x268] sm:$0xff] %vm800_vm3, %v1300_v21  ;;  %2360 = vmatmul.mubr.f32.gmra.mxu1 %v1928_v2  ;;  %2519 = vmatprep.mubr.f32.mxu0 %v1846_v3  ;;  %v1933_v37 = vld [vmem:[#allocation3 + $0x500] sm:$0xff]  ;;  %v1812_v3 = vld [vmem:[#allocation3 + $0x138] sm:$0xff] }
 0x233   :  { %1124 = vst.msk [vmem:[#allocation3 + $0x580] sm:$0xff] %vm800_vm3, %v1052_v0  ;;  %v6340_v29 = vpop.f32.mrf.mxu1  ;;  %2364 = vmatprep.mubr.f32.mxu1 %v1934_v6  ;;  %2520 = vmatmul.mubr.f32.gmra.mxu0 %v1845_v7  ;;  %v1817_v6 = vld [vmem:[#allocation3 + $0x160] sm:$0xff] }
 0x234   :  { %v2207_v49 = vadd.f32 %v6363_v45, %v6340_v29 }
 0x235   :  { %v2208_v11 = vpop.f32.mrf.mxu1  ;;  %v1590_v8 = vpop.permute.xlu1 %1589  ;;  %v1851_v9 = vld [vmem:[#allocation3 + $0x270] sm:$0xff] }
 0x236   :  { %v763_v57 = vpop.permute.xlu0 %762  ;;  %1681 = vst.msk [vmem:[#allocation3 + $0x298] sm:$0xff] %vm800_vm3, %v1590_v8  ;;  %2365 = vmatmul.mubr.f32.gmra.mxu1 %v1933_v37  ;;  %2524 = vmatprep.mubr.f32.mxu0 %v1851_v9  ;;  %v1943_v22 = vld [vmem:[#allocation3 + $0x550] sm:$0xff]  ;;  %v1822_v9 = vld [vmem:[#allocation3 + $0x188] sm:$0xff] }
 0x237   :  { %836 = vst.msk [vmem:[#allocation3 + $0x578] sm:$0xff] %vm800_vm3, %v763_v57  ;;  %v6344_v10 = vpop.f32.mrf.mxu1  ;;  %2369 = vmatprep.mubr.f32.mxu1 %v1939_v12 }
 0x238   :  { %v2212_v61 = vadd.f32 %v6363_v45, %v6344_v10  ;;  %v1827_v10 = vld [vmem:[#allocation3 + $0x1b0] sm:$0xff] }
 0x239   :  { %v2213_v43 = vpop.f32.mrf.mxu1  ;;  %v1302_v14 = vpop.permute.xlu1 %1301  ;;  %v1850_v62 = vld [vmem:[#allocation3 + $0x268] sm:$0xff] }
 0x23a   :  { %v1592_v13 = vpop.permute.xlu0 %1591  ;;  %1393 = vst.msk [vmem:[#allocation3 + $0x290] sm:$0xff] %vm800_vm3, %v1302_v14  ;;  %2370 = vmatmul.mubr.f32.gmra.mxu1 %v1938_v15  ;;  %2525 = vmatmul.mubr.f32.gmra.mxu0 %v1850_v62  ;;  %v1949_v26 = vld [vmem:[#allocation3 + $0x580] sm:$0xff]  ;;  %v1832_v62 = vld [vmem:[#allocation3 + $0x1d8] sm:$0xff] }
 0x23b   :  { %1682 = vst.msk [vmem:[#allocation3 + $0x2c0] sm:$0xff] %vm800_vm3, %v1592_v13  ;;  %v6348_v17 = vpop.f32.mrf.mxu1  ;;  %2374 = vmatprep.mubr.f32.mxu1 %v1944_v18  ;;  %v1837_v18 = vld [vmem:[#allocation3 + $0x200] sm:$0xff] }
 0x23d   :  { %v2218_v20 = vpop.f32.mrf.mxu1  ;;  %v1304_v4 = vpop.permute.xlu1 %1303  ;;  %v1856_v24 = vld [vmem:[#allocation3 + $0x298] sm:$0xff] }
 0x23e   :  { %v1594_v19 = vpop.permute.xlu0 %1593  ;;  %1394 = vst.msk [vmem:[#allocation3 + $0x2b8] sm:$0xff] %vm800_vm3, %v1304_v4  ;;  %2375 = vmatmul.mubr.f32.gmra.mxu1 %v1943_v22  ;;  %2529 = vmatprep.mubr.f32.mxu0 %v1856_v24  ;;  %v1948_v34 = vld [vmem:[#allocation3 + $0x578] sm:$0xff] }
 0x23f   :  { %1683 = vst.msk [vmem:[#allocation3 + $0x2e8] sm:$0xff] %vm800_vm3, %v1594_v19  ;;  %2379 = vmatprep.mubr.f32.mxu1 %v1949_v26 }
 0x241   :  { %v1306_v31 = vpop.permute.xlu1 %1305  ;;  %v1855_v30 = vld [vmem:[#allocation3 + $0x290] sm:$0xff] }
 0x242   :  { %v1596_v27 = vpop.permute.xlu0 %1595  ;;  %v1861_v23 = vld [vmem:[#allocation3 + $0x2c0] sm:$0xff]  ;;  %v6353_v32 = vpop.f32.mrf.mxu1  ;;  %1395 = vst.msk [vmem:[#allocation3 + $0x2e0] sm:$0xff] %vm800_vm3, %v1306_v31  ;;  %2380 = vmatmul.mubr.f32.gmra.mxu1 %v1948_v34  ;;  %2530 = vmatmul.mubr.f32.gmra.mxu0 %v1855_v30 }
 0x243   :  { %1684 = vst.msk [vmem:[#allocation3 + $0x310] sm:$0xff] %vm800_vm3, %v1596_v27  ;;  %2534 = vmatprep.mubr.f32.mxu0 %v1861_v23  ;;  %4992 = vmatprep.mubr.msk.f32.mxu1 %vm511_vm2, %v1777_v5  ;;  %v1842_v27 = vld [vmem:[#allocation3 + $0x228] sm:$0xff]  ;;  %v1847_v23 = vld [vmem:[#allocation3 + $0x250] sm:$0xff]  ;;  %v2217_v5 = vadd.f32 %v6363_v45, %v6348_v17 }
 0x244   :  { %v2223_v35 = vpop.f32.mrf.mxu1 }
 0x245   :  { %v1308_v44 = vpop.permute.xlu1 %1307  ;;  %v1860_v40 = vld [vmem:[#allocation3 + $0x2b8] sm:$0xff] }
 0x246   :  { %v1598_v36 = vpop.permute.xlu0 %1597  ;;  %v1866_v38 = vld [vmem:[#allocation3 + $0x2e8] sm:$0xff]  ;;  %v6358_v39 = vpop.f32.mrf.mxu1  ;;  %1396 = vst.msk [vmem:[#allocation3 + $0x308] sm:$0xff] %vm800_vm3, %v1308_v44  ;;  %2535 = vmatmul.mubr.f32.gmra.mxu0 %v1860_v40  ;;  %4993 = vmatmul.mubr.msk.f32.vlgmr.msra.gmra.mxu1 %vm511_vm2, %v1782_v41  ;;  %v1857_v40 = vld [vmem:[#allocation3 + $0x2a0] sm:$0xff] }
 0x247   :  { %1685 = vst.msk [vmem:[#allocation3 + $0x338] sm:$0xff] %vm800_vm3, %v1598_v36  ;;  %2539 = vmatprep.mubr.f32.mxu0 %v1866_v38  ;;  %4995 = vmatprep.mubr.msk.f32.mxu1 %vm511_vm2, %v1787_v53  ;;  %v1852_v38 = vld [vmem:[#allocation3 + $0x278] sm:$0xff] }
 0x248   :  { %v2228_v46 = vpop.f32.mrf.mxu1 }
 0x249   :  { %v1310_v63 = vpop.permute.xlu1 %1309  ;;  %v1865_v51 = vld [vmem:[#allocation3 + $0x2e0] sm:$0xff] }
 0x24a   :  { %v1600_v47 = vpop.permute.xlu0 %1599  ;;  %v1871_v48 = vld [vmem:[#allocation3 + $0x310] sm:$0xff]  ;;  %1397 = vst.msk [vmem:[#allocation3 + $0x330] sm:$0xff] %vm800_vm3, %v1310_v63  ;;  %2540 = vmatmul.mubr.f32.gmra.mxu0 %v1865_v51  ;;  %4996 = vmatmul.mubr.msk.f32.gmra.mxu1 %vm511_vm2, %v1792_v52  ;;  %v2222_v51 = vadd.f32 %v6363_v45, %v6353_v32 }
 0x24b   :  { %1686 = vst.msk [vmem:[#allocation3 + $0x360] sm:$0xff] %vm800_vm3, %v1600_v47  ;;  %v2451_v54 = vpop.f32.mrf.mxu0  ;;  %2544 = vmatprep.mubr.f32.mxu0 %v1871_v48  ;;  %4998 = vmatprep.mubr.msk.f32.mxu1 %vm511_vm2, %v1797_v55  ;;  %v1867_v63 = vld [vmem:[#allocation3 + $0x2f0] sm:$0xff] }
 0x24c   :  { %v6373_v25 = vadd.f32 %v2451_v54, %v2207_v49  ;;  %v1862_v49 = vld [vmem:[#allocation3 + $0x2c8] sm:$0xff] }
 0x24d   :  { %v2453_v56 = vpop.f32.mrf.mxu0  ;;  %v1312_v59 = vpop.permute.xlu1 %1311  ;;  %v1870_v1 = vld [vmem:[#allocation3 + $0x308] sm:$0xff] }
 0x24e   :  { %v1602_v50 = vpop.permute.xlu0 %1601  ;;  %v1876_v58 = vld [vmem:[#allocation3 + $0x338] sm:$0xff]  ;;  %1398 = vst.msk [vmem:[#allocation3 + $0x358] sm:$0xff] %vm800_vm3, %v1312_v59  ;;  %2545 = vmatmul.mubr.f32.gmra.mxu0 %v1870_v1  ;;  %4999 = vmatmul.mubr.msk.f32.gmra.mxu1 %vm511_vm2, %v1802_v16  ;;  %v1877_v1 = vld [vmem:[#allocation3 + $0x340] sm:$0xff] }
 0x24f   :  { %1687 = vst.msk [vmem:[#allocation3 + $0x388] sm:$0xff] %vm800_vm3, %v1602_v50  ;;  %2549 = vmatprep.mubr.f32.mxu0 %v1876_v58  ;;  %5001 = vmatprep.mubr.msk.f32.mxu1 %vm511_vm2, %v1807_v60  ;;  %v1872_v58 = vld [vmem:[#allocation3 + $0x318] sm:$0xff] }
 0x251   :  { %v1314_v0 = vpop.permute.xlu1 %1313  ;;  %v1875_v2 = vld [vmem:[#allocation3 + $0x330] sm:$0xff] }
 0x252   :  { %v1604_v28 = vpop.permute.xlu0 %1603  ;;  %v1881_v33 = vld [vmem:[#allocation3 + $0x360] sm:$0xff]  ;;  %v2456_v21 = vpop.f32.mrf.mxu0  ;;  %1399 = vst.msk [vmem:[#allocation3 + $0x380] sm:$0xff] %vm800_vm3, %v1314_v0  ;;  %2550 = vmatmul.mubr.f32.gmra.mxu0 %v1875_v2  ;;  %5002 = vmatmul.mubr.msk.f32.gmra.mxu1 %vm511_vm2, %v1812_v3  ;;  %v1887_v0 = vld [vmem:[#allocation3 + $0x390] sm:$0xff] }
 0x253   :  { %1688 = vst.msk [vmem:[#allocation3 + $0x3b0] sm:$0xff] %vm800_vm3, %v1604_v28  ;;  %v6384_v29 = vadd.f32 %v2456_v21, %v2212_v61  ;;  %2554 = vmatprep.mubr.f32.mxu0 %v1881_v33  ;;  %5004 = vmatprep.mubr.msk.f32.mxu1 %vm511_vm2, %v1817_v6  ;;  %v1882_v33 = vld [vmem:[#allocation3 + $0x368] sm:$0xff] }
 0x254   :  { %v2458_v7 = vpop.f32.mrf.mxu0 }
 0x255   :  { %v1316_v8 = vpop.permute.xlu1 %1315  ;;  %v1880_v37 = vld [vmem:[#allocation3 + $0x358] sm:$0xff] }
 0x256   :  { %v1606_v11 = vpop.permute.xlu0 %1605  ;;  %v1886_v57 = vld [vmem:[#allocation3 + $0x388] sm:$0xff]  ;;  %1400 = vst.msk [vmem:[#allocation3 + $0x3a8] sm:$0xff] %vm800_vm3, %v1316_v8  ;;  %2555 = vmatmul.mubr.f32.gmra.mxu0 %v1880_v37  ;;  %5005 = vmatmul.mubr.msk.f32.gmra.mxu1 %vm511_vm2, %v1822_v9 }
 0x257   :  { %1689 = vst.msk [vmem:[#allocation3 + $0x3d8] sm:$0xff] %vm800_vm3, %v1606_v11  ;;  %2559 = vmatprep.mubr.f32.mxu0 %v1886_v57  ;;  %5007 = vmatprep.mubr.msk.f32.mxu1 %vm511_vm2, %v1827_v10  ;;  %v1892_v11 = vld [vmem:[#allocation3 + $0x3b8] sm:$0xff]  ;;  %v1897_v57 = vld [vmem:[#allocation3 + $0x3e0] sm:$0xff] }
 0x259   :  { %v1318_v43 = vpop.permute.xlu1 %1317  ;;  %v1885_v15 = vld [vmem:[#allocation3 + $0x380] sm:$0xff] }
 0x25a   :  { %v1608_v12 = vpop.permute.xlu0 %1607  ;;  %v1891_v13 = vld [vmem:[#allocation3 + $0x3b0] sm:$0xff]  ;;  %v6393_v14 = vpop.f32.mrf.mxu1  ;;  %1401 = vst.msk [vmem:[#allocation3 + $0x3d0] sm:$0xff] %vm800_vm3, %v1318_v43  ;;  %2560 = vmatmul.mubr.f32.gmra.mxu0 %v1885_v15  ;;  %5008 = vmatmul.mubr.msk.f32.gmra.mxu1 %vm511_vm2, %v1832_v62 }
 0x25b   :  { %1690 = vst.msk [vmem:[#allocation3 + $0x400] sm:$0xff] %vm800_vm3, %v1608_v12  ;;  %2564 = vmatprep.mubr.f32.mxu0 %v1891_v13  ;;  %5010 = vmatprep.mubr.msk.f32.mxu1 %vm511_vm2, %v1837_v18  ;;  %v1902_v13 = vld [vmem:[#allocation3 + $0x408] sm:$0xff]  ;;  %v1907_v15 = vld [vmem:[#allocation3 + $0x430] sm:$0xff] }
 0x25c   :  { %v2233_v19 = vpop.f32.mrf.mxu1 }
 0x25d   :  { %v1320_v22 = vpop.permute.xlu1 %1319  ;;  %v1890_v26 = vld [vmem:[#allocation3 + $0x3a8] sm:$0xff]  ;;  %v2227_v19 = vadd.f32 %v6363_v45, %v6358_v39 }
 0x25e   :  { %v1610_v20 = vpop.permute.xlu0 %1609  ;;  %v1896_v4 = vld [vmem:[#allocation3 + $0x3d8] sm:$0xff]  ;;  %v6399_v24 = vpop.f32.mrf.mxu1  ;;  %1402 = vst.msk [vmem:[#allocation3 + $0x3f8] sm:$0xff] %vm800_vm3, %v1320_v22  ;;  %2565 = vmatmul.mubr.f32.gmra.mxu0 %v1890_v26  ;;  %5011 = vmatmul.mubr.msk.f32.gmra.mxu1 %vm511_vm2, %v1842_v27 }
 0x25f   :  { %1691 = vst.msk [vmem:[#allocation3 + $0x428] sm:$0xff] %vm800_vm3, %v1610_v20  ;;  %2569 = vmatprep.mubr.f32.mxu0 %v1896_v4  ;;  %5013 = vmatprep.mubr.msk.f32.mxu1 %vm511_vm2, %v1847_v23  ;;  %v1912_v26 = vld [vmem:[#allocation3 + $0x458] sm:$0xff]  ;;  %v1917_v23 = vld [vmem:[#allocation3 + $0x480] sm:$0xff] }
 0x260   :  { %v2238_v31 = vpop.f32.mrf.mxu1 }
 0x261   :  { %v1322_v35 = vpop.permute.xlu1 %1321  ;;  %v1895_v36 = vld [vmem:[#allocation3 + $0x3d0] sm:$0xff] }
 0x262   :  { %v1612_v34 = vpop.permute.xlu0 %1611  ;;  %v1901_v30 = vld [vmem:[#allocation3 + $0x400] sm:$0xff]  ;;  %1403 = vst.msk [vmem:[#allocation3 + $0x420] sm:$0xff] %vm800_vm3, %v1322_v35  ;;  %2570 = vmatmul.mubr.f32.gmra.mxu0 %v1895_v36  ;;  %5014 = vmatmul.mubr.msk.f32.gmra.mxu1 %vm511_vm2, %v1852_v38  ;;  %v1922_v35 = vld [vmem:[#allocation3 + $0x4a8] sm:$0xff]  ;;  %v1927_v38 = vld [vmem:[#allocation3 + $0x4d0] sm:$0xff] }
 0x263   :  { %1692 = vst.msk [vmem:[#allocation3 + $0x450] sm:$0xff] %vm800_vm3, %v1612_v34  ;;  %v2461_v44 = vpop.f32.mrf.mxu0  ;;  %2574 = vmatprep.mubr.f32.mxu0 %v1901_v30  ;;  %5016 = vmatprep.mubr.msk.f32.mxu1 %vm511_vm2, %v1857_v40 }
 0x264   :  { %v6409_v41 = vadd.f32 %v2461_v44, %v2217_v5  ;;  %v2232_v44 = vadd.f32 %v6363_v45, %v6393_v14 }
 0x265   :  { %v2463_v46 = vpop.f32.mrf.mxu0  ;;  %v1324_v47 = vpop.permute.xlu1 %1323  ;;  %v1900_v48 = vld [vmem:[#allocation3 + $0x3f8] sm:$0xff] }
 0x266   :  { %v1614_v53 = vpop.permute.xlu0 %1613  ;;  %v1906_v17 = vld [vmem:[#allocation3 + $0x428] sm:$0xff]  ;;  %1404 = vst.msk [vmem:[#allocation3 + $0x448] sm:$0xff] %vm800_vm3, %v1324_v47  ;;  %2575 = vmatmul.mubr.f32.gmra.mxu0 %v1900_v48  ;;  %5017 = vmatmul.mubr.msk.f32.gmra.mxu1 %vm511_vm2, %v1862_v49  ;;  %v1937_v49 = vld [vmem:[#allocation3 + $0x520] sm:$0xff] }
 0x267   :  { %1693 = vst.msk [vmem:[#allocation3 + $0x478] sm:$0xff] %vm800_vm3, %v1614_v53  ;;  %2579 = vmatprep.mubr.f32.mxu0 %v1906_v17  ;;  %5019 = vmatprep.mubr.msk.f32.mxu1 %vm511_vm2, %v1867_v63  ;;  %v1932_v17 = vld [vmem:[#allocation3 + $0x4f8] sm:$0xff] }
 0x269   :  { %v1326_v55 = vpop.permute.xlu1 %1325  ;;  %v1905_v56 = vld [vmem:[#allocation3 + $0x420] sm:$0xff] }
 0x26a   :  { %v1616_v52 = vpop.permute.xlu0 %1615  ;;  %v1911_v54 = vld [vmem:[#allocation3 + $0x450] sm:$0xff]  ;;  %v2466_v50 = vpop.f32.mrf.mxu0  ;;  %1405 = vst.msk [vmem:[#allocation3 + $0x470] sm:$0xff] %vm800_vm3, %v1326_v55  ;;  %2580 = vmatmul.mubr.f32.gmra.mxu0 %v1905_v56  ;;  %5020 = vmatmul.mubr.msk.f32.gmra.mxu1 %vm511_vm2, %v1872_v58  ;;  %v1952_v56 = vld [vmem:[#allocation3 + $0x598] sm:$0xff] }
 0x26b   :  { %1694 = vst.msk [vmem:[#allocation3 + $0x4a0] sm:$0xff] %vm800_vm3, %v1616_v52  ;;  %v6420_v59 = vadd.f32 %v2466_v50, %v2222_v51  ;;  %2584 = vmatprep.mubr.f32.mxu0 %v1911_v54  ;;  %5022 = vmatprep.mubr.msk.f32.mxu1 %vm511_vm2, %v1877_v1  ;;  %v1942_v54 = vld [vmem:[#allocation3 + $0x548] sm:$0xff]  ;;  %v1947_v50 = vld [vmem:[#allocation3 + $0x570] sm:$0xff] }
 0x26c   :  { %v2468_v32 = vpop.f32.mrf.mxu0 }
 0x26d   :  { %v1328_v61 = vpop.permute.xlu1 %1327  ;;  %v1910_v28 = vld [vmem:[#allocation3 + $0x448] sm:$0xff] }
 0x26e   :  { %v1618_v16 = vpop.permute.xlu0 %1617  ;;  %v1916_v60 = vld [vmem:[#allocation3 + $0x478] sm:$0xff]  ;;  %1406 = vst.msk [vmem:[#allocation3 + $0x498] sm:$0xff] %vm800_vm3, %v1328_v61  ;;  %2585 = vmatmul.mubr.f32.gmra.mxu0 %v1910_v28  ;;  %5023 = vmatmul.mubr.msk.f32.gmra.mxu1 %vm511_vm2, %v1882_v33  ;;  %v2237_v33 = vadd.f32 %v6363_v45, %v6399_v24 }
 0x26f   :  { %1695 = vst.msk [vmem:[#allocation3 + $0x4c8] sm:$0xff] %vm800_vm3, %v1618_v16  ;;  %2589 = vmatprep.mubr.f32.mxu0 %v1916_v60  ;;  %5025 = vmatprep.mubr.msk.f32.mxu1 %vm511_vm2, %v1887_v0 }
 0x271   :  { %v1330_v3 = vpop.permute.xlu1 %1329  ;;  %v1915_v7 = vld [vmem:[#allocation3 + $0x470] sm:$0xff] }
 0x272   :  { %v1620_v21 = vpop.permute.xlu0 %1619  ;;  %v1921_v2 = vld [vmem:[#allocation3 + $0x4a0] sm:$0xff]  ;;  %v6429_v6 = vpop.f32.mrf.mxu1  ;;  %1407 = vst.msk [vmem:[#allocation3 + $0x4c0] sm:$0xff] %vm800_vm3, %v1330_v3  ;;  %2590 = vmatmul.mubr.f32.gmra.mxu0 %v1915_v7  ;;  %5026 = vmatmul.mubr.msk.f32.gmra.mxu1 %vm511_vm2, %v1892_v11 }
 0x273   :  { %1696 = vst.msk [vmem:[#allocation3 + $0x4f0] sm:$0xff] %vm800_vm3, %v1620_v21  ;;  %2594 = vmatprep.mubr.f32.mxu0 %v1921_v2  ;;  %5028 = vmatprep.mubr.msk.f32.mxu1 %vm511_vm2, %v1897_v57  ;;  %v2242_v3 = vadd.f32 %v6363_v45, %v6429_v6 }
 0x274   :  { %v2243_v8 = vpop.f32.mrf.mxu1 }
 0x275   :  { %v1332_v10 = vpop.permute.xlu1 %1331  ;;  %v1920_v12 = vld [vmem:[#allocation3 + $0x498] sm:$0xff] }
 0x276   :  { %v1926_v37 = vld [vmem:[#allocation3 + $0x4c8] sm:$0xff]  ;;  %v1622_v9 = vpop.permute.xlu0 %1621  ;;  %1408 = vst.msk [vmem:[#allocation3 + $0x4e8] sm:$0xff] %vm800_vm3, %v1332_v10  ;;  %v6436_v43 = vpop.f32.mrf.mxu1  ;;  %2595 = vmatmul.mubr.f32.gmra.mxu0 %v1920_v12  ;;  %5029 = vmatmul.mubr.msk.f32.gmra.mxu1 %vm511_vm2, %v1902_v13 }
 0x277   :  { %1697 = vst.msk [vmem:[#allocation3 + $0x518] sm:$0xff] %vm800_vm3, %v1622_v9  ;;  %2599 = vmatprep.mubr.f32.mxu0 %v1926_v37  ;;  %5031 = vmatprep.mubr.msk.f32.mxu1 %vm511_vm2, %v1907_v15 }
 0x278   :  { %v2248_v62 = vpop.f32.mrf.mxu1 }
 0x279   :  { %v1334_v4 = vpop.permute.xlu1 %1333  ;;  %v1925_v22 = vld [vmem:[#allocation3 + $0x4c0] sm:$0xff] }
 0x27a   :  { %v1931_v18 = vld [vmem:[#allocation3 + $0x4f0] sm:$0xff]  ;;  %v1624_v20 = vpop.permute.xlu0 %1623  ;;  %1409 = vst.msk [vmem:[#allocation3 + $0x510] sm:$0xff] %vm800_vm3, %v1334_v4  ;;  %2600 = vmatmul.mubr.f32.gmra.mxu0 %v1925_v22  ;;  %5032 = vmatmul.mubr.msk.f32.gmra.mxu1 %vm511_vm2, %v1912_v26 }
 0x27b   :  { %1698 = vst.msk [vmem:[#allocation3 + $0x540] sm:$0xff] %vm800_vm3, %v1624_v20  ;;  %v2471_v27 = vpop.f32.mrf.mxu0  ;;  %2604 = vmatprep.mubr.f32.mxu0 %v1931_v18  ;;  %5034 = vmatprep.mubr.msk.f32.mxu1 %vm511_vm2, %v1917_v23 }
 0x27c   :  { %v6445_v31 = vadd.f32 %v2471_v27, %v2227_v19  ;;  %v2247_v27 = vadd.f32 %v6363_v45, %v6436_v43 }
 0x27d   :  { %v2473_v34 = vpop.f32.mrf.mxu0  ;;  %v1336_v30 = vpop.permute.xlu1 %1335  ;;  %v1930_v5 = vld [vmem:[#allocation3 + $0x4e8] sm:$0xff] }
 0x27e   :  { %v1626_v39 = vpop.permute.xlu0 %1625  ;;  %v1936_v36 = vld [vmem:[#allocation3 + $0x518] sm:$0xff]  ;;  %1410 = vst.msk [vmem:[#allocation3 + $0x538] sm:$0xff] %vm800_vm3, %v1336_v30  ;;  %2605 = vmatmul.mubr.f32.gmra.mxu0 %v1930_v5  ;;  %5035 = vmatmul.mubr.msk.f32.gmra.mxu1 %vm511_vm2, %v1922_v35 }
 0x27f   :  { %1699 = vst.msk [vmem:[#allocation3 + $0x568] sm:$0xff] %vm800_vm3, %v1626_v39  ;;  %2609 = vmatprep.mubr.f32.mxu0 %v1936_v36  ;;  %5037 = vmatprep.mubr.msk.f32.mxu1 %vm511_vm2, %v1927_v38  ;;  %v3289_v30 = vld [vmem:[#allocation6 + $0x2] sm:$0xff] }
 0x280   :  { %v3693_v5 = vld [vmem:[%s7449_s5 + $0x238] sm:$0xff]  ;;  %3307 = vrot.lane.b32.xlu1 %v3289_v30, %s5209_s25 }
 0x281   :  { %v1338_v40 = vpop.permute.xlu1 %1337  ;;  %v1935_v46 = vld [vmem:[#allocation3 + $0x510] sm:$0xff]  ;;  %5047 = vmatpush3.msra.mxu1 %v3693_v5  ;;  %v3650_v5 = vld [vmem:[%s7449_s5 + $0xe0] sm:$0xff] }
 0x282   :  { %v2476_v53 = vpop.f32.mrf.mxu0  ;;  %v1941_v47 = vld [vmem:[#allocation3 + $0x540] sm:$0xff]  ;;  %1411 = vst.msk [vmem:[#allocation3 + $0x560] sm:$0xff] %vm800_vm3, %v1338_v40  ;;  %2610 = vmatmul.mubr.f32.gmra.mxu0 %v1935_v46  ;;  %5038 = vmatmul.mubr.msk.f32.gmra.mxu1 %vm511_vm2, %v1932_v17  ;;  %v1628_v63 = vpop.permute.xlu0 %1627  ;;  %v3361_v40 = vld [vmem:[#allocation6 + $0x7] sm:$0xff] }
 0x283   :  { %v6455_v48 = vadd.f32 %v2476_v53, %v2232_v44  ;;  %2614 = vmatprep.mubr.f32.mxu0 %v1941_v47  ;;  %5040 = vmatprep.mubr.msk.f32.mxu1 %vm511_vm2, %v1937_v49  ;;  %1700 = vst.msk [vmem:[#allocation3 + $0x590] sm:$0xff] %vm800_vm3, %v1628_v63  ;;  %v3692_v44 = vld [vmem:[%s7449_s5 + $0x230] sm:$0xff]  ;;  %v3691_v53 = vld [vmem:[%s7449_s5 + $0x228] sm:$0xff] }
 0x284   :  { %v2478_v14 = vpop.f32.mrf.mxu0  ;;  %5048 = vmatprep.subr.mxu1 %v5210_v42  ;;  %3379 = vrot.lane.b32.xlu0 %v3361_v40, %s5209_s25  ;;  %v3633_v40 = vld [vmem:[%s7449_s5 + $0x58] sm:$0xff] }
 0x285   :  { %v1340_v51 = vpop.permute.xlu1 %1339  ;;  %v1940_v52 = vld [vmem:[#allocation3 + $0x538] sm:$0xff]  ;;  %5049 = vmatpush3.msra.mxu1 %v3692_v44 }
 0x286   :  { %v1946_v55 = vld [vmem:[#allocation3 + $0x568] sm:$0xff]  ;;  %1412 = vst.msk [vmem:[#allocation3 + $0x588] sm:$0xff] %vm800_vm3, %v1340_v51  ;;  %2615 = vmatmul.mubr.f32.gmra.mxu0 %v1940_v52  ;;  %5041 = vmatmul.mubr.msk.f32.gmra.mxu1 %vm511_vm2, %v1942_v54  ;;  %v3653_v51 = vld [vmem:[%s7449_s5 + $0xf8] sm:$0xff]  ;;  %v3690_v52 = vld [vmem:[%s7449_s5 + $0x220] sm:$0xff] }
 0x287   :  { %2619 = vmatprep.mubr.f32.mxu0 %v1946_v55  ;;  %5043 = vmatprep.mubr.msk.f32.mxu1 %vm511_vm2, %v1947_v50  ;;  %v3637_v54 = vld [vmem:[%s7449_s5 + $0x78] sm:$0xff] }
 0x288   :  { %5050 = vmatprep.subr.mxu1 %v5210_v42  ;;  %4690 = vmatprep.subr.mxu0 %v3653_v51  ;;  %v3689_v55 = vld [vmem:[%s7449_s5 + $0x218] sm:$0xff] }
 0x289   :  { %v1945_v1 = vld [vmem:[#allocation3 + $0x560] sm:$0xff]  ;;  %5051 = vmatpush3.msra.mxu1 %v3691_v53  ;;  %4691 = vmatpush3.msra.mxu0 %v3637_v54  ;;  %v3649_v44 = vld [vmem:[%s7449_s5 + $0xd8] sm:$0xff]  ;;  %v3648_v53 = vld [vmem:[%s7449_s5 + $0xd0] sm:$0xff] }
 0x28a   :  { %v2251_v58 = vpop.f32.mrf.mxu1  ;;  %2620 = vmatmul.mubr.f32.gmra.mxu0 %v1945_v1  ;;  %5044 = vmatmul.mubr.msk.f32.gmra.mxu1 %vm511_vm2, %v1952_v56  ;;  %v1951_v32 = vld [vmem:[#allocation3 + $0x590] sm:$0xff]  ;;  %v3687_v1 = vld [vmem:[%s7449_s5 + $0x208] sm:$0xff] }
 0x28b   :  { %2624 = vmatprep.mubr.f32.mxu0 %v1951_v32  ;;  %v2252_v46 = vadd.f32 %v6363_v45, %v2251_v58  ;;  %5052 = vmatprep.subr.mxu1 %v5210_v42  ;;  %v3688_v58 = vld [vmem:[%s7449_s5 + $0x210] sm:$0xff] }
 0x28c   :  { %v2253_v16 = vpop.f32.mrf.mxu1  ;;  %5053 = vmatpush3.msra.mxu1 %v3690_v52  ;;  %5062 = vmatprep.mubr.msk.f32.mxu1 %vm5211_vm4, %v5210_v42 }
 0x28d   :  { %v1950_v61 = vld [vmem:[#allocation3 + $0x588] sm:$0xff]  ;;  %5054 = vmatprep.subr.mxu1 %v5210_v42 }
 0x28e   :  { %v6464_v60 = vpop.f32.mrf.mxu1  ;;  %2625 = vmatmul.mubr.f32.gmra.mxu0 %v1950_v61  ;;  %5055 = vmatpush3.msra.mxu1 %v3689_v55 }
 0x28f   :  { %5056 = vmatprep.subr.mxu1 %v5210_v42  ;;  %v2257_v32 = vadd.f32 %v6363_v45, %v6464_v60  ;;  %v3636_v60 = vld [vmem:[%s7449_s5 + $0x70] sm:$0xff] }
 0x290   :  { %v2258_v28 = vpop.f32.mrf.mxu1  ;;  %5057 = vmatpush3.msra.mxu1 %v3688_v58  ;;  %v3631_v58 = vld [vmem:[%s7449_s5 + $0x48] sm:$0xff] }
 0x291   :  { %5058 = vmatprep.subr.mxu1 %v5210_v42 }
 0x292   :  { %5059 = vmatpush3.msra.mxu1 %v3687_v1 }
 0x293   :  { %v2481_v0 = vpop.f32.mrf.mxu0  ;;  %5060 = vmatprep.subr.mxu1 %v5210_v42 }
 0x294   :  { %v6468_v21 = vadd.f32 %v2481_v0, %v2237_v33  ;;  %v3686_v33 = vld [vmem:[%s7449_s5 + $0x200] sm:$0xff]  ;;  %v3652_v0 = vld [vmem:[%s7449_s5 + $0xf0] sm:$0xff] }
 0x295   :  { %v2483_v2 = vpop.f32.mrf.mxu0  ;;  %5061 = vmatpush3.msra.mxu1 %v3686_v33  ;;  %4692 = vmatprep.subr.mxu0 %v3652_v0 }
 0x296   :  { %4693 = vmatpush3.msra.mxu0 %v3636_v60 }
 0x29a   :  { %v2486_v7 = vpop.f32.mrf.mxu0 }
 0x29b   :  { %v6472_v11 = vadd.f32 %v2486_v7, %v2242_v3 }
 0x29c   :  { %v2488_v57 = vpop.f32.mrf.mxu0 }
 0x29e   :  { %v6474_v8 = vpop.f32.mrf.mxu1 }
 0x2a0   :  { %v2263_v37 = vpop.f32.mrf.mxu1 }
 0x2a2   :  { %v6476_v9 = vpop.f32.mrf.mxu1 }
 0x2a4   :  { %v2268_v10 = vpop.f32.mrf.mxu1 }
 0x2aa   :  { %v6478_v12 = vpop.f32.mrf.mxu1 }
 0x2ac   :  { %v2273_v24 = vpop.f32.mrf.mxu1 }
 0x2ad   :  { %v6564_v24 = vld [vmem:[#allocation6 + $0x27] sm:$0xff] }
 0x2ae   :  { %v6480_v13 = vpop.f32.mrf.mxu1  ;;  %3571 = vst.msk [vmem:[#allocation7 + $0x98] sm:$0xff] %vm511_vm2, %v6564_v24 }
 0x2b0   :  { %v2278_v15 = vpop.f32.mrf.mxu1 }
 0x2b1   :  { %v3651_v15 = vld [vmem:[%s7449_s5 + $0xe8] sm:$0xff] }
 0x2b2   :  { %v6482_v62 = vpop.f32.mrf.mxu1  ;;  %4694 = vmatprep.subr.mxu0 %v3651_v15 }
 0x2b4   :  { %v2283_v18 = vpop.f32.mrf.mxu1 }
 0x2b5   :  { %v3635_v18 = vld [vmem:[%s7449_s5 + $0x68] sm:$0xff] }
 0x2b6   :  { %v6484_v6 = vpop.f32.mrf.mxu1  ;;  %4695 = vmatpush3.msra.mxu0 %v3635_v18 }
 0x2b7   :  { %4696 = vmatprep.subr.mxu0 %v3650_v5  ;;  %v6630_v5 = vld [vmem:[#allocation6 + $0x29] sm:$0xff] }
 0x2b8   :  { %v2288_v19 = vpop.f32.mrf.mxu1  ;;  %3285 = vst.msk [vmem:[#allocation7 + $0xc8] sm:$0xff] %vm511_vm2, %v6630_v5 }
 0x2ba   :  { %v6486_v20 = vpop.f32.mrf.mxu1 }
 0x2bc   :  { %v2293_v4 = vpop.f32.mrf.mxu1 }
 0x2be   :  { %v6488_v22 = vpop.f32.mrf.mxu1 }
 0x2c0   :  { %v2298_v26 = vpop.f32.mrf.mxu1 }
 0x2c2   :  { %v6492_v23 = vpop.f32.mrf.mxu1  ;;  %v2491_v34 = vpop.f32.mrf.mxu0 }
 0x2c3   :  { %v6494_v39 = vadd.f32 %v2491_v34, %v2247_v27 }
 0x2c4   :  { %v2303_v35 = vpop.f32.mrf.mxu1  ;;  %v2493_v36 = vpop.f32.mrf.mxu0 }
 0x2c5   :  { %v3634_v35 = vld [vmem:[%s7449_s5 + $0x60] sm:$0xff] }
 0x2c6   :  { %v6501_v38 = vpop.f32.mrf.mxu1  ;;  %4697 = vmatpush3.msra.mxu0 %v3634_v35 }
 0x2c7   :  { %4698 = vmatprep.subr.mxu0 %v3649_v44 }
 0x2c8   :  { %v2308_v43 = vpop.f32.mrf.mxu1  ;;  %4699 = vmatpush3.msra.mxu0 %v3633_v40 }
 0x2c9   :  { %4700 = vmatprep.subr.mxu0 %v3648_v53 }
 0x2ca   :  { %v6511_v17 = vpop.f32.mrf.mxu1  ;;  %v2496_v47 = vpop.f32.mrf.mxu0 }
 0x2cb   :  { %v6514_v49 = vadd.f32 %v2496_v47, %v2252_v46 }
 0x2cc   :  { %v2313_v63 = vpop.f32.mrf.mxu1  ;;  %v2498_v14 = vpop.f32.mrf.mxu0 }
 0x2cd   :  { %v3632_v63 = vld [vmem:[%s7449_s5 + $0x50] sm:$0xff] }
 0x2ce   :  { %v6529_v50 = vpop.f32.mrf.mxu1  ;;  %4701 = vmatpush3.msra.mxu0 %v3632_v63 }
 0x2d0   :  { %v2318_v56 = vpop.f32.mrf.mxu1 }
 0x2d1   :  { %v3647_v56 = vld [vmem:[%s7449_s5 + $0xc8] sm:$0xff] }
 0x2d2   :  { %v6541_v16 = vpop.f32.mrf.mxu1  ;;  %v2501_v61 = vpop.f32.mrf.mxu0  ;;  %4702 = vmatprep.subr.mxu0 %v3647_v56 }
 0x2d3   :  { %v6544_v28 = vadd.f32 %v2501_v61, %v2257_v32  ;;  %4703 = vmatpush3.msra.mxu0 %v3631_v58 }
 0x2d4   :  { %v2323_v2 = vpop.f32.mrf.mxu1  ;;  %v2503_v3 = vpop.f32.mrf.mxu0 }
 0x2d5   :  { %v3646_v3 = vld [vmem:[%s7449_s5 + $0xc0] sm:$0xff] }
 0x2d6   :  { %v6558_v7 = vpop.f32.mrf.mxu1  ;;  %4704 = vmatprep.subr.mxu0 %v3646_v3 }
 0x2d8   :  { %v2328_v57 = vpop.f32.mrf.mxu1 }
 0x2d9   :  { %v3630_v57 = vld [vmem:[%s7449_s5 + $0x40] sm:$0xff] }
 0x2da   :  { %v6560_v37 = vpop.f32.mrf.mxu1  ;;  %v6562_v10 = vpop.f32.mrf.mxu0  ;;  %4705 = vmatpush3.msra.mxu0 %v3630_v57 }
 0x2dc   :  { %v2333_v19 = vpop.f32.mrf.mxu1  ;;  %v2508_v4 = vpop.f32.mrf.mxu0 }
 0x2de   :  { %v6574_v26 = vpop.f32.mrf.mxu1 }
 0x2e0   :  { %v2338_v27 = vpop.f32.mrf.mxu1 }
 0x2e2   :  { %v6576_v34 = vpop.f32.mrf.mxu1  ;;  %v6578_v30 = vpop.f32.mrf.mxu0 }
 0x2e4   :  { %v2343_v36 = vpop.f32.mrf.mxu1  ;;  %v2513_v43 = vpop.f32.mrf.mxu0 }
 0x2e5   :  { %v3645_v36 = vld [vmem:[%s7449_s5 + $0xb8] sm:$0xff] }
 0x2e6   :  { %v6595_v46 = vpop.f32.mrf.mxu1  ;;  %v3629_v43 = vld [vmem:[%s7449_s5 + $0x38] sm:$0xff]  ;;  %4706 = vmatprep.subr.mxu0 %v3645_v36 }
 0x2e7   :  { %4707 = vmatpush3.msra.mxu0 %v3629_v43 }
 0x2e8   :  { %v2348_v47 = vpop.f32.mrf.mxu1 }
 0x2ea   :  { %v6600_v14 = vpop.f32.mrf.mxu1  ;;  %v6602_v51 = vpop.f32.mrf.mxu0 }
 0x2ec   :  { %v2353_v52 = vpop.f32.mrf.mxu1  ;;  %v2518_v54 = vpop.f32.mrf.mxu0 }
 0x2ee   :  { %v6604_v55 = vpop.f32.mrf.mxu1 }
 0x2f0   :  { %v2358_v1 = vpop.f32.mrf.mxu1 }
 0x2f1   :  { %v3644_v1 = vld [vmem:[%s7449_s5 + $0xb0] sm:$0xff] }
 0x2f2   :  { %v6612_v32 = vpop.f32.mrf.mxu1  ;;  %4708 = vmatprep.subr.mxu0 %v3644_v1 }
 0x2f3   :  { %v6614_v61 = vpop.f32.mrf.mxu0 }
 0x2f4   :  { %v2363_v33 = vpop.f32.mrf.mxu1 }
 0x2f5   :  { %v2523_v0 = vpop.f32.mrf.mxu0 }
 0x2f6   :  { %v6616_v60 = vpop.f32.mrf.mxu1 }
 0x2f8   :  { %v2368_v2 = vpop.f32.mrf.mxu1 }
 0x2fa   :  { %v6624_v15 = vpop.f32.mrf.mxu1  ;;  %v6626_v18 = vpop.f32.mrf.mxu0 }
 0x2fc   :  { %v2373_v19 = vpop.f32.mrf.mxu1  ;;  %v2528_v4 = vpop.f32.mrf.mxu0 }
 0x2fe   :  { %v6628_v27 = vpop.f32.mrf.mxu1 }
 0x300   :  { %v2378_v35 = vpop.f32.mrf.mxu1 }
 0x301   :  { %v3628_v35 = vld [vmem:[%s7449_s5 + $0x30] sm:$0xff] }
 0x302   :  { %v6640_v44 = vpop.f32.mrf.mxu1  ;;  %v6642_v40 = vpop.f32.mrf.mxu0  ;;  %4709 = vmatpush3.msra.mxu0 %v3628_v35  ;;  %v3271_v35 = vld [vmem:[#allocation6 + $0x1] sm:$0xff] }
 0x303   :  { %3280 = vst.msk [vmem:[#allocation7] sm:$0xff] %vm511_vm2, %v3271_v35 }
 0x304   :  { %v2383_v53 = vpop.f32.mrf.mxu1  ;;  %v2533_v47 = vpop.f32.mrf.mxu0 }
 0x306   :  { %v6644_v63 = vpop.f32.mrf.mxu0  ;;  %v4994_v52 = vpop.f32.mrf.mxu1 }
 0x307   :  { %v2702_v54 = vadd.f32 %v4994_v52, %v6384_v29 }
 0x308   :  { %v2538_v56 = vpop.f32.mrf.mxu0  ;;  %v2696_v58 = vpop.f32.mrf.mxu1 }
 0x309   :  { %v2876_v33 = vmax.f32 %v2702_v54, 0.0  ;;  %v2697_v0 = vadd.f32 %v2696_v58, %v6373_v25 }
 0x30a   :  { %v6651_v2 = vpop.f32.mrf.mxu0  ;;  %v4997_v3 = vpop.f32.mrf.mxu1 }
 0x30b   :  { %2912 = vst.msk [vmem:[#allocation4 + $0x8] sm:$0xff] %vm511_vm2, %v2876_v33  ;;  %v2875_v57 = vmax.f32 %v2697_v0, 0.0  ;;  %v2712_v19 = vadd.f32 %v4997_v3, %v6420_v59  ;;  %v3643_v3 = vld [vmem:[%s7449_s5 + $0xa8] sm:$0xff] }
 0x30c   :  { %v2543_v4 = vpop.f32.mrf.mxu0  ;;  %v2706_v29 = vpop.f32.mrf.mxu1  ;;  %4710 = vmatprep.subr.mxu0 %v3643_v3 }
 0x30d   :  { %2911 = vst.msk [vmem:[#allocation4] sm:$0xff] %vm511_vm2, %v2875_v57  ;;  %v2878_v36 = vmax.f32 %v2712_v19, 0.0  ;;  %v2707_v25 = vadd.f32 %v2706_v29, %v6409_v41  ;;  %v3626_v29 = vld [vmem:[%s7449_s5 + $0x20] sm:$0xff] }
 0x30e   :  { %v6660_v43 = vpop.f32.mrf.mxu0  ;;  %v5000_v53 = vpop.f32.mrf.mxu1 }
 0x30f   :  { %2914 = vst.msk [vmem:[#allocation4 + $0x18] sm:$0xff] %vm511_vm2, %v2878_v36  ;;  %v2877_v47 = vmax.f32 %v2707_v25, 0.0  ;;  %v2722_v59 = vadd.f32 %v5000_v53, %v6455_v48  ;;  %v3627_v48 = vld [vmem:[%s7449_s5 + $0x28] sm:$0xff]  ;;  %v3641_v36 = vld [vmem:[%s7449_s5 + $0x98] sm:$0xff] }
 0x310   :  { %v2548_v52 = vpop.f32.mrf.mxu0  ;;  %v2716_v54 = vpop.f32.mrf.mxu1  ;;  %4711 = vmatpush3.msra.mxu0 %v3627_v48 }
 0x311   :  { %2913 = vst.msk [vmem:[#allocation4 + $0x10] sm:$0xff] %vm511_vm2, %v2877_v47  ;;  %v2880_v56 = vmax.f32 %v2722_v59, 0.0  ;;  %v2717_v58 = vadd.f32 %v2716_v54, %v6445_v31  ;;  %v3642_v31 = vld [vmem:[%s7449_s5 + $0xa0] sm:$0xff]  ;;  %v3343_v47 = vld [vmem:[#allocation6 + $0x3] sm:$0xff]  ;;  %v2262_v59 = vadd.f32 %v6363_v45, %v6474_v8 }
 0x312   :  { %v6666_v1 = vpop.f32.mrf.mxu0  ;;  %v5003_v33 = vpop.f32.mrf.mxu1  ;;  %4712 = vmatprep.subr.mxu0 %v3642_v31  ;;  %3352 = vst.msk [vmem:[#allocation7 + $0x8] sm:$0xff] %vm511_vm2, %v3343_v47 }
 0x313   :  { %2916 = vst.msk [vmem:[#allocation4 + $0x28] sm:$0xff] %vm511_vm2, %v2880_v56  ;;  %v2879_v41 = vmax.f32 %v2717_v58, 0.0  ;;  %v2732_v0 = vadd.f32 %v5003_v33, %v6472_v11  ;;  %4713 = vmatpush3.msra.mxu0 %v3626_v29  ;;  %v2507_v33 = vadd.f32 %v6562_v10, %v2262_v59  ;;  %v2282_v59 = vadd.f32 %v6363_v45, %v6482_v62 }
 0x314   :  { %v2553_v57 = vpop.f32.mrf.mxu0  ;;  %v2726_v19 = vpop.f32.mrf.mxu1  ;;  %4714 = vmatprep.subr.mxu0 %v3641_v36  ;;  %v2267_v36 = vadd.f32 %v6363_v45, %v6476_v9 }
 0x315   :  { %2915 = vst.msk [vmem:[#allocation4 + $0x20] sm:$0xff] %vm511_vm2, %v2879_v41  ;;  %v2882_v4 = vmax.f32 %v2732_v0, 0.0  ;;  %v2727_v11 = vadd.f32 %v2726_v19, %v6468_v21  ;;  %v3625_v21 = vld [vmem:[%s7449_s5 + $0x18] sm:$0xff] }
 0x316   :  { %v6687_v25 = vpop.f32.mrf.mxu0  ;;  %v5006_v53 = vpop.f32.mrf.mxu1  ;;  %4715 = vmatpush3.msra.mxu0 %v3625_v21  ;;  %v2950_v19 = vld [vmem:[#allocation4 + $0x18] sm:$0xff] }
 0x317   :  { %2918 = vst.msk [vmem:[#allocation4 + $0x38] sm:$0xff] %vm511_vm2, %v2882_v4  ;;  %v2881_v52 = vmax.f32 %v2727_v11, 0.0  ;;  %v2742_v54 = vadd.f32 %v5006_v53, %v6514_v49  ;;  %v2272_v49 = vadd.f32 %v6363_v45, %v6478_v12  ;;  %v6721_v45 = vld [vmem:[%s7448_s4] ss:$0 sm:$0xff] }
 0x318   :  { %v2558_v56 = vpop.f32.mrf.mxu0  ;;  %v2736_v58 = vpop.f32.mrf.mxu1  ;;  %v2277_v62 = vadd.f32 %v6721_v45, %v6480_v13  ;;  %v2287_v13 = vadd.f32 %v6721_v45, %v6484_v6 }
 0x319   :  { %2917 = vst.msk [vmem:[#allocation4 + $0x30] sm:$0xff] %vm511_vm2, %v2881_v52  ;;  %v2884_v41 = vmax.f32 %v2742_v54, 0.0  ;;  %v2737_v0 = vadd.f32 %v2736_v58, %v6494_v39  ;;  %v2517_v11 = vadd.f32 %v6602_v51, %v2272_v49  ;;  %v2512_v58 = vadd.f32 %v6578_v30, %v2267_v36 }
 0x31a   :  { %v6701_v8 = vpop.f32.mrf.mxu0  ;;  %v5009_v3 = vpop.f32.mrf.mxu1 }
 0x31b   :  { %2920 = vst.msk [vmem:[#allocation4 + $0x48] sm:$0xff] %vm511_vm2, %v2884_v41  ;;  %v2883_v48 = vmax.f32 %v2737_v0, 0.0  ;;  %v2752_v57 = vadd.f32 %v5009_v3, %v2507_v33  ;;  %v2527_v0 = vadd.f32 %v6626_v18, %v2282_v59 }
 0x31c   :  { %v2986_v31 = vld [vmem:[#allocation4 + $0x19] sm:$0xff]  ;;  %v2563_v4 = vpop.f32.mrf.mxu0  ;;  %v2746_v10 = vpop.f32.mrf.mxu1  ;;  %v3058_v35 = vld [vmem:[#allocation4 + $0x24] sm:$0xff] }
 0x31d   :  { %v3022_v29 = vmax.f32 %v2950_v19, %v2986_v31  ;;  %2919 = vst.msk [vmem:[#allocation4 + $0x40] sm:$0xff] %vm511_vm2, %v2883_v48  ;;  %v2886_v39 = vmax.f32 %v2752_v57, 0.0  ;;  %v3094_v53 = vld [vmem:[#allocation4 + $0x25] sm:$0xff]  ;;  %v2747_v12 = vadd.f32 %v2746_v10, %v6544_v28  ;;  %v2292_v4 = vadd.f32 %v6721_v45, %v6486_v20 }
 0x31e   :  { %v6711_v21 = vpop.f32.mrf.mxu0  ;;  %v5012_v47 = vpop.f32.mrf.mxu1  ;;  %v2951_v52 = vld [vmem:[#allocation4 + $0x20] sm:$0xff]  ;;  %v3130_v51 = vmax.f32 %v3058_v35, %v3094_v53  ;;  %v2522_v35 = vadd.f32 %v6614_v61, %v2277_v62 }
 0x31f   :  { %v2987_v54 = vld [vmem:[#allocation4 + $0x21] sm:$0xff]  ;;  %2922 = vst.msk [vmem:[#allocation4 + $0x58] sm:$0xff] %vm511_vm2, %v2886_v39  ;;  %v2762_v56 = vadd.f32 %v5012_v47, %v2517_v11  ;;  %v2885_v33 = vmax.f32 %v2747_v12, 0.0  ;;  %v2954_v39 = vld [vmem:[#allocation4 + $0x38] sm:$0xff]  ;;  %v2537_v20 = vadd.f32 %v6644_v63, %v2292_v4  ;;  %v2532_v63 = vadd.f32 %v6642_v40, %v2287_v13 }
 0x320   :  { %v2568_v41 = vpop.f32.mrf.mxu0  ;;  %v2756_v9 = vpop.f32.mrf.mxu1  ;;  %v3166_v28 = vmax.f32 %v3022_v29, %v3130_v51  ;;  %v3059_v3 = vld [vmem:[#allocation4 + $0x2c] sm:$0xff]  ;;  %v3023_v57 = vmax.f32 %v2951_v52, %v2987_v54  ;;  %v2312_v40 = vadd.f32 %v6721_v45, %v6511_v17 }
 0x321   :  { %v3095_v49 = vld [vmem:[#allocation4 + $0x2d] sm:$0xff]  ;;  %v2888_v48 = vmax.f32 %v2762_v56, 0.0  ;;  %2921 = vst.msk [vmem:[#allocation4 + $0x50] sm:$0xff] %vm511_vm2, %v2885_v33  ;;  %v2757_v30 = vadd.f32 %v2756_v9, %v2512_v58 }
 0x322   :  { %v3131_v19 = vmax.f32 %v3059_v3, %v3095_v49  ;;  %v6726_v31 = vpop.f32.mrf.mxu0  ;;  %v5015_v18 = vpop.f32.mrf.mxu1  ;;  %3202 = vst.msk [vmem:[#allocation5 + $0x18] sm:$0xff] %vm511_vm2, %v3166_v28  ;;  %v2953_v10 = vld [vmem:[#allocation4 + $0x30] sm:$0xff]  ;;  %v2302_v28 = vadd.f32 %v6721_v45, %v6492_v23  ;;  %v2956_v4 = vld [vmem:[#allocation4 + $0x48] sm:$0xff] }
 0x323   :  { %v2989_v11 = vld [vmem:[#allocation4 + $0x31] sm:$0xff]  ;;  %2924 = vst.msk [vmem:[#allocation4 + $0x68] sm:$0xff] %vm511_vm2, %v2888_v48  ;;  %v2772_v29 = vadd.f32 %v5015_v18, %v2527_v0  ;;  %v2887_v12 = vmax.f32 %v2757_v30, 0.0  ;;  %v2297_v48 = vadd.f32 %v6721_v45, %v6488_v22 }
 0x324   :  { %v3167_v36 = vmax.f32 %v3023_v57, %v3131_v19  ;;  %v2990_v53 = vld [vmem:[#allocation4 + $0x39] sm:$0xff]  ;;  %v2573_v47 = vpop.f32.mrf.mxu0  ;;  %v2766_v59 = vpop.f32.mrf.mxu1  ;;  %v3062_v51 = vld [vmem:[#allocation4 + $0x44] sm:$0xff]  ;;  %v3025_v33 = vmax.f32 %v2953_v10, %v2989_v11  ;;  %v2547_v18 = vadd.f32 %v6660_v43, %v2302_v28  ;;  %v3640_v17 = vld [vmem:[%s7449_s5 + $0x90] sm:$0xff] }
 0x325   :  { %v3026_v52 = vmax.f32 %v2954_v39, %v2990_v53  ;;  %v3061_v54 = vld [vmem:[#allocation4 + $0x3c] sm:$0xff]  ;;  %v2890_v58 = vmax.f32 %v2772_v29, 0.0  ;;  %v3098_v41 = vld [vmem:[#allocation4 + $0x45] sm:$0xff]  ;;  %2923 = vst.msk [vmem:[#allocation4 + $0x60] sm:$0xff] %vm511_vm2, %v2887_v12  ;;  %v2767_v61 = vadd.f32 %v2766_v59, %v2522_v35  ;;  %v2542_v13 = vadd.f32 %v6651_v2, %v2297_v48  ;;  %4716 = vmatprep.subr.mxu0 %v3640_v17 }
 0x326   :  { %v3097_v56 = vld [vmem:[#allocation4 + $0x3d] sm:$0xff]  ;;  %3203 = vst.msk [vmem:[#allocation5 + $0x20] sm:$0xff] %vm511_vm2, %v3167_v36  ;;  %v6738_v9 = vpop.f32.mrf.mxu0  ;;  %v5018_v0 = vpop.f32.mrf.mxu1  ;;  %v3134_v3 = vmax.f32 %v3062_v51, %v3098_v41  ;;  %v2307_v2 = vadd.f32 %v6721_v45, %v6501_v38  ;;  %v2557_v51 = vadd.f32 %v6687_v25, %v2312_v40 }
 0x327   :  { %v3133_v6 = vmax.f32 %v3061_v54, %v3097_v56  ;;  %2926 = vst.msk [vmem:[#allocation4 + $0x78] sm:$0xff] %vm511_vm2, %v2890_v58  ;;  %v2782_v49 = vadd.f32 %v5018_v0, %v2537_v20  ;;  %v2889_v57 = vmax.f32 %v2767_v61, 0.0 }
 0x328   :  { %v2578_v19 = vpop.f32.mrf.mxu0  ;;  %v2776_v30 = vpop.f32.mrf.mxu1  ;;  %v3170_v10 = vmax.f32 %v3026_v52, %v3134_v3  ;;  %v2992_v11 = vld [vmem:[#allocation4 + $0x49] sm:$0xff]  ;;  %v3064_v22 = vld [vmem:[#allocation4 + $0x54] sm:$0xff]  ;;  %v2552_v41 = vadd.f32 %v6666_v1, %v2307_v2 }
 0x329   :  { %v3169_v62 = vmax.f32 %v3025_v33, %v3133_v6  ;;  %v2892_v29 = vmax.f32 %v2782_v49, 0.0  ;;  %v2777_v23 = vadd.f32 %v2776_v30, %v2532_v63  ;;  %v3028_v35 = vmax.f32 %v2956_v4, %v2992_v11  ;;  %2925 = vst.msk [vmem:[#allocation4 + $0x70] sm:$0xff] %vm511_vm2, %v2889_v57  ;;  %v3100_v43 = vld [vmem:[#allocation4 + $0x55] sm:$0xff]  ;;  %v3639_v30 = vld [vmem:[%s7449_s5 + $0x88] sm:$0xff] }
 0x32a   :  { %v6752_v39 = vpop.f32.mrf.mxu0  ;;  %v5021_v36 = vpop.f32.mrf.mxu1  ;;  %3206 = vst.msk [vmem:[#allocation5 + $0x38] sm:$0xff] %vm511_vm2, %v3170_v10  ;;  %v2957_v47 = vld [vmem:[#allocation4 + $0x50] sm:$0xff]  ;;  %v3136_v20 = vmax.f32 %v3064_v22, %v3100_v43  ;;  %v2322_v33 = vadd.f32 %v6721_v45, %v6541_v16  ;;  %v2960_v10 = vld [vmem:[#allocation4 + $0x68] sm:$0xff] }
 0x32b   :  { %3205 = vst.msk [vmem:[#allocation5 + $0x30] sm:$0xff] %vm511_vm2, %v3169_v62  ;;  %2928 = vst.msk [vmem:[#allocation4 + $0x88] sm:$0xff] %vm511_vm2, %v2892_v29  ;;  %v2891_v53 = vmax.f32 %v2777_v23, 0.0  ;;  %v2792_v12 = vadd.f32 %v5021_v36, %v2547_v18  ;;  %v2993_v59 = vld [vmem:[#allocation4 + $0x51] sm:$0xff]  ;;  %v3623_v18 = vld [vmem:[%s7449_s5 + $0x8] sm:$0xff] }
 0x32c   :  { %v2583_v52 = vpop.f32.mrf.mxu0  ;;  %v2786_v54 = vpop.f32.mrf.mxu1  ;;  %v3172_v6 = vmax.f32 %v3028_v35, %v3136_v20  ;;  %v2959_v38 = vld [vmem:[#allocation4 + $0x60] sm:$0xff]  ;;  %v3029_v3 = vmax.f32 %v2957_v47, %v2993_v59  ;;  %v3624_v1 = vld [vmem:[%s7449_s5 + $0x10] sm:$0xff]  ;;  %v2567_v4 = vadd.f32 %v6711_v21, %v2322_v33  ;;  %v2332_v35 = vadd.f32 %v6721_v45, %v6560_v37 }
 0x32d   :  { %2927 = vst.msk [vmem:[#allocation4 + $0x80] sm:$0xff] %vm511_vm2, %v2891_v53  ;;  %v2894_v56 = vmax.f32 %v2792_v12, 0.0  ;;  %v2787_v58 = vadd.f32 %v2786_v54, %v2542_v13  ;;  %v3065_v61 = vld [vmem:[#allocation4 + $0x5c] sm:$0xff]  ;;  %v3247_v57 = vld [vmem:[#allocation5 + $0x1a] ss:$2 sm:$0xf]  ;;  %4717 = vmatpush3.msra.mxu0 %v3624_v1  ;;  %v2317_v13 = vadd.f32 %v6721_v45, %v6529_v50  ;;  %v2327_v37 = vadd.f32 %v6721_v45, %v6558_v7 }
 0x32e   :  { %v3101_v0 = vld [vmem:[#allocation4 + $0x5d] sm:$0xff]  ;;  %v6766_v28 = vpop.f32.mrf.mxu0  ;;  %v5024_v63 = vpop.f32.mrf.mxu1  ;;  %3208 = vst.msk [vmem:[#allocation5 + $0x48] sm:$0xff] %vm511_vm2, %v3172_v6  ;;  %4718 = vmatprep.subr.mxu0 %v3639_v30  ;;  %v2577_v33 = vadd.f32 %v6738_v9, %v2332_v35 }
 0x32f   :  { %v2995_v49 = vld [vmem:[#allocation4 + $0x61] sm:$0xff]  ;;  %v3137_v48 = vmax.f32 %v3065_v61, %v3101_v0  ;;  %2930 = vst.msk [vmem:[#allocation4 + $0x98] sm:$0xff] %vm511_vm2, %v2894_v56  ;;  %v2893_v25 = vmax.f32 %v2787_v58, 0.0  ;;  %v2802_v62 = vadd.f32 %v5024_v63, %v2557_v51  ;;  %4719 = vmatpush3.msra.mxu0 %v3623_v18  ;;  %v2562_v52 = vadd.f32 %v6701_v8, %v2317_v13 }
 0x330   :  { %v2588_v16 = vpop.f32.mrf.mxu0  ;;  %v2796_v19 = vpop.f32.mrf.mxu1  ;;  %3249 = vst.msk [vmem:[#allocation6 + $0xf] sm:$0xf] %vm3248_vm5, %v3247_v57  ;;  %v2996_v29 = vld [vmem:[#allocation4 + $0x69] sm:$0xff]  ;;  %v3068_v43 = vld [vmem:[#allocation4 + $0x74] sm:$0xff]  ;;  %v3031_v17 = vmax.f32 %v2959_v38, %v2995_v49  ;;  %v3638_v7 = vld [vmem:[%s7449_s5 + $0x80] sm:$0xff]  ;;  %v2342_v8 = vadd.f32 %v6721_v45, %v6576_v34 }
 0x331   :  { %v3173_v11 = vmax.f32 %v3029_v3, %v3137_v48  ;;  %2929 = vst.msk [vmem:[#allocation4 + $0x90] sm:$0xff] %vm511_vm2, %v2893_v25  ;;  %v2896_v23 = vmax.f32 %v2802_v62, 0.0  ;;  %v2797_v40 = vadd.f32 %v2796_v19, %v2552_v41  ;;  %v3032_v22 = vmax.f32 %v2960_v10, %v2996_v29  ;;  %v3067_v36 = vld [vmem:[#allocation4 + $0x6c] sm:$0xff]  ;;  %v3104_v2 = vld [vmem:[#allocation4 + $0x75] sm:$0xff]  ;;  %v3308_v49 = vpop.permute.xlu1 %3307  ;;  %4720 = vmatprep.subr.mxu0 %v3638_v7 }
 0x332   :  { %v3103_v53 = vld [vmem:[#allocation4 + $0x6d] sm:$0xff]  ;;  %v6786_v12 = vpop.f32.mrf.mxu0  ;;  %v5027_v21 = vpop.f32.mrf.mxu1  ;;  %v3251_v20 = vld [vmem:[#allocation5 + $0x32] ss:$2 sm:$0xf]  ;;  %v3140_v54 = vmax.f32 %v3068_v43, %v3104_v2  ;;  %v2572_v25 = vadd.f32 %v6726_v31, %v2327_v37  ;;  %3334 = vst.msk [vmem:[#allocation7] sm:$0xff] %vm800_vm3, %v3308_v49  ;;  %v2587_v16 = vadd.f32 %v6766_v28, %v2342_v8  ;;  %v2337_v31 = vadd.f32 %v6721_v45, %v6574_v26 }
 0x333   :  { %3209 = vst.msk [vmem:[#allocation5 + $0x50] sm:$0xff] %vm511_vm2, %v3173_v11  ;;  %v3139_v47 = vmax.f32 %v3067_v36, %v3103_v53  ;;  %2932 = vst.msk [vmem:[#allocation4 + $0xa8] sm:$0xff] %vm511_vm2, %v2896_v23  ;;  %v2895_v59 = vmax.f32 %v2797_v40, 0.0  ;;  %v2812_v50 = vadd.f32 %v5027_v21, %v2567_v4  ;;  %v2352_v10 = vadd.f32 %v6721_v45, %v6600_v14  ;;  %v3380_v28 = vpop.permute.xlu0 %3379 }
 0x334   :  { %v2593_v51 = vpop.f32.mrf.mxu0  ;;  %v2806_v56 = vpop.f32.mrf.mxu1  ;;  %3252 = vst.msk [vmem:[#allocation6 + $0x15] sm:$0xf] %vm3248_vm5, %v3251_v20  ;;  %v3176_v6 = vmax.f32 %v3032_v22, %v3140_v54  ;;  %v2347_v26 = vadd.f32 %v6721_v45, %v6595_v46  ;;  %v2582_v40 = vadd.f32 %v6752_v39, %v2337_v31  ;;  %v2362_v39 = vadd.f32 %v6721_v45, %v6612_v32 }
 0x335   :  { %v3175_v58 = vmax.f32 %v3031_v17, %v3139_v47  ;;  %2931 = vst.msk [vmem:[#allocation4 + $0xa0] sm:$0xff] %vm511_vm2, %v2895_v59  ;;  %v2898_v41 = vmax.f32 %v2812_v50, 0.0  ;;  %v2807_v38 = vadd.f32 %v2806_v56, %v2562_v52  ;;  %v3622_v59 = vld [vmem:[%s7449_s5] sm:$0xff]  ;;  %v2357_v50 = vadd.f32 %v6721_v45, %v6604_v55 }
 0x336   :  { %v2596_v61 = vpop.f32.mrf.mxu0  ;;  %v5030_v0 = vpop.f32.mrf.mxu1  ;;  %3212 = vst.msk [vmem:[#allocation5 + $0x68] sm:$0xff] %vm511_vm2, %v3176_v6  ;;  %v2592_v17 = vadd.f32 %v6786_v12, %v2347_v26  ;;  %4721 = vmatpush3.msra.mxu0 %v3622_v59  ;;  %v2372_v31 = vadd.f32 %v6721_v45, %v6624_v15 }
 0x337   :  { %3211 = vst.msk [vmem:[#allocation5 + $0x60] sm:$0xff] %vm511_vm2, %v3175_v58  ;;  %2934 = vst.msk [vmem:[#allocation4 + $0xb8] sm:$0xff] %vm511_vm2, %v2898_v41  ;;  %v3290_v63 = vld [vmem:[#allocation6 + $0xa] sm:$0xff]  ;;  %v2822_v9 = vadd.f32 %v5030_v0, %v2577_v33  ;;  %v2897_v62 = vmax.f32 %v2807_v38, 0.0  ;;  %v2597_v22 = vadd.f32 %v2596_v61, %v2352_v10 }
 0x338   :  { %v6803_v3 = vld [vmem:[#allocation6 + $0x9] sm:$0xff]  ;;  %3309 = vrot.lane.b32.xlu1 %v3290_v63, %s5209_s25  ;;  %v2598_v57 = vpop.f32.mrf.mxu0  ;;  %v2816_v34 = vpop.f32.mrf.mxu1  ;;  %3406 = vst.msk [vmem:[#allocation7 + $0x8] sm:$0xff] %vm800_vm3, %v3380_v28 }
 0x339   :  { %v3344_v48 = vld [vmem:[#allocation6 + $0xb] sm:$0xff]  ;;  %3281 = vst.msk [vmem:[#allocation7 + $0x28] sm:$0xff] %vm511_vm2, %v6803_v3  ;;  %v2900_v19 = vmax.f32 %v2822_v9, 0.0  ;;  %2933 = vst.msk [vmem:[#allocation4 + $0xb0] sm:$0xff] %vm511_vm2, %v2897_v62  ;;  %v2817_v1 = vadd.f32 %v2816_v34, %v2572_v25  ;;  %v2367_v25 = vadd.f32 %v6721_v45, %v6616_v60 }
 0x33a   :  { %3353 = vst.msk [vmem:[#allocation7 + $0x30] sm:$0xff] %vm511_vm2, %v3344_v48  ;;  %v2601_v30 = vpop.f32.mrf.mxu0  ;;  %v5033_v18 = vpop.f32.mrf.mxu1  ;;  %v3254_v4 = vld [vmem:[#allocation5 + $0x4a] ss:$2 sm:$0xf]  ;;  %v2968_v51 = vld [vmem:[#allocation4 + $0xa8] sm:$0xff] }
 0x33b   :  { %2936 = vst.msk [vmem:[#allocation4 + $0xc8] sm:$0xff] %vm511_vm2, %v2900_v19  ;;  %v3362_v11 = vld [vmem:[#allocation6 + $0xf] sm:$0xff]  ;;  %v2832_v23 = vadd.f32 %v5033_v18, %v2587_v16  ;;  %v2899_v13 = vmax.f32 %v2817_v1, 0.0  ;;  %v2602_v61 = vadd.f32 %v2601_v30, %v2357_v50 }
 0x33c   :  { %v3291_v29 = vld [vmem:[#allocation6 + $0x12] sm:$0xff]  ;;  %3255 = vst.msk [vmem:[#allocation6 + $0x1b] sm:$0xf] %vm3248_vm5, %v3254_v4  ;;  %3381 = vrot.lane.b32.xlu0 %v3362_v11, %s5209_s25  ;;  %v2603_v35 = vpop.f32.mrf.mxu0  ;;  %v2826_v14 = vpop.f32.mrf.mxu1  ;;  %v3415_v12 = vld [vmem:[#allocation6 + $0x8] sm:$0xff] }
 0x33d   :  { %3311 = vrot.lane.b32.xlu1 %v3291_v29, %s5209_s25  ;;  %3568 = vst.msk [vmem:[#allocation7 + $0x20] sm:$0xff] %vm511_vm2, %v3362_v11  ;;  %v2902_v36 = vmax.f32 %v2832_v23, 0.0  ;;  %2935 = vst.msk [vmem:[#allocation4 + $0xc0] sm:$0xff] %vm511_vm2, %v2899_v13  ;;  %v2827_v43 = vadd.f32 %v2826_v14, %v2582_v40  ;;  %v6828_v21 = vld [vmem:[#allocation6 + $0x11] sm:$0xff]  ;;  %v2377_v14 = vadd.f32 %v6721_v45, %v6628_v27 }
 0x33e   :  { %v2606_v53 = vpop.f32.mrf.mxu0  ;;  %v5036_v46 = vpop.f32.mrf.mxu1  ;;  %v3257_v47 = vld [vmem:[#allocation5 + $0x62] ss:$2 sm:$0xf]  ;;  %3282 = vst.msk [vmem:[#allocation7 + $0x50] sm:$0xff] %vm511_vm2, %v6828_v21  ;;  %v3345_v32 = vld [vmem:[#allocation6 + $0x13] sm:$0xff]  ;;  %3424 = vst.msk [vmem:[#allocation7 + $0x10] sm:$0xff] %vm511_vm2, %v3415_v12 }
 0x33f   :  { %2938 = vst.msk [vmem:[#allocation4 + $0xd8] sm:$0xff] %vm511_vm2, %v2902_v36  ;;  %v2842_v2 = vadd.f32 %v5036_v46, %v2597_v22  ;;  %v2901_v20 = vmax.f32 %v2827_v43, 0.0  ;;  %v3487_v54 = vld [vmem:[#allocation6 + $0xd] sm:$0xff]  ;;  %v2607_v33 = vadd.f32 %v2606_v53, %v2362_v39  ;;  %3354 = vst.msk [vmem:[#allocation7 + $0x58] sm:$0xff] %vm511_vm2, %v3345_v32 }
 0x340   :  { %v2608_v37 = vpop.f32.mrf.mxu0  ;;  %v2836_v52 = vpop.f32.mrf.mxu1  ;;  %3258 = vst.msk [vmem:[#allocation6 + $0x21] sm:$0xf] %vm3248_vm5, %v3257_v47  ;;  %v2969_v56 = vld [vmem:[#allocation4 + $0xb0] sm:$0xff] }
 0x341   :  { %v3004_v58 = vld [vmem:[#allocation4 + $0xa9] sm:$0xff]  ;;  %v2904_v41 = vmax.f32 %v2842_v2, 0.0  ;;  %v2837_v6 = vadd.f32 %v2836_v52, %v2592_v17  ;;  %3496 = vst.msk [vmem:[#allocation7 + $0x18] sm:$0xff] %vm511_vm2, %v3487_v54  ;;  %v3076_v38 = vld [vmem:[#allocation4 + $0xb4] sm:$0xff]  ;;  %2937 = vst.msk [vmem:[#allocation4 + $0xd0] sm:$0xff] %vm511_vm2, %v2901_v20 }
 0x342   :  { %v3040_v55 = vmax.f32 %v2968_v51, %v3004_v58  ;;  %v2611_v0 = vpop.f32.mrf.mxu0  ;;  %v5039_v7 = vpop.f32.mrf.mxu1  ;;  %v3005_v8 = vld [vmem:[#allocation4 + $0xb1] sm:$0xff]  ;;  %v2972_v53 = vld [vmem:[#allocation4 + $0xc8] sm:$0xff] }
 0x343   :  { %v3112_v63 = vld [vmem:[#allocation4 + $0xb5] sm:$0xff]  ;;  %2940 = vst.msk [vmem:[#allocation4 + $0xe8] sm:$0xff] %vm511_vm2, %v2904_v41  ;;  %v2903_v9 = vmax.f32 %v2837_v6, 0.0  ;;  %v2852_v48 = vadd.f32 %v5039_v7, %v2607_v33  ;;  %v3363_v57 = vld [vmem:[#allocation6 + $0x17] sm:$0xff]  ;;  %v3041_v60 = vmax.f32 %v2969_v56, %v3005_v8  ;;  %v2612_v26 = vadd.f32 %v2611_v0, %v2367_v25 }
 0x344   :  { %v3581_v49 = vld [vmem:[#allocation7 + $0x20] sm:$0xff]  ;;  %v3148_v62 = vmax.f32 %v3076_v38, %v3112_v63  ;;  %v2613_v34 = vpop.f32.mrf.mxu0  ;;  %v2846_v16 = vpop.f32.mrf.mxu1  ;;  %v2971_v1 = vld [vmem:[#allocation4 + $0xc0] sm:$0xff]  ;;  %3383 = vrot.lane.b32.xlu0 %v3363_v57, %s5209_s25  ;;  %3569 = vst.msk [vmem:[#allocation7 + $0x48] sm:$0xff] %vm511_vm2, %v3363_v57  ;;  %v2382_v7 = vadd.f32 %v6721_v45, %v6640_v44 }
 0x345   :  { %5063 = vmatmul.mubr.msk.f32.vlgmr.msra.gmra.mxu1 %vm511_vm2, %v3581_v49  ;;  %v6850_v19 = vld [vmem:[#allocation6 + $0x19] sm:$0xff]  ;;  %2939 = vst.msk [vmem:[#allocation4 + $0xe0] sm:$0xff] %vm511_vm2, %v2903_v9  ;;  %v2906_v30 = vmax.f32 %v2852_v48, 0.0  ;;  %v2847_v18 = vadd.f32 %v2846_v16, %v2602_v61  ;;  %v3077_v10 = vld [vmem:[#allocation4 + $0xbc] sm:$0xff] }
 0x346   :  { %5065 = vmatprep.mubr.msk.f32.mxu1 %vm5211_vm4, %v5210_v42  ;;  %3283 = vst.msk [vmem:[#allocation7 + $0x78] sm:$0xff] %vm511_vm2, %v6850_v19  ;;  %v3184_v4 = vmax.f32 %v3040_v55, %v3148_v62  ;;  %v3113_v11 = vld [vmem:[#allocation4 + $0xbd] sm:$0xff]  ;;  %v2616_v15 = vpop.f32.mrf.mxu0  ;;  %v5042_v29 = vpop.f32.mrf.mxu1  ;;  %v3577_v49 = vld [vmem:[#allocation7] sm:$0xff] }
 0x347   :  { %v3007_v23 = vld [vmem:[#allocation4 + $0xc1] sm:$0xff]  ;;  %v3149_v28 = vmax.f32 %v3077_v10, %v3113_v11  ;;  %2942 = vst.msk [vmem:[#allocation4 + $0xf8] sm:$0xff] %vm511_vm2, %v2906_v30  ;;  %v2905_v40 = vmax.f32 %v2847_v18, 0.0  ;;  %v3364_v13 = vld [vmem:[#allocation6 + $0x1f] sm:$0xff]  ;;  %v2617_v35 = vadd.f32 %v2616_v15, %v2372_v31  ;;  %v2974_v33 = vld [vmem:[#allocation4 + $0xd8] sm:$0xff] }
 0x348   :  { %3220 = vst.msk [vmem:[#allocation5 + $0xa8] sm:$0xff] %vm511_vm2, %v3184_v4  ;;  %v3292_v22 = vld [vmem:[#allocation6 + $0x1a] sm:$0xff]  ;;  %v2618_v36 = vpop.f32.mrf.mxu0  ;;  %v2856_v43 = vpop.f32.mrf.mxu1  ;;  %3570 = vst.msk [vmem:[#allocation7 + $0x70] sm:$0xff] %vm511_vm2, %v3364_v13  ;;  %3385 = vrot.lane.b32.xlu0 %v3364_v13, %s5209_s25  ;;  %v3043_v47 = vmax.f32 %v2971_v1, %v3007_v23  ;;  %v3080_v50 = vld [vmem:[#allocation4 + $0xd4] sm:$0xff] }
 0x349   :  { %v3185_v46 = vmax.f32 %v3041_v60, %v3149_v28  ;;  %v3008_v39 = vld [vmem:[#allocation4 + $0xc9] sm:$0xff]  ;;  %2941 = vst.msk [vmem:[#allocation4 + $0xf0] sm:$0xff] %vm511_vm2, %v2905_v40  ;;  %3313 = vrot.lane.b32.xlu1 %v3292_v22, %s5209_s25  ;;  %v2862_v17 = vadd.f32 %v5042_v29, %v2617_v35  ;;  %v2857_v2 = vadd.f32 %v2856_v43, %v2612_v26  ;;  %v3116_v32 = vld [vmem:[#allocation4 + $0xd5] sm:$0xff]  ;;  %v3596_v40 = vld [vmem:[#allocation7 + $0x98] sm:$0xff] }
 0x34a   :  { %v3044_v27 = vmax.f32 %v2972_v53, %v3008_v39  ;;  %v3079_v59 = vld [vmem:[#allocation4 + $0xcc] sm:$0xff]  ;;  %v2621_v37 = vpop.f32.mrf.mxu0  ;;  %v5045_v52 = vpop.f32.mrf.mxu1  ;;  %v3152_v41 = vmax.f32 %v3080_v50, %v3116_v32  ;;  %v3294_v0 = vld [vmem:[#allocation6 + $0x2a] sm:$0xff] }
 0x34b   :  { %v3115_v20 = vld [vmem:[#allocation4 + $0xcd] sm:$0xff]  ;;  %3221 = vst.msk [vmem:[#allocation5 + $0xb0] sm:$0xff] %vm511_vm2, %v3185_v46  ;;  %v2908_v54 = vmax.f32 %v2862_v17, 0.0  ;;  %v2907_v51 = vmax.f32 %v2857_v2, 0.0  ;;  %v2622_v56 = vadd.f32 %v2621_v37, %v2377_v14  ;;  %v3685_v14 = vld [vmem:[%s7449_s5 + $0x1f8] sm:$0xff] }
 0x34c   :  { %v3151_v12 = vmax.f32 %v3079_v59, %v3115_v20  ;;  %v6870_v58 = vld [vmem:[#allocation6 + $0x21] sm:$0xff]  ;;  %v3010_v6 = vld [vmem:[#allocation4 + $0xd9] sm:$0xff]  ;;  %v2623_v38 = vpop.f32.mrf.mxu0  ;;  %v2866_v61 = vpop.f32.mrf.mxu1  ;;  %v3082_v9 = vld [vmem:[#allocation4 + $0xe4] sm:$0xff]  ;;  %3387 = vrot.lane.b32.xlu0 %v6564_v24, %s5209_s25  ;;  %v3188_v48 = vmax.f32 %v3044_v27, %v3152_v41  ;;  %4749 = vmatprep.subr.mxu0 %v3685_v14 }
 0x34d   :  { %v3293_v55 = vld [vmem:[#allocation6 + $0x22] sm:$0xff]  ;;  %3284 = vst.msk [vmem:[#allocation7 + $0xa0] sm:$0xff] %vm511_vm2, %v6870_v58  ;;  %v3046_v63 = vmax.f32 %v2974_v33, %v3010_v6  ;;  %2944 = vst.msk [vmem:[#allocation4 + $0x108] sm:$0xff] %vm511_vm2, %v2908_v54  ;;  %v2975_v25 = vld [vmem:[#allocation4 + $0xe0] sm:$0xff]  ;;  %v2867_v34 = vadd.f32 %v2866_v61, %v2622_v56 }
 0x34e   :  { %v3187_v8 = vmax.f32 %v3043_v47, %v3151_v12  ;;  %2943 = vst.msk [vmem:[#allocation4 + $0x100] sm:$0xff] %vm511_vm2, %v2907_v51  ;;  %3315 = vrot.lane.b32.xlu1 %v3293_v55, %s5209_s25  ;;  %v3118_v62 = vld [vmem:[#allocation4 + $0xe5] sm:$0xff]  ;;  %v3586_v57 = vld [vmem:[#allocation7 + $0x48] sm:$0xff]  ;;  %v2626_v16 = vpop.f32.mrf.mxu0  ;;  %3224 = vst.msk [vmem:[#allocation5 + $0xc8] sm:$0xff] %vm511_vm2, %v3188_v48 }
 0x34f   :  { %v3011_v44 = vld [vmem:[#allocation4 + $0xe1] sm:$0xff]  ;;  %v3154_v45 = vmax.f32 %v3082_v9, %v3118_v62  ;;  %5066 = vmatmul.mubr.msk.f32.gmra.mxu1 %vm511_vm2, %v3586_v57  ;;  %v2627_v31 = vadd.f32 %v2626_v16, %v2382_v7  ;;  %v3578_v1 = vld [vmem:[#allocation7 + $0x8] sm:$0xff]  ;;  %v2909_v24 = vmax.f32 %v2867_v34, 0.0  ;;  %v3591_v18 = vld [vmem:[#allocation7 + $0x70] sm:$0xff] }
 0x350   :  { %3223 = vst.msk [vmem:[#allocation5 + $0xc0] sm:$0xff] %vm511_vm2, %v3187_v8  ;;  %v3346_v30 = vld [vmem:[#allocation6 + $0x1b] sm:$0xff]  ;;  %5068 = vmatprep.mubr.msk.f32.mxu1 %vm5211_vm4, %v5210_v42  ;;  %v2628_v60 = vpop.f32.mrf.mxu0  ;;  %3792 = vmatprep.mubr.f32.mxu0 %v3578_v1  ;;  %v3047_v29 = vmax.f32 %v2975_v25, %v3011_v44  ;;  %v2978_v23 = vld [vmem:[#allocation4 + $0xf8] sm:$0xff]  ;;  %v3682_v56 = vld [vmem:[%s7449_s5 + $0x1e0] sm:$0xff] }
 0x351   :  { %3355 = vst.msk [vmem:[#allocation7 + $0x80] sm:$0xff] %vm511_vm2, %v3346_v30  ;;  %v3190_v4 = vmax.f32 %v3046_v63, %v3154_v45  ;;  %v3083_v10 = vld [vmem:[#allocation4 + $0xec] sm:$0xff]  ;;  %v2872_v15 = vadd.f32 %v5045_v52, %v2627_v31  ;;  %2945 = vst.msk [vmem:[#allocation4 + $0x110] sm:$0xff] %vm511_vm2, %v2909_v24  ;;  %3793 = vmatmul.mubr.f32.vlgmr.msra.gmra.mxu0 %v3577_v49  ;;  %v3669_v22 = vld [vmem:[%s7449_s5 + $0x178] sm:$0xff] }
 0x352   :  { %v3119_v11 = vld [vmem:[#allocation4 + $0xed] sm:$0xff]  ;;  %3317 = vrot.lane.b32.xlu1 %v3294_v0, %s5209_s25  ;;  %v3260_v26 = vld [vmem:[#allocation5 + $0xaa] ss:$2 sm:$0xf]  ;;  %4750 = vmatpush3.msra.mxu0 %v3669_v22 }
 0x353   :  { %v3155_v28 = vmax.f32 %v3083_v10, %v3119_v11  ;;  %v3347_v13 = vld [vmem:[#allocation6 + $0x23] sm:$0xff]  ;;  %3226 = vst.msk [vmem:[#allocation5 + $0xd8] sm:$0xff] %vm511_vm2, %v3190_v4  ;;  %5069 = vmatmul.mubr.msk.f32.gmra.mxu1 %vm511_vm2, %v3591_v18  ;;  %v2910_v35 = vmax.f32 %v2872_v15, 0.0  ;;  %v3348_v50 = vld [vmem:[#allocation6 + $0x2b] sm:$0xff]  ;;  %v3683_v54 = vld [vmem:[%s7449_s5 + $0x1e8] sm:$0xff] }
 0x354   :  { %3261 = vst.msk [vmem:[#allocation6 + $0x33] sm:$0xf] %vm3248_vm5, %v3260_v26  ;;  %v3684_v36 = vld [vmem:[%s7449_s5 + $0x1f0] sm:$0xff]  ;;  %5071 = vmatprep.mubr.msk.f32.mxu1 %vm5211_vm4, %v5210_v42  ;;  %v3667_v51 = vld [vmem:[%s7449_s5 + $0x168] sm:$0xff]  ;;  %v3666_v6 = vld [vmem:[%s7449_s5 + $0x160] sm:$0xff] }
 0x355   :  { %3356 = vst.msk [vmem:[#allocation7 + $0xa8] sm:$0xff] %vm511_vm2, %v3347_v13  ;;  %v2977_v43 = vld [vmem:[#allocation4 + $0xf0] sm:$0xff]  ;;  %v3191_v46 = vmax.f32 %v3047_v29, %v3155_v28  ;;  %v3014_v39 = vld [vmem:[#allocation4 + $0xf9] sm:$0xff]  ;;  %v3086_v47 = vld [vmem:[#allocation4 + $0x104] sm:$0xff]  ;;  %4751 = vmatprep.subr.mxu0 %v3684_v36 }
 0x356   :  { %v3013_v53 = vld [vmem:[#allocation4 + $0xf1] sm:$0xff]  ;;  %v3050_v17 = vmax.f32 %v2978_v23, %v3014_v39  ;;  %v3085_v2 = vld [vmem:[#allocation4 + $0xfc] sm:$0xff]  ;;  %2946 = vst.msk [vmem:[#allocation4 + $0x118] sm:$0xff] %vm511_vm2, %v2910_v35  ;;  %v3122_v59 = vld [vmem:[#allocation4 + $0x105] sm:$0xff] }
 0x357   :  { %3227 = vst.msk [vmem:[#allocation5 + $0xe0] sm:$0xff] %vm511_vm2, %v3191_v46  ;;  %v3121_v27 = vld [vmem:[#allocation4 + $0xfd] sm:$0xff]  ;;  %v3049_v20 = vmax.f32 %v2977_v43, %v3013_v53  ;;  %v3158_v52 = vmax.f32 %v3086_v47, %v3122_v59  ;;  %5072 = vmatmul.mubr.msk.f32.gmra.mxu1 %vm511_vm2, %v3596_v40  ;;  %v3263_v32 = vld [vmem:[#allocation5 + $0xc2] ss:$2 sm:$0xf]  ;;  %3357 = vst.msk [vmem:[#allocation7 + $0xd0] sm:$0xff] %vm511_vm2, %v3348_v50 }
 0x358   :  { %v3157_v37 = vmax.f32 %v3085_v2, %v3121_v27  ;;  %v3668_v12 = vld [vmem:[%s7449_s5 + $0x170] sm:$0xff]  ;;  %3264 = vst.msk [vmem:[#allocation6 + $0x39] sm:$0xf] %vm3248_vm5, %v3263_v32  ;;  %5074 = vmatprep.mubr.msk.f32.mxu1 %vm5211_vm4, %v5210_v42  ;;  %v3681_v61 = vld [vmem:[%s7449_s5 + $0x1d8] sm:$0xff]  ;;  %v3679_v25 = vld [vmem:[%s7449_s5 + $0x1c8] sm:$0xff] }
 0x359   :  { %4752 = vmatpush3.msra.mxu0 %v3668_v12  ;;  %v3194_v41 = vmax.f32 %v3050_v17, %v3158_v52  ;;  %v3665_v0 = vld [vmem:[%s7449_s5 + $0x158] sm:$0xff]  ;;  %v3680_v8 = vld [vmem:[%s7449_s5 + $0x1d0] sm:$0xff]  ;;  %v3663_v62 = vld [vmem:[%s7449_s5 + $0x148] sm:$0xff] }
 0x35a   :  { %v3193_v33 = vmax.f32 %v3049_v20, %v3157_v37  ;;  %4753 = vmatprep.subr.mxu0 %v3683_v54  ;;  %v3664_v48 = vld [vmem:[%s7449_s5 + $0x150] sm:$0xff]  ;;  %v3678_v57 = vld [vmem:[%s7449_s5 + $0x1c0] sm:$0xff]  ;;  %v3677_v45 = vld [vmem:[%s7449_s5 + $0x1b8] sm:$0xff] }
 0x35b   :  { %v3366_v55 = vld [vmem:[#allocation6 + $0x2f] sm:$0xff]  ;;  %4754 = vmatpush3.msra.mxu0 %v3667_v51  ;;  %3230 = vst.msk [vmem:[#allocation5 + $0xf8] sm:$0xff] %vm511_vm2, %v3194_v41  ;;  %v3676_v1 = vld [vmem:[%s7449_s5 + $0x1b0] sm:$0xff]  ;;  %v3675_v11 = vld [vmem:[%s7449_s5 + $0x1a8] sm:$0xff] }
 0x35c   :  { %3229 = vst.msk [vmem:[#allocation5 + $0xf0] sm:$0xff] %vm511_vm2, %v3193_v33  ;;  %3389 = vrot.lane.b32.xlu0 %v3366_v55, %s5209_s25  ;;  %3572 = vst.msk [vmem:[#allocation7 + $0xc0] sm:$0xff] %vm511_vm2, %v3366_v55  ;;  %v6930_v38 = vld [vmem:[#allocation6 + $0x31] sm:$0xff]  ;;  %4755 = vmatprep.subr.mxu0 %v3682_v56  ;;  %v3661_v31 = vld [vmem:[%s7449_s5 + $0x138] sm:$0xff] }
 0x35d   :  { %3286 = vst.msk [vmem:[#allocation7 + $0xf0] sm:$0xff] %vm511_vm2, %v6930_v38  ;;  %4756 = vmatpush3.msra.mxu0 %v3666_v6  ;;  %v3662_v44 = vld [vmem:[%s7449_s5 + $0x140] sm:$0xff]  ;;  %v3660_v30 = vld [vmem:[%s7449_s5 + $0x130] sm:$0xff]  ;;  %v3659_v15 = vld [vmem:[%s7449_s5 + $0x128] sm:$0xff] }
 0x35e   :  { %4757 = vmatprep.subr.mxu0 %v3681_v61  ;;  %v3266_v7 = vld [vmem:[#allocation5 + $0xda] ss:$2 sm:$0xf]  ;;  %v3416_v24 = vld [vmem:[#allocation6 + $0x10] sm:$0xff]  ;;  %v3673_v46 = vld [vmem:[%s7449_s5 + $0x198] sm:$0xff] }
 0x35f   :  { %4758 = vmatpush3.msra.mxu0 %v3665_v0  ;;  %v3367_v63 = vld [vmem:[#allocation6 + $0x37] sm:$0xff]  ;;  %3267 = vst.msk [vmem:[#allocation6 + $0x3f] sm:$0xf] %vm3248_vm5, %v3266_v7  ;;  %v3418_v40 = vld [vmem:[#allocation6 + $0x20] sm:$0xff]  ;;  %v3491_v13 = vld [vmem:[#allocation6 + $0x2d] sm:$0xff] }
 0x360   :  { %v3295_v9 = vld [vmem:[#allocation6 + $0x32] sm:$0xff]  ;;  %4759 = vmatprep.subr.mxu0 %v3680_v8  ;;  %3391 = vrot.lane.b32.xlu0 %v3367_v63, %s5209_s25  ;;  %3573 = vst.msk [vmem:[#allocation7 + $0xe8] sm:$0xff] %vm511_vm2, %v3367_v63  ;;  %3425 = vst.msk [vmem:[#allocation7 + $0x38] sm:$0xff] %vm511_vm2, %v3416_v24  ;;  %v3489_v26 = vld [vmem:[#allocation6 + $0x1d] sm:$0xff] }
 0x361   :  { %3319 = vrot.lane.b32.xlu1 %v3295_v9, %s5209_s25  ;;  %v3349_v49 = vld [vmem:[#allocation6 + $0x33] sm:$0xff]  ;;  %4760 = vmatpush3.msra.mxu0 %v3664_v48  ;;  %3498 = vst.msk [vmem:[#allocation7 + $0x68] sm:$0xff] %vm511_vm2, %v3489_v26  ;;  %3427 = vst.msk [vmem:[#allocation7 + $0x88] sm:$0xff] %vm511_vm2, %v3418_v40  ;;  %v3657_v39 = vld [vmem:[%s7449_s5 + $0x118] sm:$0xff] }
 0x362   :  { %3358 = vst.msk [vmem:[#allocation7 + $0xf8] sm:$0xff] %vm511_vm2, %v3349_v49  ;;  %4761 = vmatprep.subr.mxu0 %v3679_v25  ;;  %v3674_v29 = vld [vmem:[%s7449_s5 + $0x1a0] sm:$0xff]  ;;  %v3417_v28 = vld [vmem:[#allocation6 + $0x18] sm:$0xff]  ;;  %3500 = vst.msk [vmem:[#allocation7 + $0xb8] sm:$0xff] %vm511_vm2, %v3491_v13 }
 0x363   :  { %v3601_v34 = vld [vmem:[#allocation7 + $0xc0] sm:$0xff]  ;;  %4762 = vmatpush3.msra.mxu0 %v3663_v62  ;;  %3426 = vst.msk [vmem:[#allocation7 + $0x60] sm:$0xff] %vm511_vm2, %v3417_v28  ;;  %v3658_v43 = vld [vmem:[%s7449_s5 + $0x120] sm:$0xff]  ;;  %v3672_v17 = vld [vmem:[%s7449_s5 + $0x190] sm:$0xff] }
 0x364   :  { %v3269_v16 = vld [vmem:[#allocation5 + $0xf2] ss:$2 sm:$0xf]  ;;  %5075 = vmatmul.mubr.msk.f32.gmra.mxu1 %vm511_vm2, %v3601_v34  ;;  %4763 = vmatprep.subr.mxu0 %v3678_v57  ;;  %v3490_v50 = vld [vmem:[#allocation6 + $0x25] sm:$0xff] }
 0x365   :  { %3270 = vst.msk [vmem:[#allocation6 + $0x45] sm:$0xf] %vm3248_vm5, %v3269_v16  ;;  %5077 = vmatprep.mubr.msk.f32.mxu1 %vm5211_vm4, %v5210_v42  ;;  %4764 = vmatpush3.msra.mxu0 %v3662_v44  ;;  %v3488_v23 = vld [vmem:[#allocation6 + $0x15] sm:$0xff]  ;;  %v3656_v12 = vld [vmem:[%s7449_s5 + $0x110] sm:$0xff]  ;;  %v3419_v54 = vld [vmem:[#allocation6 + $0x28] sm:$0xff] }
 0x366   :  { %v3296_v18 = vld [vmem:[#allocation6 + $0x3a] sm:$0xff]  ;;  %4765 = vmatprep.subr.mxu0 %v3677_v45  ;;  %3497 = vst.msk [vmem:[#allocation7 + $0x40] sm:$0xff] %vm511_vm2, %v3488_v23  ;;  %v3420_v2 = vld [vmem:[#allocation6 + $0x30] sm:$0xff]  ;;  %3499 = vst.msk [vmem:[#allocation7 + $0x90] sm:$0xff] %vm511_vm2, %v3490_v50 }
 0x367   :  { %v6979_v60 = vld [vmem:[#allocation6 + $0x39] sm:$0xff]  ;;  %3321 = vrot.lane.b32.xlu1 %v3296_v18, %s5209_s25  ;;  %4766 = vmatpush3.msra.mxu0 %v3661_v31  ;;  %3429 = vst.msk [vmem:[#allocation7 + $0xd8] sm:$0xff] %vm511_vm2, %v3420_v2  ;;  %v3505_v32 = vld [vmem:[#allocation6 + $0xe] sm:$0xff]  ;;  %3428 = vst.msk [vmem:[#allocation7 + $0xb0] sm:$0xff] %vm511_vm2, %v3419_v54 }
 0x368   :  { %v3350_v4 = vld [vmem:[#allocation6 + $0x3b] sm:$0xff]  ;;  %3287 = vst.msk [vmem:[#allocation7 + $0x118] sm:$0xff] %vm511_vm2, %v6979_v60  ;;  %4767 = vmatprep.subr.mxu0 %v3676_v1  ;;  %v3670_v6 = vld [vmem:[%s7449_s5 + $0x180] sm:$0xff]  ;;  %v3508_v61 = vld [vmem:[#allocation6 + $0x26] sm:$0xff] }
 0x369   :  { %v3606_v10 = vld [vmem:[#allocation7 + $0xe8] sm:$0xff]  ;;  %3359 = vst.msk [vmem:[#allocation7 + $0x120] sm:$0xff] %vm511_vm2, %v3350_v4  ;;  %4768 = vmatpush3.msra.mxu0 %v3660_v30  ;;  %v3492_v47 = vld [vmem:[#allocation6 + $0x35] sm:$0xff]  ;;  %v3495_v7 = vld [vmem:[#allocation6 + $0x4d] sm:$0xff] }
 0x36a   :  { %5078 = vmatmul.mubr.msk.f32.gmra.mxu1 %vm511_vm2, %v3606_v10  ;;  %4769 = vmatprep.subr.mxu0 %v3675_v11  ;;  %v3421_v27 = vld [vmem:[#allocation6 + $0x38] sm:$0xff]  ;;  %3501 = vst.msk [vmem:[#allocation7 + $0xe0] sm:$0xff] %vm511_vm2, %v3492_v47  ;;  %v3509_v0 = vld [vmem:[#allocation6 + $0x2e] sm:$0xff]  ;;  %3504 = vst.msk [vmem:[#allocation7 + $0x158] sm:$0xff] %vm511_vm2, %v3495_v7 }
 0x36b   :  { %5080 = vmatprep.mubr.msk.f32.mxu1 %vm5211_vm4, %v5210_v42  ;;  %4770 = vmatpush3.msra.mxu0 %v3659_v15  ;;  %v3493_v59 = vld [vmem:[#allocation6 + $0x3d] sm:$0xff]  ;;  %3430 = vst.msk [vmem:[#allocation7 + $0x100] sm:$0xff] %vm511_vm2, %v3421_v27  ;;  %v3567_v63 = vld [vmem:[#allocation6 + $0x4f] sm:$0xff] }
 0x36c   :  { %v3368_v35 = vld [vmem:[#allocation6 + $0x3f] sm:$0xff]  ;;  %v3369_v22 = vld [vmem:[#allocation6 + $0x47] sm:$0xff]  ;;  %4771 = vmatprep.subr.mxu0 %v3674_v29  ;;  %3502 = vst.msk [vmem:[#allocation7 + $0x108] sm:$0xff] %vm511_vm2, %v3493_v59  ;;  %v3506_v41 = vld [vmem:[#allocation6 + $0x16] sm:$0xff] }
 0x36d   :  { %v3297_v14 = vld [vmem:[#allocation6 + $0x42] sm:$0xff]  ;;  %3393 = vrot.lane.b32.xlu0 %v3368_v35, %s5209_s25  ;;  %3574 = vst.msk [vmem:[#allocation7 + $0x110] sm:$0xff] %vm511_vm2, %v3368_v35  ;;  %3575 = vst.msk [vmem:[#allocation7 + $0x138] sm:$0xff] %vm511_vm2, %v3369_v22  ;;  %4772 = vmatpush3.msra.mxu0 %v3658_v43  ;;  %v3671_v51 = vld [vmem:[%s7449_s5 + $0x188] sm:$0xff] }
 0x36e   :  { %3323 = vrot.lane.b32.xlu1 %v3297_v14, %s5209_s25  ;;  %v7007_v36 = vld [vmem:[#allocation6 + $0x41] sm:$0xff]  ;;  %4773 = vmatprep.subr.mxu0 %v3673_v46  ;;  %v3655_v56 = vld [vmem:[%s7449_s5 + $0x108] sm:$0xff]  ;;  %3576 = vst.msk [vmem:[#allocation7 + $0x160] sm:$0xff] %vm511_vm2, %v3567_v63 }
 0x36f   :  { %3288 = vst.msk [vmem:[#allocation7 + $0x140] sm:$0xff] %vm511_vm2, %v7007_v36  ;;  %v3351_v53 = vld [vmem:[#allocation6 + $0x43] sm:$0xff]  ;;  %4774 = vmatpush3.msra.mxu0 %v3657_v39 }
 0x370   :  { %3360 = vst.msk [vmem:[#allocation7 + $0x148] sm:$0xff] %vm511_vm2, %v3351_v53  ;;  %v3422_v20 = vld [vmem:[#allocation6 + $0x40] sm:$0xff]  ;;  %v3423_v52 = vld [vmem:[#allocation6 + $0x48] sm:$0xff]  ;;  %4775 = vmatprep.subr.mxu0 %v3672_v17 }
 0x371   :  { %3395 = vrot.lane.b32.xlu0 %v3369_v22, %s5209_s25  ;;  %v3494_v37 = vld [vmem:[#allocation6 + $0x45] sm:$0xff]  ;;  %3431 = vst.msk [vmem:[#allocation7 + $0x128] sm:$0xff] %vm511_vm2, %v3422_v20  ;;  %3432 = vst.msk [vmem:[#allocation7 + $0x150] sm:$0xff] %vm511_vm2, %v3423_v52  ;;  %4776 = vmatpush3.msra.mxu0 %v3656_v12 }
 0x372   :  { %3451 = vrot.lane.b32.xlu1 %v6803_v3, %s5209_s25  ;;  %3503 = vst.msk [vmem:[#allocation7 + $0x130] sm:$0xff] %vm511_vm2, %v3494_v37  ;;  %4777 = vmatprep.subr.mxu0 %v3671_v51  ;;  %v3507_v55 = vld [vmem:[#allocation6 + $0x1e] sm:$0xff]  ;;  %v3512_v8 = vld [vmem:[#allocation6 + $0x46] sm:$0xff] }
 0x373   :  { %4778 = vmatpush3.msra.mxu0 %v3655_v56 }
 0x374   :  { %v3611_v3 = vld [vmem:[#allocation7 + $0x110] sm:$0xff]  ;;  %v3616_v33 = vld [vmem:[#allocation7 + $0x138] sm:$0xff]  ;;  %4779 = vmatprep.subr.mxu0 %v3670_v6 }
 0x375   :  { %5081 = vmatmul.mubr.msk.f32.gmra.mxu1 %vm511_vm2, %v3611_v3  ;;  %3523 = vrot.lane.b32.xlu0 %v3505_v32, %s5209_s25  ;;  %v3621_v9 = vld [vmem:[#allocation7 + $0x160] sm:$0xff] }
 0x376   :  { %3453 = vrot.lane.b32.xlu1 %v6828_v21, %s5209_s25  ;;  %5083 = vmatprep.mubr.msk.f32.mxu1 %vm5211_vm4, %v5210_v42  ;;  %v3654_v21 = vld [vmem:[%s7449_s5 + $0x100] sm:$0xff] }
 0x377   :  { %4780 = vmatpush3.msra.mxu0 %v3654_v21 }
 0x379   :  { %5084 = vmatmul.mubr.msk.f32.gmra.mxu1 %vm511_vm2, %v3616_v33  ;;  %3525 = vrot.lane.b32.xlu0 %v3506_v41, %s5209_s25 }
 0x37a   :  { %3455 = vrot.lane.b32.xlu1 %v6850_v19, %s5209_s25  ;;  %5086 = vmatprep.mubr.msk.f32.mxu1 %vm5211_vm4, %v5210_v42  ;;  %v3510_v19 = vld [vmem:[#allocation6 + $0x36] sm:$0xff] }
 0x37d   :  { %3527 = vrot.lane.b32.xlu0 %v3507_v55, %s5209_s25  ;;  %5087 = vmatmul.mubr.msk.f32.gmra.mxu1 %vm511_vm2, %v3621_v9 }
 0x37e   :  { %3457 = vrot.lane.b32.xlu1 %v6870_v58, %s5209_s25  ;;  %v3511_v58 = vld [vmem:[#allocation6 + $0x3e] sm:$0xff] }
 0x381   :  { %3529 = vrot.lane.b32.xlu0 %v3508_v61, %s5209_s25 }
 0x382   :  { %3459 = vrot.lane.b32.xlu1 %v6630_v5, %s5209_s25  ;;  %v3441_v5 = vld [vmem:[#allocation6 + $0x49] sm:$0xff] }
 0x385   :  { %3531 = vrot.lane.b32.xlu0 %v3509_v0, %s5209_s25 }
 0x386   :  { %3461 = vrot.lane.b32.xlu1 %v6930_v38, %s5209_s25  ;;  %v3513_v38 = vld [vmem:[#allocation6 + $0x4e] sm:$0xff] }
 0x389   :  { %3533 = vrot.lane.b32.xlu0 %v3510_v19, %s5209_s25 }
 0x38a   :  { %3463 = vrot.lane.b32.xlu1 %v6979_v60, %s5209_s25 }
 0x38d   :  { %3535 = vrot.lane.b32.xlu0 %v3511_v58, %s5209_s25 }
 0x38e   :  { %3465 = vrot.lane.b32.xlu1 %v7007_v36, %s5209_s25 }
 0x391   :  { %3537 = vrot.lane.b32.xlu0 %v3512_v8, %s5209_s25 }
 0x392   :  { %3467 = vrot.lane.b32.xlu1 %v3441_v5, %s5209_s25 }
 0x395   :  { %3539 = vrot.lane.b32.xlu0 %v3513_v38, %s5209_s25 }
 0x3aa   :  { %v3310_v49 = vpop.permute.xlu1 %3309 }
 0x3ab   :  { %3335 = vst.msk [vmem:[#allocation7 + $0x28] sm:$0xff] %vm800_vm3, %v3310_v49 }
 0x3ae   :  { %v3382_v48 = vpop.permute.xlu0 %3381 }
 0x3af   :  { %v3312_v25 = vpop.permute.xlu1 %3311  ;;  %3407 = vst.msk [vmem:[#allocation7 + $0x30] sm:$0xff] %vm800_vm3, %v3382_v48 }
 0x3b0   :  { %3336 = vst.msk [vmem:[#allocation7 + $0x50] sm:$0xff] %vm800_vm3, %v3312_v25 }
 0x3b2   :  { %v3582_v34 = vld [vmem:[#allocation7 + $0x28] sm:$0xff] }
 0x3b6   :  { %v3583_v62 = vld [vmem:[#allocation7 + $0x30] sm:$0xff]  ;;  %v3384_v57 = vpop.permute.xlu0 %3383 }
 0x3b7   :  { %3797 = vmatprep.mubr.f32.mxu0 %v3583_v62  ;;  %3408 = vst.msk [vmem:[#allocation7 + $0x58] sm:$0xff] %vm800_vm3, %v3384_v57  ;;  %v3587_v30 = vld [vmem:[#allocation7 + $0x50] sm:$0xff] }
 0x3b8   :  { %3798 = vmatmul.mubr.f32.gmra.mxu0 %v3582_v34 }
 0x3ba   :  { %v3386_v16 = vpop.permute.xlu0 %3385 }
 0x3bb   :  { %v3314_v44 = vpop.permute.xlu1 %3313  ;;  %3409 = vst.msk [vmem:[#allocation7 + $0x80] sm:$0xff] %vm800_vm3, %v3386_v16 }
 0x3bc   :  { %3337 = vst.msk [vmem:[#allocation7 + $0x78] sm:$0xff] %vm800_vm3, %v3314_v44 }
 0x3be   :  { %v3388_v45 = vpop.permute.xlu0 %3387  ;;  %v3588_v1 = vld [vmem:[#allocation7 + $0x58] sm:$0xff] }
 0x3bf   :  { %3410 = vst.msk [vmem:[#allocation7 + $0xa8] sm:$0xff] %vm800_vm3, %v3388_v45  ;;  %3802 = vmatprep.mubr.f32.mxu0 %v3588_v1 }
 0x3c0   :  { %v3316_v31 = vpop.permute.xlu1 %3315  ;;  %3803 = vmatmul.mubr.f32.gmra.mxu0 %v3587_v30 }
 0x3c1   :  { %3338 = vst.msk [vmem:[#allocation7 + $0xa0] sm:$0xff] %vm800_vm3, %v3316_v31 }
 0x3c2   :  { %v3593_v24 = vld [vmem:[#allocation7 + $0x80] sm:$0xff] }
 0x3c3   :  { %v3592_v18 = vld [vmem:[#allocation7 + $0x78] sm:$0xff]  ;;  %3807 = vmatprep.mubr.f32.mxu0 %v3593_v24 }
 0x3c4   :  { %v3318_v60 = vpop.permute.xlu1 %3317  ;;  %3808 = vmatmul.mubr.f32.gmra.mxu0 %v3592_v18 }
 0x3c5   :  { %3339 = vst.msk [vmem:[#allocation7 + $0xc8] sm:$0xff] %vm800_vm3, %v3318_v60 }
 0x3c6   :  { %v3598_v4 = vld [vmem:[#allocation7 + $0xa8] sm:$0xff] }
 0x3c7   :  { %3812 = vmatprep.mubr.f32.mxu0 %v3598_v4 }
 0x3c8   :  { %v3597_v10 = vld [vmem:[#allocation7 + $0xa0] sm:$0xff] }
 0x3c9   :  { %3813 = vmatmul.mubr.f32.gmra.mxu0 %v3597_v10 }
 0x3cc   :  { %v3602_v23 = vld [vmem:[#allocation7 + $0xc8] sm:$0xff] }
 0x3ce   :  { %v3390_v11 = vpop.permute.xlu0 %3389 }
 0x3cf   :  { %3411 = vst.msk [vmem:[#allocation7 + $0xd0] sm:$0xff] %vm800_vm3, %v3390_v11 }
 0x3d2   :  { %v3392_v15 = vpop.permute.xlu0 %3391 }
 0x3d3   :  { %v3320_v29 = vpop.permute.xlu1 %3319  ;;  %3412 = vst.msk [vmem:[#allocation7 + $0xf8] sm:$0xff] %vm800_vm3, %v3392_v15 }
 0x3d4   :  { %3340 = vst.msk [vmem:[#allocation7 + $0xf0] sm:$0xff] %vm800_vm3, %v3320_v29 }
 0x3d6   :  { %v3603_v28 = vld [vmem:[#allocation7 + $0xd0] sm:$0xff] }
 0x3d7   :  { %3817 = vmatprep.mubr.f32.mxu0 %v3603_v28 }
 0x3d8   :  { %3818 = vmatmul.mubr.f32.gmra.mxu0 %v3602_v23 }
 0x3d9   :  { %v3322_v26 = vpop.permute.xlu1 %3321 }
 0x3da   :  { %3341 = vst.msk [vmem:[#allocation7 + $0x118] sm:$0xff] %vm800_vm3, %v3322_v26  ;;  %v3608_v40 = vld [vmem:[#allocation7 + $0xf8] sm:$0xff] }
 0x3db   :  { %v3607_v13 = vld [vmem:[#allocation7 + $0xf0] sm:$0xff]  ;;  %3822 = vmatprep.mubr.f32.mxu0 %v3608_v40 }
 0x3dc   :  { %3823 = vmatmul.mubr.f32.gmra.mxu0 %v3607_v13  ;;  %v4196_v40 = vld [vmem:[%s7451_s7 + $0xf8] sm:$0xff] }
 0x3dd   :  { %v4180_v13 = vld [vmem:[%s7451_s7 + $0x78] sm:$0xff]  ;;  %4825 = vmatprep.subr.mxu0 %v4196_v40 }
 0x3de   :  { %v4200_v40 = vld [vmem:[%s7451_s7 + $0x118] sm:$0xff] }
 0x3df   :  { %v3394_v35 = vpop.permute.xlu0 %3393 }
 0x3e0   :  { %v3324_v14 = vpop.permute.xlu1 %3323  ;;  %3413 = vst.msk [vmem:[#allocation7 + $0x120] sm:$0xff] %vm800_vm3, %v3394_v35  ;;  %v4228_v35 = vld [vmem:[%s7451_s7 + $0x1f8] sm:$0xff] }
 0x3e1   :  { %3342 = vst.msk [vmem:[#allocation7 + $0x140] sm:$0xff] %vm800_vm3, %v3324_v14  ;;  %v3612_v39 = vld [vmem:[#allocation7 + $0x118] sm:$0xff]  ;;  %4860 = vmatprep.subr.mxu1 %v4228_v35  ;;  %v4195_v14 = vld [vmem:[%s7451_s7 + $0xf0] sm:$0xff] }
 0x3e2   :  { %v4215_v35 = vld [vmem:[%s7451_s7 + $0x190] sm:$0xff] }
 0x3e3   :  { %v3396_v22 = vpop.permute.xlu0 %3395 }
 0x3e4   :  { %v3452_v36 = vpop.permute.xlu1 %3451  ;;  %3414 = vst.msk [vmem:[#allocation7 + $0x148] sm:$0xff] %vm800_vm3, %v3396_v22  ;;  %v4212_v22 = vld [vmem:[%s7451_s7 + $0x178] sm:$0xff] }
 0x3e5   :  { %3478 = vst.msk [vmem:[#allocation7 + $0x10] sm:$0xff] %vm800_vm3, %v3452_v36  ;;  %v4179_v36 = vld [vmem:[%s7451_s7 + $0x70] sm:$0xff]  ;;  %4861 = vmatpush3.msra.mxu1 %v4212_v22 }
 0x3e6   :  { %v4199_v22 = vld [vmem:[%s7451_s7 + $0x110] sm:$0xff] }
 0x3e7   :  { %v3524_v43 = vpop.permute.xlu0 %3523  ;;  %v3613_v53 = vld [vmem:[#allocation7 + $0x120] sm:$0xff] }
 0x3e8   :  { %3550 = vst.msk [vmem:[#allocation7 + $0x18] sm:$0xff] %vm800_vm3, %v3524_v43  ;;  %v3454_v46 = vpop.permute.xlu1 %3453  ;;  %3827 = vmatprep.mubr.f32.mxu0 %v3613_v53  ;;  %v3617_v27 = vld [vmem:[#allocation7 + $0x140] sm:$0xff]  ;;  %v4227_v53 = vld [vmem:[%s7451_s7 + $0x1f0] sm:$0xff] }
 0x3e9   :  { %3479 = vst.msk [vmem:[#allocation7 + $0x38] sm:$0xff] %vm800_vm3, %v3454_v46  ;;  %3828 = vmatmul.mubr.f32.gmra.mxu0 %v3612_v39  ;;  %v4194_v43 = vld [vmem:[%s7451_s7 + $0xe8] sm:$0xff]  ;;  %4862 = vmatprep.subr.mxu1 %v4227_v53  ;;  %v4211_v39 = vld [vmem:[%s7451_s7 + $0x170] sm:$0xff] }
 0x3ea   :  { %v4178_v46 = vld [vmem:[%s7451_s7 + $0x68] sm:$0xff]  ;;  %4863 = vmatpush3.msra.mxu1 %v4211_v39 }
 0x3eb   :  { %v3526_v17 = vpop.permute.xlu0 %3525  ;;  %v3618_v2 = vld [vmem:[#allocation7 + $0x148] sm:$0xff]  ;;  %v4214_v53 = vld [vmem:[%s7451_s7 + $0x188] sm:$0xff] }
 0x3ec   :  { %3551 = vst.msk [vmem:[#allocation7 + $0x40] sm:$0xff] %vm800_vm3, %v3526_v17  ;;  %v3456_v47 = vpop.permute.xlu1 %3455  ;;  %3832 = vmatprep.mubr.f32.mxu0 %v3618_v2  ;;  %v3579_v37 = vld [vmem:[#allocation7 + $0x10] sm:$0xff]  ;;  %v4226_v17 = vld [vmem:[%s7451_s7 + $0x1e8] sm:$0xff]  ;;  %v4193_v2 = vld [vmem:[%s7451_s7 + $0xe0] sm:$0xff] }
 0x3ed   :  { %3480 = vst.msk [vmem:[#allocation7 + $0x60] sm:$0xff] %vm800_vm3, %v3456_v47  ;;  %3833 = vmatmul.mubr.f32.gmra.mxu0 %v3617_v27  ;;  %v4210_v47 = vld [vmem:[%s7451_s7 + $0x168] sm:$0xff]  ;;  %4864 = vmatprep.subr.mxu1 %v4226_v17  ;;  %v4177_v27 = vld [vmem:[%s7451_s7 + $0x60] sm:$0xff] }
 0x3ee   :  { %4865 = vmatpush3.msra.mxu1 %v4210_v47  ;;  %v4198_v39 = vld [vmem:[%s7451_s7 + $0x108] sm:$0xff]  ;;  %v4213_v47 = vld [vmem:[%s7451_s7 + $0x180] sm:$0xff] }
 0x3ef   :  { %v3528_v59 = vpop.permute.xlu0 %3527  ;;  %v3580_v50 = vld [vmem:[#allocation7 + $0x18] sm:$0xff] }
 0x3f0   :  { %3552 = vst.msk [vmem:[#allocation7 + $0x68] sm:$0xff] %vm800_vm3, %v3528_v59  ;;  %v3458_v20 = vpop.permute.xlu1 %3457  ;;  %3902 = vmatprep.mubr.f32.mxu0 %v3580_v50  ;;  %v3584_v12 = vld [vmem:[#allocation7 + $0x38] sm:$0xff] }
 0x3f1   :  { %3481 = vst.msk [vmem:[#allocation7 + $0x88] sm:$0xff] %vm800_vm3, %v3458_v20  ;;  %3903 = vmatmul.mubr.f32.vlgmr.msra.gmra.mxu0 %v3579_v37  ;;  %v4225_v59 = vld [vmem:[%s7451_s7 + $0x1e0] sm:$0xff]  ;;  %v4192_v20 = vld [vmem:[%s7451_s7 + $0xd8] sm:$0xff] }
 0x3f2   :  { %4826 = vmatpush3.msra.mxu0 %v4180_v13  ;;  %v4209_v50 = vld [vmem:[%s7451_s7 + $0x160] sm:$0xff]  ;;  %v4224_v37 = vld [vmem:[%s7451_s7 + $0x1d8] sm:$0xff]  ;;  %4866 = vmatprep.subr.mxu1 %v4225_v59  ;;  %v4183_v13 = vld [vmem:[%s7451_s7 + $0x90] sm:$0xff] }
 0x3f3   :  { %v3530_v52 = vpop.permute.xlu0 %3529  ;;  %v3585_v32 = vld [vmem:[#allocation7 + $0x40] sm:$0xff]  ;;  %4827 = vmatprep.subr.mxu0 %v4195_v14  ;;  %4867 = vmatpush3.msra.mxu1 %v4209_v50  ;;  %v4167_v14 = vld [vmem:[%s7451_s7 + $0x10] sm:$0xff]  ;;  %v4197_v59 = vld [vmem:[%s7451_s7 + $0x100] sm:$0xff] }
 0x3f4   :  { %3553 = vst.msk [vmem:[#allocation7 + $0x90] sm:$0xff] %vm800_vm3, %v3530_v52  ;;  %v3460_v3 = vpop.permute.xlu1 %3459  ;;  %3907 = vmatprep.mubr.f32.mxu0 %v3585_v32  ;;  %v3589_v33 = vld [vmem:[#allocation7 + $0x60] sm:$0xff]  ;;  %4828 = vmatpush3.msra.mxu0 %v4179_v36  ;;  %v4176_v52 = vld [vmem:[%s7451_s7 + $0x58] sm:$0xff] }
 0x3f5   :  { %3482 = vst.msk [vmem:[#allocation7 + $0xb0] sm:$0xff] %vm800_vm3, %v3460_v3  ;;  %3908 = vmatmul.mubr.f32.gmra.mxu0 %v3584_v12  ;;  %4829 = vmatprep.subr.mxu0 %v4194_v43  ;;  %v4208_v32 = vld [vmem:[%s7451_s7 + $0x158] sm:$0xff]  ;;  %v4191_v3 = vld [vmem:[%s7451_s7 + $0xd0] sm:$0xff]  ;;  %v4182_v43 = vld [vmem:[%s7451_s7 + $0x88] sm:$0xff] }
 0x3f6   :  { %4830 = vmatpush3.msra.mxu0 %v4178_v46  ;;  %v4223_v12 = vld [vmem:[%s7451_s7 + $0x1d0] sm:$0xff]  ;;  %4868 = vmatprep.subr.mxu1 %v4224_v37  ;;  %v4166_v46 = vld [vmem:[%s7451_s7 + $0x8] sm:$0xff] }
 0x3f7   :  { %v3532_v54 = vpop.permute.xlu0 %3531  ;;  %v3590_v51 = vld [vmem:[#allocation7 + $0x68] sm:$0xff]  ;;  %4831 = vmatprep.subr.mxu0 %v4193_v2  ;;  %4869 = vmatpush3.msra.mxu1 %v4208_v32  ;;  %v4181_v2 = vld [vmem:[%s7451_s7 + $0x80] sm:$0xff] }
 0x3f8   :  { %3554 = vst.msk [vmem:[#allocation7 + $0xb8] sm:$0xff] %vm800_vm3, %v3532_v54  ;;  %v3462_v56 = vpop.permute.xlu1 %3461  ;;  %3912 = vmatprep.mubr.f32.mxu0 %v3590_v51  ;;  %v3594_v55 = vld [vmem:[#allocation7 + $0x88] sm:$0xff]  ;;  %4832 = vmatpush3.msra.mxu0 %v4177_v27  ;;  %v4165_v27 = vld [vmem:[%s7451_s7] sm:$0xff] }
 0x3f9   :  { %3483 = vst.msk [vmem:[#allocation7 + $0xd8] sm:$0xff] %vm800_vm3, %v3462_v56  ;;  %3913 = vmatmul.mubr.f32.gmra.mxu0 %v3589_v33  ;;  %4833 = vmatprep.subr.mxu0 %v4192_v20  ;;  %v4175_v54 = vld [vmem:[%s7451_s7 + $0x50] sm:$0xff]  ;;  %v4190_v56 = vld [vmem:[%s7451_s7 + $0xc8] sm:$0xff] }
 0x3fa   :  { %v4207_v51 = vld [vmem:[%s7451_s7 + $0x150] sm:$0xff]  ;;  %4834 = vmatpush3.msra.mxu0 %v4176_v52  ;;  %v4222_v33 = vld [vmem:[%s7451_s7 + $0x1c8] sm:$0xff]  ;;  %4870 = vmatprep.subr.mxu1 %v4223_v12 }
 0x3fb   :  { %v3534_v41 = vpop.permute.xlu0 %3533  ;;  %v3595_v6 = vld [vmem:[#allocation7 + $0x90] sm:$0xff]  ;;  %4835 = vmatprep.subr.mxu0 %v4191_v3  ;;  %4871 = vmatpush3.msra.mxu1 %v4207_v51 }
 0x3fc   :  { %3555 = vst.msk [vmem:[#allocation7 + $0xe0] sm:$0xff] %vm800_vm3, %v3534_v41  ;;  %v3464_v21 = vpop.permute.xlu1 %3463  ;;  %3917 = vmatprep.mubr.f32.mxu0 %v3595_v6  ;;  %v3599_v61 = vld [vmem:[#allocation7 + $0xb0] sm:$0xff]  ;;  %v4174_v41 = vld [vmem:[%s7451_s7 + $0x48] sm:$0xff]  ;;  %4836 = vmatpush3.msra.mxu0 %v4175_v54 }
 0x3fd   :  { %3484 = vst.msk [vmem:[#allocation7 + $0x100] sm:$0xff] %vm800_vm3, %v3464_v21  ;;  %3918 = vmatmul.mubr.f32.gmra.mxu0 %v3594_v55  ;;  %v4206_v6 = vld [vmem:[%s7451_s7 + $0x148] sm:$0xff]  ;;  %v4189_v21 = vld [vmem:[%s7451_s7 + $0xc0] sm:$0xff]  ;;  %4837 = vmatprep.subr.mxu0 %v4190_v56 }
 0x3fe   :  { %v4221_v55 = vld [vmem:[%s7451_s7 + $0x1c0] sm:$0xff]  ;;  %4872 = vmatprep.subr.mxu1 %v4222_v33  ;;  %4838 = vmatpush3.msra.mxu0 %v4174_v41 }
 0x3ff   :  { %v3536_v0 = vpop.permute.xlu0 %3535  ;;  %v3600_v19 = vld [vmem:[#allocation7 + $0xb8] sm:$0xff]  ;;  %4873 = vmatpush3.msra.mxu1 %v4206_v6  ;;  %4839 = vmatprep.subr.mxu0 %v4189_v21 }
 0x400   :  { %3556 = vst.msk [vmem:[#allocation7 + $0x108] sm:$0xff] %vm800_vm3, %v3536_v0  ;;  %v3466_v7 = vpop.permute.xlu1 %3465  ;;  %3922 = vmatprep.mubr.f32.mxu0 %v3600_v19  ;;  %v3604_v8 = vld [vmem:[#allocation7 + $0xd8] sm:$0xff]  ;;  %4874 = vmatprep.subr.mxu1 %v4221_v55 }
 0x401   :  { %3485 = vst.msk [vmem:[#allocation7 + $0x128] sm:$0xff] %vm800_vm3, %v3466_v7  ;;  %3923 = vmatmul.mubr.f32.gmra.mxu0 %v3599_v61  ;;  %v4173_v61 = vld [vmem:[%s7451_s7 + $0x40] sm:$0xff]  ;;  %v4188_v7 = vld [vmem:[%s7451_s7 + $0xb8] sm:$0xff] }
 0x402   :  { %v4205_v0 = vld [vmem:[%s7451_s7 + $0x140] sm:$0xff]  ;;  %4840 = vmatpush3.msra.mxu0 %v4173_v61 }
 0x403   :  { %v3538_v58 = vpop.permute.xlu0 %3537  ;;  %v3605_v5 = vld [vmem:[#allocation7 + $0xe0] sm:$0xff]  ;;  %4875 = vmatpush3.msra.mxu1 %v4205_v0  ;;  %4841 = vmatprep.subr.mxu0 %v4188_v7  ;;  %v7346_v61 = vld [vmem:[%s7450_s6] ss:$0 sm:$0xff] }
 0x404   :  { %3557 = vst.msk [vmem:[#allocation7 + $0x130] sm:$0xff] %vm800_vm3, %v3538_v58  ;;  %3927 = vmatprep.mubr.f32.mxu0 %v3605_v5  ;;  %v3468_v38 = vpop.permute.xlu1 %3467  ;;  %v3609_v25 = vld [vmem:[#allocation7 + $0x100] sm:$0xff]  ;;  %v4220_v58 = vld [vmem:[%s7451_s7 + $0x1b8] sm:$0xff] }
 0x405   :  { %3928 = vmatmul.mubr.f32.gmra.mxu0 %v3604_v8  ;;  %3486 = vst.msk [vmem:[#allocation7 + $0x150] sm:$0xff] %vm800_vm3, %v3468_v38  ;;  %v7117_v63 = vpop.f32.mrf.mxu1  ;;  %v4172_v5 = vld [vmem:[%s7451_s7 + $0x38] sm:$0xff]  ;;  %v4187_v38 = vld [vmem:[%s7451_s7 + $0xb0] sm:$0xff]  ;;  %4876 = vmatprep.subr.mxu1 %v4220_v58 }
 0x406   :  { %v4204_v8 = vld [vmem:[%s7451_s7 + $0x138] sm:$0xff]  ;;  %4842 = vmatpush3.msra.mxu0 %v4172_v5 }
 0x407   :  { %v3540_v9 = vpop.permute.xlu0 %3539  ;;  %v3610_v49 = vld [vmem:[#allocation7 + $0x108] sm:$0xff]  ;;  %v5064_v48 = vpop.f32.mrf.mxu1  ;;  %4877 = vmatpush3.msra.mxu1 %v4204_v8  ;;  %4843 = vmatprep.subr.mxu0 %v4187_v38 }
 0x408   :  { %3558 = vst.msk [vmem:[#allocation7 + $0x158] sm:$0xff] %vm800_vm3, %v3540_v9  ;;  %3932 = vmatprep.mubr.f32.mxu0 %v3610_v49  ;;  %v3614_v57 = vld [vmem:[#allocation7 + $0x128] sm:$0xff] }
 0x409   :  { %3933 = vmatmul.mubr.f32.gmra.mxu0 %v3609_v25  ;;  %v4219_v9 = vld [vmem:[%s7451_s7 + $0x1b0] sm:$0xff] }
 0x40a   :  { %v4171_v49 = vld [vmem:[%s7451_s7 + $0x30] sm:$0xff]  ;;  %4878 = vmatprep.subr.mxu1 %v4219_v9 }
 0x40b   :  { %v3615_v62 = vld [vmem:[#allocation7 + $0x130] sm:$0xff]  ;;  %v4203_v48 = vld [vmem:[%s7451_s7 + $0x130] sm:$0xff]  ;;  %4844 = vmatpush3.msra.mxu0 %v4171_v49 }
 0x40c   :  { %3937 = vmatprep.mubr.f32.mxu0 %v3615_v62  ;;  %v3619_v34 = vld [vmem:[#allocation7 + $0x150] sm:$0xff]  ;;  %v4186_v62 = vld [vmem:[%s7451_s7 + $0xa8] sm:$0xff]  ;;  %4879 = vmatpush3.msra.mxu1 %v4203_v48 }
 0x40d   :  { %3938 = vmatmul.mubr.f32.gmra.mxu0 %v3614_v57  ;;  %v4218_v57 = vld [vmem:[%s7451_s7 + $0x1a8] sm:$0xff]  ;;  %4845 = vmatprep.subr.mxu0 %v4186_v62 }
 0x40e   :  { %4880 = vmatprep.subr.mxu1 %v4218_v57 }
 0x40f   :  { %v3620_v16 = vld [vmem:[#allocation7 + $0x158] sm:$0xff]  ;;  %v7120_v44 = vpop.f32.mrf.mxu1 }
 0x410   :  { %3942 = vmatprep.mubr.f32.mxu0 %v3620_v16  ;;  %v4202_v16 = vld [vmem:[%s7451_s7 + $0x128] sm:$0xff] }
 0x411   :  { %3943 = vmatmul.mubr.f32.gmra.mxu0 %v3619_v34  ;;  %v5067_v45 = vpop.f32.mrf.mxu1  ;;  %v7232_v19 = vpop.f32.mrf.mxu0  ;;  %v4170_v34 = vld [vmem:[%s7451_s7 + $0x28] sm:$0xff]  ;;  %4881 = vmatpush3.msra.mxu1 %v4202_v16 }
 0x412   :  { %v4185_v45 = vld [vmem:[%s7451_s7 + $0xa0] sm:$0xff]  ;;  %4846 = vmatpush3.msra.mxu0 %v4170_v34 }
 0x413   :  { %v7122_v31 = vpop.f32.mrf.mxu1  ;;  %v7258_v25 = vpop.f32.mrf.mxu0  ;;  %4847 = vmatprep.subr.mxu0 %v4185_v45 }
 0x414   :  { %v4724_v21 = vadd.f32 %v7258_v25, %v7232_v19 }
 0x415   :  { %v5070_v1 = vpop.f32.mrf.mxu1 }
 0x416   :  { %v4217_v1 = vld [vmem:[%s7451_s7 + $0x1a0] sm:$0xff]  ;;  %v3795_v7 = vadd.f32 %v4724_v21, %v7346_v61 }
 0x417   :  { %v7124_v30 = vpop.f32.mrf.mxu1  ;;  %4882 = vmatprep.subr.mxu1 %v4217_v1 }
 0x419   :  { %v5073_v24 = vpop.f32.mrf.mxu1 }
 0x41a   :  { %v4169_v24 = vld [vmem:[%s7451_s7 + $0x20] sm:$0xff] }
 0x41b   :  { %4848 = vmatpush3.msra.mxu0 %v4169_v24 }
 0x424   :  { %v7126_v18 = vpop.f32.mrf.mxu1 }
 0x426   :  { %v5076_v60 = vpop.f32.mrf.mxu1 }
 0x427   :  { %v4201_v60 = vld [vmem:[%s7451_s7 + $0x120] sm:$0xff] }
 0x428   :  { %4883 = vmatpush3.msra.mxu1 %v4201_v60 }
 0x42a   :  { %v7128_v4 = vpop.f32.mrf.mxu1 }
 0x42c   :  { %v5079_v10 = vpop.f32.mrf.mxu1 }
 0x435   :  { %v7130_v11 = vpop.f32.mrf.mxu1 }
 0x437   :  { %v5082_v15 = vpop.f32.mrf.mxu1 }
 0x438   :  { %v4184_v15 = vld [vmem:[%s7451_s7 + $0x98] sm:$0xff] }
 0x439   :  { %v7132_v29 = vpop.f32.mrf.mxu1  ;;  %4849 = vmatprep.subr.mxu0 %v4184_v15 }
 0x43b   :  { %v5085_v23 = vpop.f32.mrf.mxu1 }
 0x43c   :  { %v4216_v23 = vld [vmem:[%s7451_s7 + $0x198] sm:$0xff] }
 0x43d   :  { %v7134_v28 = vpop.f32.mrf.mxu1  ;;  %4884 = vmatprep.subr.mxu1 %v4216_v23 }
 0x43e   :  { %4885 = vmatpush3.msra.mxu1 %v4200_v40 }
 0x43f   :  { %v5088_v26 = vpop.f32.mrf.mxu1  ;;  %4886 = vmatprep.subr.mxu1 %v4215_v35 }
 0x440   :  { %v4168_v26 = vld [vmem:[%s7451_s7 + $0x18] sm:$0xff]  ;;  %4887 = vmatpush3.msra.mxu1 %v4199_v22 }
 0x441   :  { %4850 = vmatpush3.msra.mxu0 %v4168_v26  ;;  %4888 = vmatprep.subr.mxu1 %v4214_v53 }
 0x442   :  { %4851 = vmatprep.subr.mxu0 %v4183_v13  ;;  %4889 = vmatpush3.msra.mxu1 %v4198_v39 }
 0x443   :  { %4852 = vmatpush3.msra.mxu0 %v4167_v14  ;;  %4890 = vmatprep.subr.mxu1 %v4213_v47 }
 0x444   :  { %4853 = vmatprep.subr.mxu0 %v4182_v43  ;;  %4891 = vmatpush3.msra.mxu1 %v4197_v59 }
 0x445   :  { %4854 = vmatpush3.msra.mxu0 %v4166_v46 }
 0x446   :  { %4855 = vmatprep.subr.mxu0 %v4181_v2 }
 0x447   :  { %4856 = vmatpush3.msra.mxu0 %v4165_v27 }
 0x448   :  { %5089 = vmatprep.subr.mxu0 %v5210_v42 }
 0x478   :  { %v4725_v10 = vpop.f32.mrf.mxu0 }
 0x47a   :  { %v4726_v36 = vpop.f32.mrf.mxu0 }
 0x47b   :  { %v4727_v58 = vadd.f32 %v4726_v36, %v4725_v10 }
 0x47d   :  { %v3800_v49 = vadd.f32 %v4727_v58, %v7346_v61 }
 0x480   :  { %v4728_v17 = vpop.f32.mrf.mxu0 }
 0x482   :  { %v4729_v50 = vpop.f32.mrf.mxu0 }
 0x483   :  { %v4730_v48 = vadd.f32 %v4729_v50, %v4728_v17 }
 0x484   :  { %v4731_v20 = vpop.f32.mrf.mxu0 }
 0x485   :  { %v3805_v45 = vadd.f32 %v4730_v48, %v7346_v61 }
 0x486   :  { %v4732_v37 = vpop.f32.mrf.mxu0 }
 0x487   :  { %v4733_v1 = vadd.f32 %v4732_v37, %v4731_v20 }
 0x489   :  { %v4734_v52 = vpop.f32.mrf.mxu0  ;;  %v3810_v40 = vadd.f32 %v4733_v1, %v7346_v61 }
 0x48b   :  { %v4735_v32 = vpop.f32.mrf.mxu0 }
 0x48c   :  { %v4736_v13 = vadd.f32 %v4735_v32, %v4734_v52 }
 0x48e   :  { %v3815_v46 = vadd.f32 %v4736_v13, %v7346_v61 }
 0x498   :  { %v4737_v3 = vpop.f32.mrf.mxu0 }
 0x49a   :  { %v4738_v12 = vpop.f32.mrf.mxu0 }
 0x49b   :  { %v4739_v43 = vadd.f32 %v4738_v12, %v4737_v3 }
 0x49c   :  { %v4740_v54 = vpop.f32.mrf.mxu0 }
 0x49d   :  { %v3820_v27 = vadd.f32 %v4739_v43, %v7346_v61 }
 0x49e   :  { %v4741_v51 = vpop.f32.mrf.mxu0 }
 0x49f   :  { %v4742_v59 = vadd.f32 %v4741_v51, %v4740_v54 }
 0x4a9   :  { %v7333_v56 = vpop.f32.mrf.mxu0 }
 0x4ab   :  { %v7335_v33 = vpop.f32.mrf.mxu0 }
 0x4ac   :  { %v4745_v58 = vadd.f32 %v7335_v33, %v7333_v56 }
 0x4ad   :  { %v7337_v41 = vpop.f32.mrf.mxu0 }
 0x4af   :  { %v7339_v6 = vpop.f32.mrf.mxu0 }
 0x4b0   :  { %v4748_v56 = vadd.f32 %v7339_v6, %v7337_v41 }
 0x4b1   :  { %v4781_v55 = vpop.f32.mrf.mxu0 }
 0x4b3   :  { %v4782_v0 = vpop.f32.mrf.mxu0 }
 0x4b4   :  { %v4783_v5 = vadd.f32 %v4782_v0, %v4781_v55 }
 0x4b5   :  { %v4784_v8 = vpop.f32.mrf.mxu0 }
 0x4b6   :  { %v3905_v38 = vadd.f32 %v4783_v5, %v3795_v7  ;;  %v3825_v7 = vadd.f32 %v4742_v59, %v7346_v61 }
 0x4b7   :  { %v4785_v9 = vpop.f32.mrf.mxu0 }
 0x4b8   :  { %v4015_v62 = vadd.f32 %v7117_v63, %v3905_v38  ;;  %v4786_v19 = vadd.f32 %v4785_v9, %v4784_v8 }
 0x4b9   :  { %v4787_v25 = vpop.f32.mrf.mxu0 }
 0x4ba   :  { %v4058_v57 = vmax.f32 %v4015_v62, 0.0  ;;  %v3910_v34 = vadd.f32 %v4786_v19, %v3800_v49 }
 0x4bb   :  { %v4788_v16 = vpop.f32.mrf.mxu0 }
 0x4bc   :  { %4067 = vst [vmem:[#allocation8] sm:$0xff] %v4058_v57  ;;  %v4020_v24 = vadd.f32 %v7120_v44, %v3910_v34  ;;  %v4789_v60 = vadd.f32 %v4788_v16, %v4787_v25 }
 0x4bd   :  { %v4790_v10 = vpop.f32.mrf.mxu0 }
 0x4be   :  { %v4059_v15 = vmax.f32 %v4020_v24, 0.0  ;;  %v3915_v23 = vadd.f32 %v4789_v60, %v3805_v45 }
 0x4bf   :  { %v4791_v26 = vpop.f32.mrf.mxu0 }
 0x4c0   :  { %4068 = vst [vmem:[#allocation8 + $0x8] sm:$0xff] %v4059_v15  ;;  %v4025_v63 = vadd.f32 %v7122_v31, %v3915_v23  ;;  %v4792_v35 = vadd.f32 %v4791_v26, %v4790_v10 }
 0x4c1   :  { %v4793_v14 = vpop.f32.mrf.mxu0 }
 0x4c2   :  { %v4060_v22 = vmax.f32 %v4025_v63, 0.0  ;;  %v3920_v36 = vadd.f32 %v4792_v35, %v3810_v40  ;;  %v3835_v40 = vadd.f32 %v4748_v56, %v7346_v61  ;;  %v4410_v56 = vld [vmem:[%s7453_s9 + $0x58] sm:$0xff] }
 0x4c3   :  { %v4794_v53 = vpop.f32.mrf.mxu0 }
 0x4c4   :  { %4069 = vst [vmem:[#allocation8 + $0x10] sm:$0xff] %v4060_v22  ;;  %v4030_v44 = vadd.f32 %v7124_v30, %v3920_v36  ;;  %v4795_v39 = vadd.f32 %v4794_v53, %v4793_v14 }
 0x4c5   :  { %v4796_v17 = vpop.f32.mrf.mxu0 }
 0x4c6   :  { %v4061_v2 = vmax.f32 %v4030_v44, 0.0  ;;  %v3925_v47 = vadd.f32 %v4795_v39, %v3815_v46 }
 0x4c7   :  { %v4085_v50 = vld [vmem:[#allocation8 + $0x1] sm:$0xff]  ;;  %v4797_v37 = vpop.f32.mrf.mxu0 }
 0x4c8   :  { %v4103_v31 = vld [vmem:[#allocation8 + $0x6] sm:$0xff]  ;;  %v4094_v52 = vmax.f32 %v4058_v57, %v4085_v50  ;;  %4070 = vst [vmem:[#allocation8 + $0x18] sm:$0xff] %v4061_v2  ;;  %v4035_v3 = vadd.f32 %v7126_v18, %v3925_v47  ;;  %v4798_v12 = vadd.f32 %v4797_v37, %v4796_v17  ;;  %v3830_v57 = vadd.f32 %v4745_v58, %v7346_v61 }
 0x4c9   :  { %v4112_v20 = vld [vmem:[#allocation8 + $0x7] sm:$0xff]  ;;  %v4799_v21 = vpop.f32.mrf.mxu0 }
 0x4ca   :  { %v4121_v32 = vmax.f32 %v4103_v31, %v4112_v20  ;;  %v4062_v30 = vmax.f32 %v4035_v3, 0.0  ;;  %v3930_v0 = vadd.f32 %v4798_v12, %v3820_v27 }
 0x4cb   :  { %v4086_v54 = vld [vmem:[#allocation8 + $0x9] sm:$0xff]  ;;  %v4800_v8 = vpop.f32.mrf.mxu0 }
 0x4cc   :  { %v4130_v55 = vmax.f32 %v4094_v52, %v4121_v32  ;;  %v4104_v51 = vld [vmem:[#allocation8 + $0xe] sm:$0xff]  ;;  %v4095_v38 = vmax.f32 %v4059_v15, %v4086_v54  ;;  %4071 = vst [vmem:[#allocation8 + $0x20] sm:$0xff] %v4062_v30  ;;  %v4040_v18 = vadd.f32 %v7128_v4, %v3930_v0  ;;  %v4801_v49 = vadd.f32 %v4800_v8, %v4799_v21 }
 0x4cd   :  { %v4113_v5 = vld [vmem:[#allocation8 + $0xf] sm:$0xff]  ;;  %v4802_v48 = vpop.f32.mrf.mxu0  ;;  %v5212_v30 = vmov 1983009808  }
 0x4ce   :  { %4139 = vst [vmem:[#allocation9] sm:$0xff] %v4130_v55  ;;  %v4122_v9 = vmax.f32 %v4104_v51, %v4113_v5  ;;  %v4063_v19 = vmax.f32 %v4040_v18, 0.0  ;;  %v3935_v25 = vadd.f32 %v4801_v49, %v3825_v7  ;;  %v4239_v0 = vunpack.c.l.s4 %v5212_v30 }
 0x4cf   :  { %v4087_v33 = vld [vmem:[#allocation8 + $0x11] sm:$0xff]  ;;  %v4803_v45 = vpop.f32.mrf.mxu0  ;;  %v4241_v7 = vlaneseq }
 0x4d0   :  { %v4131_v62 = vmax.f32 %v4095_v38, %v4122_v9  ;;  %v4105_v34 = vld [vmem:[#allocation8 + $0x16] sm:$0xff]  ;;  %v4096_v1 = vmax.f32 %v4060_v22, %v4087_v33  ;;  %4072 = vst [vmem:[#allocation8 + $0x28] sm:$0xff] %v4063_v19  ;;  %v4045_v4 = vadd.f32 %v7130_v11, %v3935_v25  ;;  %v4804_v60 = vadd.f32 %v4803_v45, %v4802_v48  ;;  %v4414_v48 = vld [vmem:[%s7453_s9 + $0x78] sm:$0xff]  ;;  %v4409_v33 = vld [vmem:[%s7453_s9 + $0x50] sm:$0xff] }
 0x4d1   :  { %v4114_v16 = vld [vmem:[#allocation8 + $0x17] sm:$0xff]  ;;  %v4805_v10 = vpop.f32.mrf.mxu0  ;;  %v4240_v54 = vunpack.c.0.s8 %v4239_v0  ;;  %v4242_v51 = vshrl.u32 %v4241_v7, 7  ;;  %v4406_v45 = vld [vmem:[%s7453_s9 + $0x38] sm:$0xff] }
 0x4d2   :  { %4140 = vst [vmem:[#allocation9 + $0x8] sm:$0xff] %v4131_v62  ;;  %v4123_v24 = vmax.f32 %v4105_v34, %v4114_v16  ;;  %v4064_v23 = vmax.f32 %v4045_v4, 0.0  ;;  %v3940_v26 = vadd.f32 %v4804_v60, %v3830_v57  ;;  %v4412_v25 = vld [vmem:[%s7453_s9 + $0x68] sm:$0xff]  ;;  %v4411_v57 = vld [vmem:[%s7453_s9 + $0x60] sm:$0xff]  ;;  %v4402_v60 = vld [vmem:[%s7453_s9 + $0x18] sm:$0xff] }
 0x4d3   :  { %v4806_v13 = vpop.f32.mrf.mxu0  ;;  %v4243_v5 = vsub.s32 %v4240_v54, %v4242_v51  ;;  %v4408_v34 = vld [vmem:[%s7453_s9 + $0x48] sm:$0xff]  ;;  %v4407_v16 = vld [vmem:[%s7453_s9 + $0x40] sm:$0xff] }
 0x4d4   :  { %v4132_v15 = vmax.f32 %v4096_v1, %v4123_v24  ;;  %4073 = vst [vmem:[#allocation8 + $0x30] sm:$0xff] %v4064_v23  ;;  %v4050_v41 = vadd.f32 %v7132_v29, %v3940_v26  ;;  %v4807_v6 = vadd.f32 %v4806_v13, %v4805_v10  ;;  %v4405_v1 = vld [vmem:[%s7453_s9 + $0x30] sm:$0xff]  ;;  %v4404_v24 = vld [vmem:[%s7453_s9 + $0x28] sm:$0xff]  ;;  %v4403_v4 = vld [vmem:[%s7453_s9 + $0x20] sm:$0xff] }
 0x4d5   :  { %v4148_v63 = vld [vmem:[#allocation9 + $0x7] sm:$0x1]  ;;  %v4401_v10 = vld [vmem:[%s7453_s9 + $0x10] sm:$0xff] }
 0x4d6   :  { %4141 = vst [vmem:[#allocation9 + $0x10] sm:$0xff] %v4132_v15  ;;  %4149 = vst [vmem:[#allocation10] sm:$0x1] %v4148_v63  ;;  %v4065_v35 = vmax.f32 %v4050_v41, 0.0  ;;  %v3945_v14 = vadd.f32 %v4807_v6, %v3835_v40  ;;  %v4400_v15 = vld [vmem:[%s7453_s9 + $0x8] sm:$0xff] }
 0x4d7   :  { %v4602_v40 = vld [vmem:[%s7452_s8] ss:$0 sm:$0xff]  ;;  %s5213_s8 = smov [#allocation16]  }
 0x4d8   :  { %4074 = vst [vmem:[#allocation8 + $0x38] sm:$0xff] %v4065_v35  ;;  %v4055_v11 = vadd.f32 %v7134_v28, %v3945_v14  ;;  %s4507_s28 = sshll.u32 %s5213_s8, 4  ;;  %s4508_s28 = int_to_ptr.vmem [resolvable:$true] %s4507_s28 }
 0x4d9   :  { %v4150_v22 = vld [vmem:[#allocation9 + $0x9] sm:$0x1]  ;;  %s5179_s29 = scalar_lea.vmem %s4508_s28, 32  ;;  %p5184_p11 = scmp.lt.s32.totalorder %s4508_s28, %s4508_s28 }
 0x4da   :  { %4151 = vst [vmem:[#allocation10 + $0x2] sm:$0x1] %v4150_v22  ;;  %v4066_v36 = vmax.f32 %v4055_v11, 0.0  ;;  %p5180_p10 = scmp.ne.s32.totalorder %s4508_s28, %s5179_s29  ;;  %p5185_p12 = scmp.lt.s32.totalorder %s5179_s29, %s5179_s29 }
 0x4db   :  { %v4090_v43 = vld [vmem:[#allocation8 + $0x29] sm:$0xff] }
 0x4dc   :  { %v4108_v53 = vld [vmem:[#allocation8 + $0x2e] sm:$0xff]  ;;  %v4099_v61 = vmax.f32 %v4063_v19, %v4090_v43  ;;  %4075 = vst [vmem:[#allocation8 + $0x40] sm:$0xff] %v4066_v36  ;;  %v4413_v19 = vld [vmem:[%s7453_s9 + $0x70] sm:$0xff]  ;;  %p5186_p13 = por %p5185_p12, %p5184_p11 }
 0x4dd   :  { %v4117_v46 = vld [vmem:[#allocation8 + $0x2f] sm:$0xff]  ;;  %v4152_v39 = vld [vmem:[#allocation9 + $0x13] sm:$0x1]  ;;  %v4154_v17 = vld [vmem:[#allocation9 + $0x15] sm:$0x1] }
 0x4de   :  { %v4126_v44 = vmax.f32 %v4108_v53, %v4117_v46  ;;  %4153 = vst [vmem:[#allocation10 + $0x4] sm:$0x1] %v4152_v39  ;;  %4155 = vst [vmem:[#allocation10 + $0x6] sm:$0x1] %v4154_v17  ;;  %v4603_v36 = vld [vmem:[%s7454_s10] ss:$0 sm:$0xff]  ;;  %v4494_v46 = vstv %s4493_s27  ;;  %p5187_p0 = pnand %p5186_p13, %p5180_p10 }
 0x4df   :  { %v4091_v2 = vld [vmem:[#allocation8 + $0x31] sm:$0xff] }
 0x4e0   :  { %v4135_v29 = vmax.f32 %v4099_v61, %v4126_v44  ;;  %v4109_v47 = vld [vmem:[#allocation8 + $0x36] sm:$0xff]  ;;  %v4100_v59 = vmax.f32 %v4064_v23, %v4091_v2  ;;  %v4497_v44 = vstv %s4604_s3 }
 0x4e1   :  { %v4118_v27 = vld [vmem:[#allocation8 + $0x37] sm:$0xff] }
 0x4e2   :  { %4144 = vst [vmem:[#allocation9 + $0x28] sm:$0xff] %v4135_v29  ;;  %v4127_v28 = vmax.f32 %v4109_v47, %v4118_v27  ;;  %v4399_v23 = vld [vmem:[%s7453_s9] sm:$0xff] }
 0x4e3   :  { %v4092_v31 = vld [vmem:[#allocation8 + $0x39] sm:$0xff] }
 0x4e4   :  { %v4136_v50 = vmax.f32 %v4100_v59, %v4127_v28  ;;  %v4110_v20 = vld [vmem:[#allocation8 + $0x3e] sm:$0xff]  ;;  %v4101_v37 = vmax.f32 %v4065_v35, %v4092_v31 }
 0x4e5   :  { %v4119_v52 = vld [vmem:[#allocation8 + $0x3f] sm:$0xff] }
 0x4e6   :  { %4145 = vst [vmem:[#allocation9 + $0x30] sm:$0xff] %v4136_v50  ;;  %v4128_v32 = vmax.f32 %v4110_v20, %v4119_v52 }
 0x4e8   :  { %v4137_v3 = vmax.f32 %v4101_v37, %v4128_v32 }
 0x4e9   :  { %v4156_v12 = vld [vmem:[#allocation9 + $0x2b] sm:$0x1]  ;;  %v4158_v21 = vld [vmem:[#allocation9 + $0x2d] sm:$0x1] }
 0x4ea   :  { %4157 = vst [vmem:[#allocation10 + $0x1] sm:$0x1] %v4156_v12  ;;  %4159 = vst [vmem:[#allocation10 + $0x3] sm:$0x1] %v4158_v21 }
 0x4eb   :  { %4146 = vst [vmem:[#allocation9 + $0x38] sm:$0xff] %v4137_v3 }
 0x4ed   :  { %v4160_v55 = vld [vmem:[#allocation9 + $0x37] sm:$0x1] }
 0x4ee   :  { %4161 = vst [vmem:[#allocation10 + $0x5] sm:$0x1] %v4160_v55 }
 0x4f2   :  { %v4162_v58 = vld [vmem:[#allocation9 + $0x39] sm:$0x1] }
 0x4f3   :  { %4163 = vst [vmem:[#allocation10 + $0x7] sm:$0x1] %v4162_v58 }
 0x4fa   :  { %v4164_v8 = vld [vmem:[#allocation10] sm:$0xff] }
 0x4fb   :  { %v4244_v38 = vrot.slane %v4164_v8, %v4243_v5  ;;  %v4237_v9 = vcombine.high %v4164_v8, %v4164_v8 }
 0x4fd   :  { %v4252_v18 = vcombine.high %v4244_v38, %v4244_v38  ;;  %v4251_v49 = vrot.slane %v4237_v9, %v4243_v5 }
 0x4ff   :  { %4322 = vmatprep.mubr.f32.mxu0 %v4252_v18  ;;  %v4253_v62 = vcombine.high %v4251_v49, %v4251_v49 }
 0x500   :  { %4323 = vmatmul.mubr.f32.vlgmr.msra.gmra.mxu0 %v4244_v38 }
 0x501   :  { %4392 = vmatprep.mubr.f32.mxu1 %v4253_v62  ;;  %5090 = vmatpush3.msra.mxu0 %v4414_v48 }
 0x502   :  { %4393 = vmatmul.mubr.f32.vlgmr.msra.gmra.mxu1 %v4251_v49  ;;  %5091 = vmatprep.subr.mxu0 %v5210_v42 }
 0x503   :  { %5092 = vmatpush3.msra.mxu0 %v4413_v19  ;;  %5121 = vmatprep.mubr.msk.f32.mxu0 %vm5211_vm4, %v5210_v42 }
 0x504   :  { %5093 = vmatprep.subr.mxu0 %v5210_v42 }
 0x505   :  { %5094 = vmatpush3.msra.mxu0 %v4412_v25 }
 0x506   :  { %5095 = vmatprep.subr.mxu0 %v5210_v42 }
 0x507   :  { %5096 = vmatpush3.msra.mxu0 %v4411_v57 }
 0x508   :  { %5097 = vmatprep.subr.mxu0 %v5210_v42 }
 0x509   :  { %5098 = vmatpush3.msra.mxu0 %v4410_v56 }
 0x50a   :  { %5099 = vmatprep.subr.mxu0 %v5210_v42 }
 0x50b   :  { %5100 = vmatpush3.msra.mxu0 %v4409_v33 }
 0x50c   :  { %5101 = vmatprep.subr.mxu0 %v5210_v42 }
 0x50d   :  { %5102 = vmatpush3.msra.mxu0 %v4408_v34 }
 0x50e   :  { %5103 = vmatprep.subr.mxu0 %v5210_v42 }
 0x50f   :  { %5104 = vmatpush3.msra.mxu0 %v4407_v16 }
 0x510   :  { %5105 = vmatprep.subr.mxu0 %v5210_v42 }
 0x511   :  { %5106 = vmatpush3.msra.mxu0 %v4406_v45 }
 0x512   :  { %5107 = vmatprep.subr.mxu0 %v5210_v42 }
 0x513   :  { %5108 = vmatpush3.msra.mxu0 %v4405_v1 }
 0x514   :  { %5109 = vmatprep.subr.mxu0 %v5210_v42 }
 0x515   :  { %5110 = vmatpush3.msra.mxu0 %v4404_v24 }
 0x516   :  { %5111 = vmatprep.subr.mxu0 %v5210_v42 }
 0x517   :  { %5112 = vmatpush3.msra.mxu0 %v4403_v4 }
 0x518   :  { %5113 = vmatprep.subr.mxu0 %v5210_v42 }
 0x519   :  { %5114 = vmatpush3.msra.mxu0 %v4402_v60 }
 0x51a   :  { %5115 = vmatprep.subr.mxu0 %v5210_v42 }
 0x51b   :  { %5116 = vmatpush3.msra.mxu0 %v4401_v10 }
 0x51c   :  { %5117 = vmatprep.subr.mxu0 %v5210_v42 }
 0x51d   :  { %5118 = vmatpush3.msra.mxu0 %v4400_v15 }
 0x51e   :  { %5119 = vmatprep.subr.mxu0 %v5210_v42 }
 0x51f   :  { %5120 = vmatpush3.msra.mxu0 %v4399_v23 }
 0x5c0   :  { %v4857_v26 = vpop.f32.mrf.mxu0 }
 0x5c2   :  { %v4858_v13 = vpop.f32.mrf.mxu0  ;;  %v4892_v41 = vpop.f32.mrf.mxu1 }
 0x5c3   :  { %v4859_v6 = vadd.f32 %v4858_v13, %v4857_v26 }
 0x5c4   :  { %v4893_v63 = vpop.f32.mrf.mxu1 }
 0x5c5   :  { %v4325_v35 = vadd.f32 %v4859_v6, %v4602_v40  ;;  %v4894_v14 = vadd.f32 %v4893_v63, %v4892_v41 }
 0x5c7   :  { %v4395_v11 = vadd.f32 %v4894_v14, %v4325_v35 }
 0x5c9   :  { %v4398_v22 = vmax.f32 %v4395_v11, 0.0 }
 0x5cb   :  { %5122 = vmatmul.mubr.f32.vlgmr.msra.gmra.mxu0 %v4398_v22 }
 0x68b   :  { %v4488_v42 = vpop.f32.mrf.mxu0 }
 0x68c   :  { %v4489_v43 = vadd.f32 %v4603_v36, %v4488_v42 }
 0x68d   :  { %v5123_v53 = vpop.f32.mrf.mxu0 }
 0x68e   :  { %5144 = vtanh.f32 %v4489_v43 }
 0x69b   :  { %v5145_v61 = vpop.eup %5144 }
 0x69c   :  { %v4495_v39 = vmul.f32 %v5145_v61, %v4494_v46 }
 0x69e   :  { %v4498_v17 = vadd.f32 %v4497_v44, %v4495_v39 }
 0x6a0   :  { %4500 = vst.msk [vmem:[#allocation16] sm:$0x3] %vm4499_vm6, %v4498_v17 }
 0x6a1   :  { %5190 = shalt.err (!%p5187_p0)
}
 0x6a2   :  { %4510 = dma.vmem_to_hbm [thread:$0]  %s4508_s28, 32, %s7456_s12, [#allocation13]  }
 0x6a3   :  { %5203 = dma.done.wait [#allocation13], 32  }
 0x6a4   :  { %5204 = vsyncadd [#allocation13], 4294967264 }
 0x6a5   :  { %4514 = vsyncpa [#allocation12], 1 }
 0x6a6   :  { %4515 = vsyncpa [#allocation13], 1 }
 0x6a7   :  { %4516 = vsyncpa [#allocation14], 1 }

</bundles_post_ra>
